<compile_context>
chip_gen: v7x
topology: tpu7x:2x2x1
jax: 0.10.0
libtpu: 0.0.40
codegen_flags: <defaults>
</compile_context>

<pallas_src>
import math

import jax
import jax.numpy as jnp
from jax.experimental import pallas as pl
from jax.experimental.pallas import tpu as pltpu

EPS = 1e-5                              # BatchNorm1d eps
BN_SCALE = 1.0 / math.sqrt(1.0 + EPS)   # eval-mode BN with default stats
LANE = 128


def _prelu(x, a):
    return jnp.where(x >= 0, x, a * x)


def _vmem_capacity_bytes():
    try:
        return int(pltpu.get_tpu_info().vmem_capacity_bytes)
    except Exception:
        return 64 << 20                 # v7x per-TC VMEM (smallest of the gens)


# ---------------------------------------------------------------------------
# Fused forward: whole SIGNV3 in one pallas_call
# ---------------------------------------------------------------------------
def sign_v3_forward(params, feats, alpha, bns=True, *, tile_n=None,
                    use_bf16_matmul=False, pad_out_lanes=True):
    alpha = float(alpha)
    num_hops = len(feats)
    N, S, D = feats[0].shape
    feat_itemsize = feats[0].dtype.itemsize

    agg = jnp.stack(params["agg"], axis=0)                       # [H, S, D]

    # ---- per-hop FeedForwardNet weights: fold BN scale, stack over hops ----
    n1 = len(params["ffn"][0]["layers"])
    ffn_ws, ffn_shifts = [], []
    for i in range(n1):
        ws, shs = [], []
        for hop in params["ffn"]:
            w = hop["layers"][i]["w"]
            b = hop["layers"][i]["b"]
            if i < n1 - 1 and bns:          # hidden Linear followed by BN
                w = w * BN_SCALE
                b = b * BN_SCALE
            ws.append(w)
            shs.append(b)
        ffn_ws.append(jnp.stack(ws, axis=0))         # [H, din_i, dout_i]
        ffn_shifts.append(jnp.stack(shs, axis=0))    # [H, dout_i]
    hid = ffn_ws[-1].shape[-1]                       # per-hop FFN output dim

    # ---- lr_output (3x FeedForwardNetII): fold BN scale into weights -------
    lr_blocks = []                     # per block: list of (kind, residual, W)
    for blk in params["lr_output"]:
        layers = []
        for layer in blk["layers"]:
            kind, w = layer["kind"], layer["w"]
            if kind == "dense" or bns:     # Dense always has BN; GC iff bns
                w = w * BN_SCALE
            layers.append((kind, w.shape[0] == w.shape[1], w))
        lr_blocks.append(layers)

    # First lr layer consumes the concatenated hop features; split its weight
    # per hop so the kernel never materializes the concat (prelu(cat) @ W0 ==
    # sum_h prelu(h_h) @ W0_h).  TODO(synk): for hid < MXU K depth a padded
    # concat-K scratch matmul would fill the MXU better than the per-hop split.
    k0, res0, w0 = lr_blocks[0][0]
    assert k0 == "dense" and w0.shape[0] == num_hops * hid and not res0, (
        "SIGNV3's first lr_output layer is Dense(num_hops*hidden, nh//2); "
        "it is never square")
    lr0_w = jnp.stack([w0[h * hid:(h + 1) * hid, :] for h in range(num_hops)],
                      axis=0)                        # [H, hid, dout0]

    lr_rest, lr_plan = [], []          # remaining lr weights (flat) + metadata
    for bi, layers in enumerate(lr_blocks):
        plan = []
        for kind, res, w in (layers[1:] if bi == 0 else layers):
            lr_rest.append(w)
            plan.append((kind, res))
        lr_plan.append(plan)
    n_rest = len(lr_rest)
    nclass = int((lr_rest[-1] if lr_rest else w0).shape[-1])

    # ---- lane-dense output: zero-pad the last weight's columns to 128 ------
    pad_out = 0
    if pad_out_lanes and n_rest > 0:
        last_res = lr_plan[-1][-1][1]
        if (not last_res) and (nclass % LANE != 0):
            nclass_pad = ((nclass + LANE - 1) // LANE) * LANE
            pad_out = nclass_pad - nclass
            lr_rest[-1] = jnp.pad(lr_rest[-1], ((0, 0), (0, pad_out)))
    nclass_out = nclass + pad_out

    # PReLU slopes: trace-time Python constants (nn.PReLU default 0.25).
    prelu_ffn = [float(hop["prelu"]) for hop in params["ffn"]]
    prelu_sign = float(params["sign_prelu"])
    prelu_lr = [float(blk["prelu"]) for blk in params["lr_output"]]

    # Optional bf16 matmul path: cast weights ONCE wrapper-side.
    mm_dtype = jnp.bfloat16 if use_bf16_matmul else None
    if mm_dtype is not None:
        ffn_ws = [w.astype(mm_dtype) for w in ffn_ws]
        lr0_w = lr0_w.astype(mm_dtype)
        lr_rest = [w.astype(mm_dtype) for w in lr_rest]

    def mm(a, b):
        if mm_dtype is not None:
            a = a.astype(mm_dtype)
        return jnp.dot(a, b, preferred_element_type=jnp.float32)

    # ---- the single fused kernel -------------------------------------------
    def kernel(*refs):
        it = iter(refs)
        feat_refs = [next(it) for _ in range(num_hops)]  # each [tile_n, S, D]
        agg_ref = next(it)                           # [H, S, D]
        fw_refs = [next(it) for _ in range(n1)]      # [H, din_i, dout_i]
        fs_refs = [next(it) for _ in range(n1)]      # [H, dout_i]
        lr0_ref = next(it)                           # [H, hid, dout0]
        lw_refs = [next(it) for _ in range(n_rest)]  # [din, dout]
        out_ref = next(it)                           # [tile_n, nclass_out]

        # 1) hop aggregation + per-hop FFN + SIGN PReLU + first lr Dense,
        #    fused: acc = sum_h prelu(ffn_h(agg_h(feat_h))) @ W0_h
        acc = None
        for h in range(num_hops):
            x = jnp.sum(feat_refs[h][...] * agg_ref[h], axis=1)   # [tn, D]
            for i in range(n1):
                y = mm(x, fw_refs[i][h]) + fs_refs[i][pl.ds(h, 1), :]
                if i < n1 - 1:                       # Linear -> (BN) -> PReLU
                    y = _prelu(y, prelu_ffn[h])
                x = y
            t = mm(_prelu(x, prelu_sign), lr0_ref[h])
            acc = t if acc is None else acc + t

        # 2) rest of lr_output block 0
        h0 = acc
        x = acc
        wi = 0
        a_blk = prelu_lr[0]
        for kind, res in lr_plan[0]:
            xp = _prelu(x, a_blk)
            sup = (1.0 - alpha) * xp + alpha * h0 if kind == "gc" else xp
            y = mm(sup, lw_refs[wi][...]); wi += 1
            if res:
                y = y + xp
            x = y

        # 3) remaining FeedForwardNetII blocks
        for bi in range(1, len(lr_plan)):
            a_blk = prelu_lr[bi]
            plan = lr_plan[bi]
            _, r0 = plan[0]                          # layer 0: Dense (no prelu)
            y = mm(x, lw_refs[wi][...]); wi += 1
            if r0:
                y = y + x
            h0 = y
            x = y
            for kind, res in plan[1:]:
                xp = _prelu(x, a_blk)
                sup = (1.0 - alpha) * xp + alpha * h0 if kind == "gc" else xp
                y = mm(sup, lw_refs[wi][...]); wi += 1
                if res:
                    y = y + xp
                x = y

        out_ref[...] = x.astype(out_ref.dtype)

    # ---- tile_n / VMEM budgeting --------------------------------------------
    weights = [agg] + ffn_ws + ffn_shifts + [lr0_w] + lr_rest

    def nbytes(a):
        return a.size * a.dtype.itemsize

    WEIGHT_BUFS = 2        # conservative (covers the double-buffered fallback)
    weight_bytes = sum(nbytes(a) for a in weights)
    max_w = max([D, hid] + [int(w.shape[-1]) for w in [lr0_w] + lr_rest])
    feat_row_bytes = num_hops * S * D * feat_itemsize    # streamed feats / row
    out_row_bytes = nclass_out * 4
    act_row_bytes = 4 * (S * D + 4 * max_w)              # live activations est.
    bytes_per_row = 2 * feat_row_bytes + 2 * out_row_bytes + act_row_bytes

    vmem_cap = _vmem_capacity_bytes()
    budget = int(vmem_cap * 0.6)                         # leave headroom
    avail = budget - WEIGHT_BUFS * weight_bytes - (1 << 20)
    tile_cap = max(8, avail // max(1, bytes_per_row))

    if tile_n is None:
        tile_n = min(N, tile_cap, 2048)
        if tile_n >= N and N > 8:
            # whole problem fits in one tile: still split in two so v7x's
            # second TensorCore gets work on the 'parallel' row axis.
            tile_n = min(N, (((N + 1) // 2) + 7) // 8 * 8)
    if tile_n < N:
        tile_n = max(8, (tile_n // 8) * 8)               # f32 sublane multiple
    else:
        tile_n = N
    grid = (pl.cdiv(N, tile_n),)

    est = (WEIGHT_BUFS * weight_bytes
           + 2 * num_hops * tile_n * S * D * feat_itemsize   # feats dbl-buffer
           + 2 * tile_n * nclass_out * 4                     # output dbl-buffer
           + tile_n * act_row_bytes                          # live activations
           + (1 << 20))                                      # slack
    cp_kwargs = dict(dimension_semantics=("parallel",))
    if est > (8 << 20):
        # never clamp below the estimate; cap at physical VMEM.
        cp_kwargs["vmem_limit_bytes"] = min(int(est * 1.5), vmem_cap)

    # ---- BlockSpecs / call ---------------------------------------------------
    def _run(single_buffer_weights):
        def const_spec(a):
            nd = a.ndim
            imap = lambda i, nd=nd: (0,) * nd
            if single_buffer_weights:
                return pl.BlockSpec(a.shape, imap,
                                    pipeline_mode=pl.Buffered(1))
            return pl.BlockSpec(a.shape, imap)

        feat_spec = pl.BlockSpec((tile_n, S, D), lambda i: (i, 0, 0))
        in_specs = [feat_spec] * num_hops + [const_spec(a) for a in weights]
        out_spec = pl.BlockSpec((tile_n, nclass_out), lambda i: (i, 0))

        out = pl.pallas_call(
            kernel,
            out_shape=jax.ShapeDtypeStruct((N, nclass_out), jnp.float32),
            grid=grid,
            in_specs=in_specs,
            out_specs=out_spec,
            compiler_params=pltpu.CompilerParams(**cp_kwargs),
        )(*feats, *weights)
        return jax.block_until_ready(out)

    try:
        out = _run(True)           # resident weights: single-buffered
    except Exception:              # pl.Buffered(1) unsupported -> plain specs
        out = _run(False)

    if pad_out > 0:
        out = out[:, :nclass]
    return out


# ---------------------------------------------------------------------------
# Pure-JAX reference (independent, mirrors the PyTorch module structure)
# ---------------------------------------------------------------------------
def sign_v3_forward_ref(params, feats, alpha, bns=True):
    def bn(x):                            # eval-mode BatchNorm1d, fresh init
        return x * BN_SCALE

    def prelu(x, a):
        return jnp.where(x >= 0, x, a * x)

    new_feats = [jnp.sum(f * w[None, :, :], axis=1)
                 for f, w in zip(feats, params["agg"])]

    hidden = []
    for x, ff in zip(new_feats, params["ffn"]):
        n = len(ff["layers"])
        for i, layer in enumerate(ff["layers"]):
            x = x @ layer["w"] + layer["b"]
            if i < n - 1:
                if bns:
                    x = bn(x)
                x = prelu(x, ff["prelu"])
        hidden.append(x)

    h = jnp.concatenate(hidden, axis=-1)
    h = prelu(h, params["sign_prelu"])

    for blk in params["lr_output"]:
        layers = blk["layers"]
        l0 = layers[0]
        y = bn(h @ l0["w"])                          # Dense: bias='bn' always
        if l0["w"].shape[0] == l0["w"].shape[1]:
            y = y + h
        h0 = y
        x = y
        for layer in layers[1:]:
            xp = prelu(x, blk["prelu"])
            if layer["kind"] == "gc":
                sup = (1.0 - alpha) * xp + alpha * h0
                y = sup @ layer["w"]
                if bns:
                    y = bn(y)
            else:
                y = bn(xp @ layer["w"])              # Dense: BN always
            if layer["w"].shape[0] == layer["w"].shape[1]:
                y = y + xp
            x = y
        h = x
    return h


# ---------------------------------------------------------------------------
# Parameter init (deterministic, mirrors the PyTorch __init__ distributions)
# ---------------------------------------------------------------------------
def xavier_uniform(key, shape, gain=1.0):
    fan_in, fan_out = shape
    bound = gain * math.sqrt(6.0 / (fan_in + fan_out))
    return jax.random.uniform(key, shape, jnp.float32, -bound, bound)


def uniform_stdv(key, shape, stdv):
    return jax.random.uniform(key, shape, jnp.float32, -stdv, stdv)


def init_sign_v3(key, cfg):
    subset_dim, feat_dim = cfg["subset_dim"], cfg["feat_dim"]
    hidden, nclass = cfg["hidden"], cfg["nclass"]
    num_hops = cfg["num_hops"]
    n_layers_1, n_layers_2 = cfg["n_layers_1"], cfg["n_layers_2"]

    keys = iter(jax.random.split(key, 256))
    params = {}

    # agg_feats: xavier_uniform [subset_dim, feat_dim]
    params["agg"] = [xavier_uniform(next(keys), (subset_dim, feat_dim))
                     for _ in range(num_hops)]

    # FeedForwardNet per hop (xavier_uniform with relu gain, zero bias)
    gain_relu = math.sqrt(2.0)
    ffns = []
    for _ in range(num_hops):
        if n_layers_1 == 1:
            dims = [(feat_dim, hidden)]
        else:
            dims = ([(feat_dim, hidden)]
                    + [(hidden, hidden)] * (n_layers_1 - 2)
                    + [(hidden, hidden)])
        layers = [{"w": xavier_uniform(next(keys), d, gain_relu),
                   "b": jnp.zeros((d[1],), jnp.float32)} for d in dims]
        ffns.append({"layers": layers, "prelu": 0.25})
    params["ffn"] = ffns
    params["sign_prelu"] = 0.25

    # lr_output: three FeedForwardNetII blocks
    nh = num_hops * hidden
    ffnii_cfgs = [(nh, nh // 2, nh // 2),
                  (nh // 2, nh // 4, nh // 4),
                  (nh // 4, hidden, nclass)]
    lr = []
    for fin, fh, fout in ffnii_cfgs:
        if n_layers_2 == 1:
            layer_dims = [("dense", fin, fout)]
        else:
            layer_dims = ([("dense", fin, fh)]
                          + [("gc", fh, fh)] * (n_layers_2 - 2)
                          + [("dense", fh, fout)])
        layers = []
        for kind, din, dout in layer_dims:
            stdv = 1.0 / math.sqrt(dout)
            layers.append({"kind": kind,
                           "w": uniform_stdv(next(keys), (din, dout), stdv)})
        lr.append({"layers": layers, "prelu": 0.25})
    params["lr_output"] = lr
    return params


# ---------------------------------------------------------------------------
if __name__ == "__main__":
    cfg = dict(subset_dim=4, feat_dim=32, hidden=32, nclass=8,
               num_hops=3, n_layers_1=2, n_layers_2=3)
    alpha = 0.5
    N = 16

    key = jax.random.PRNGKey(0)
    pkey, dkey = jax.random.split(key)
    params = init_sign_v3(pkey, cfg)

    fkeys = jax.random.split(dkey, cfg["num_hops"])
    feats = [jax.random.normal(k, (N, cfg["subset_dim"], cfg["feat_dim"]),
                               jnp.float32) for k in fkeys]

    out = sign_v3_forward(params, feats, alpha)
    out = jax.block_until_ready(out)
    assert out.shape == (N, cfg["nclass"])

    # independent pure-JAX reference following the PyTorch layer structure
    ref = sign_v3_forward_ref(params, feats, alpha)
    assert jnp.allclose(out, ref, rtol=2e-3, atol=2e-3), "mismatch vs reference"

    print("KERNEL_OK")
</pallas_src>

<mosaic_0001>
module attributes {stable_mosaic.version = 11 : i64} {
  func.func @kernel(%arg0: i32, %arg1: memref<8x4x32xf32, #tpu.memory_space<vmem>>, %arg2: memref<8x4x32xf32, #tpu.memory_space<vmem>>, %arg3: memref<8x4x32xf32, #tpu.memory_space<vmem>>, %arg4: memref<3x4x32xf32, #tpu.memory_space<vmem>>, %arg5: memref<3x32x32xf32, #tpu.memory_space<vmem>>, %arg6: memref<3x32x32xf32, #tpu.memory_space<vmem>>, %arg7: memref<3x32xf32, #tpu.memory_space<vmem>>, %arg8: memref<3x32xf32, #tpu.memory_space<vmem>>, %arg9: memref<3x32x48xf32, #tpu.memory_space<vmem>>, %arg10: memref<48x48xf32, #tpu.memory_space<vmem>>, %arg11: memref<48x48xf32, #tpu.memory_space<vmem>>, %arg12: memref<48x24xf32, #tpu.memory_space<vmem>>, %arg13: memref<24x24xf32, #tpu.memory_space<vmem>>, %arg14: memref<24x24xf32, #tpu.memory_space<vmem>>, %arg15: memref<24x32xf32, #tpu.memory_space<vmem>>, %arg16: memref<32x32xf32, #tpu.memory_space<vmem>>, %arg17: memref<32x128xf32, #tpu.memory_space<vmem>>, %arg18: memref<8x128xf32, #tpu.memory_space<vmem>>) attributes {dimension_semantics = [#tpu.dimension_semantics<parallel>], iteration_bounds = array<i64: 2>, scalar_prefetch = 0 : i64, scratch_operands = 0 : i64, tpu.core_type = #tpu.core_type<tc>, window_params = [{transform_indices = @transform_0, window_bounds = array<i64: 8, 4, 32>}, {transform_indices = @transform_1, window_bounds = array<i64: 8, 4, 32>}, {transform_indices = @transform_2, window_bounds = array<i64: 8, 4, 32>}, {pipeline_mode = #tpu.pipeline_mode<synchronous>, transform_indices = @transform_3, window_bounds = array<i64: 3, 4, 32>}, {pipeline_mode = #tpu.pipeline_mode<synchronous>, transform_indices = @transform_4, window_bounds = array<i64: 3, 32, 32>}, {pipeline_mode = #tpu.pipeline_mode<synchronous>, transform_indices = @transform_5, window_bounds = array<i64: 3, 32, 32>}, {pipeline_mode = #tpu.pipeline_mode<synchronous>, transform_indices = @transform_6, window_bounds = array<i64: 3, 32>}, {pipeline_mode = #tpu.pipeline_mode<synchronous>, transform_indices = @transform_7, window_bounds = array<i64: 3, 32>}, {pipeline_mode = #tpu.pipeline_mode<synchronous>, transform_indices = @transform_8, window_bounds = array<i64: 3, 32, 48>}, {pipeline_mode = #tpu.pipeline_mode<synchronous>, transform_indices = @transform_9, window_bounds = array<i64: 48, 48>}, {pipeline_mode = #tpu.pipeline_mode<synchronous>, transform_indices = @transform_10, window_bounds = array<i64: 48, 48>}, {pipeline_mode = #tpu.pipeline_mode<synchronous>, transform_indices = @transform_11, window_bounds = array<i64: 48, 24>}, {pipeline_mode = #tpu.pipeline_mode<synchronous>, transform_indices = @transform_12, window_bounds = array<i64: 24, 24>}, {pipeline_mode = #tpu.pipeline_mode<synchronous>, transform_indices = @transform_13, window_bounds = array<i64: 24, 24>}, {pipeline_mode = #tpu.pipeline_mode<synchronous>, transform_indices = @transform_14, window_bounds = array<i64: 24, 32>}, {pipeline_mode = #tpu.pipeline_mode<synchronous>, transform_indices = @transform_15, window_bounds = array<i64: 32, 32>}, {pipeline_mode = #tpu.pipeline_mode<synchronous>, transform_indices = @transform_16, window_bounds = array<i64: 32, 128>}, {transform_indices = @transform_17, window_bounds = array<i64: 8, 128>}]} {
    %c0 = arith.constant 0 : index
    %c0_0 = arith.constant 0 : index
    %c0_1 = arith.constant 0 : index
    %0 = vector.load %arg1[%c0, %c0_0, %c0_1] : memref<8x4x32xf32, #tpu.memory_space<vmem>>, vector<8x4x32xf32>
    %c0_2 = arith.constant 0 : index
    %c0_3 = arith.constant 0 : index
    %c0_4 = arith.constant 0 : index
    %1 = vector.load %arg4[%c0_2, %c0_3, %c0_4] : memref<3x4x32xf32, #tpu.memory_space<vmem>>, vector<1x4x32xf32>
    %2 = vector.shape_cast %1 : vector<1x4x32xf32> to vector<4x32xf32>
    %3 = vector.shape_cast %2 : vector<4x32xf32> to vector<1x4x32xf32>
    %4 = vector.broadcast %3 : vector<1x4x32xf32> to vector<8x4x32xf32>
    %5 = arith.mulf %0, %4 : vector<8x4x32xf32>
    %cst = arith.constant dense<0.000000e+00> : vector<8x32xf32>
    %6 = vector.multi_reduction <add>, %5, %cst [1] : vector<8x4x32xf32> to vector<8x32xf32>
    %c0_5 = arith.constant 0 : index
    %c0_6 = arith.constant 0 : index
    %c0_7 = arith.constant 0 : index
    %7 = vector.load %arg5[%c0_5, %c0_6, %c0_7] : memref<3x32x32xf32, #tpu.memory_space<vmem>>, vector<1x32x32xf32>
    %8 = vector.shape_cast %7 : vector<1x32x32xf32> to vector<32x32xf32>
    %cst_8 = arith.constant dense<0.000000e+00> : vector<8x32xf32>
    %9 = tpu.matmul %6, %8, %cst_8 {dimension_numbers = #tpu.dot_dimension_numbers<[1], [0], [0], [1], [0, 0, 1, 1], [], []>} : vector<8x32xf32>, vector<32x32xf32>, vector<8x32xf32> -> vector<8x32xf32>
    %c0_9 = arith.constant 0 : index
    %c0_10 = arith.constant 0 : index
    %10 = vector.load %arg7[%c0_9, %c0_10] : memref<3x32xf32, #tpu.memory_space<vmem>>, vector<1x32xf32>
    %11 = vector.broadcast %10 : vector<1x32xf32> to vector<8x32xf32>
    %12 = arith.addf %9, %11 : vector<8x32xf32>
    %cst_11 = arith.constant 0.000000e+00 : f32
    %13 = vector.broadcast %cst_11 : f32 to vector<8x32xf32>
    %14 = arith.cmpf oge, %12, %13 : vector<8x32xf32>
    %cst_12 = arith.constant 2.500000e-01 : f32
    %15 = vector.broadcast %cst_12 : f32 to vector<8x32xf32>
    %16 = arith.mulf %15, %12 : vector<8x32xf32>
    %17 = arith.select %14, %12, %16 : vector<8x32xi1>, vector<8x32xf32>
    %c0_13 = arith.constant 0 : index
    %c0_14 = arith.constant 0 : index
    %c0_15 = arith.constant 0 : index
    %18 = vector.load %arg6[%c0_13, %c0_14, %c0_15] : memref<3x32x32xf32, #tpu.memory_space<vmem>>, vector<1x32x32xf32>
    %19 = vector.shape_cast %18 : vector<1x32x32xf32> to vector<32x32xf32>
    %cst_16 = arith.constant dense<0.000000e+00> : vector<8x32xf32>
    %20 = tpu.matmul %17, %19, %cst_16 {dimension_numbers = #tpu.dot_dimension_numbers<[1], [0], [0], [1], [0, 0, 1, 1], [], []>} : vector<8x32xf32>, vector<32x32xf32>, vector<8x32xf32> -> vector<8x32xf32>
    %c0_17 = arith.constant 0 : index
    %c0_18 = arith.constant 0 : index
    %21 = vector.load %arg8[%c0_17, %c0_18] : memref<3x32xf32, #tpu.memory_space<vmem>>, vector<1x32xf32>
    %22 = vector.broadcast %21 : vector<1x32xf32> to vector<8x32xf32>
    %23 = arith.addf %20, %22 : vector<8x32xf32>
    %cst_19 = arith.constant 0.000000e+00 : f32
    %24 = vector.broadcast %cst_19 : f32 to vector<8x32xf32>
    %25 = arith.cmpf oge, %23, %24 : vector<8x32xf32>
    %cst_20 = arith.constant 2.500000e-01 : f32
    %26 = vector.broadcast %cst_20 : f32 to vector<8x32xf32>
    %27 = arith.mulf %26, %23 : vector<8x32xf32>
    %28 = arith.select %25, %23, %27 : vector<8x32xi1>, vector<8x32xf32>
    %c0_21 = arith.constant 0 : index
    %c0_22 = arith.constant 0 : index
    %c0_23 = arith.constant 0 : index
    %29 = vector.load %arg9[%c0_21, %c0_22, %c0_23] : memref<3x32x48xf32, #tpu.memory_space<vmem>>, vector<1x32x48xf32>
    %30 = vector.shape_cast %29 : vector<1x32x48xf32> to vector<32x48xf32>
    %cst_24 = arith.constant dense<0.000000e+00> : vector<8x48xf32>
    %31 = tpu.matmul %28, %30, %cst_24 {dimension_numbers = #tpu.dot_dimension_numbers<[1], [0], [0], [1], [0, 0, 1, 1], [], []>} : vector<8x32xf32>, vector<32x48xf32>, vector<8x48xf32> -> vector<8x48xf32>
    %c0_25 = arith.constant 0 : index
    %c0_26 = arith.constant 0 : index
    %c0_27 = arith.constant 0 : index
    %32 = vector.load %arg2[%c0_25, %c0_26, %c0_27] : memref<8x4x32xf32, #tpu.memory_space<vmem>>, vector<8x4x32xf32>
    %c1 = arith.constant 1 : index
    %c0_28 = arith.constant 0 : index
    %c0_29 = arith.constant 0 : index
    %33 = vector.load %arg4[%c1, %c0_28, %c0_29] : memref<3x4x32xf32, #tpu.memory_space<vmem>>, vector<1x4x32xf32>
    %34 = vector.shape_cast %33 : vector<1x4x32xf32> to vector<4x32xf32>
    %35 = vector.shape_cast %34 : vector<4x32xf32> to vector<1x4x32xf32>
    %36 = vector.broadcast %35 : vector<1x4x32xf32> to vector<8x4x32xf32>
    %37 = arith.mulf %32, %36 : vector<8x4x32xf32>
    %cst_30 = arith.constant dense<0.000000e+00> : vector<8x32xf32>
    %38 = vector.multi_reduction <add>, %37, %cst_30 [1] : vector<8x4x32xf32> to vector<8x32xf32>
    %c1_31 = arith.constant 1 : index
    %c0_32 = arith.constant 0 : index
    %c0_33 = arith.constant 0 : index
    %39 = vector.load %arg5[%c1_31, %c0_32, %c0_33] : memref<3x32x32xf32, #tpu.memory_space<vmem>>, vector<1x32x32xf32>
    %40 = vector.shape_cast %39 : vector<1x32x32xf32> to vector<32x32xf32>
    %cst_34 = arith.constant dense<0.000000e+00> : vector<8x32xf32>
    %41 = tpu.matmul %38, %40, %cst_34 {dimension_numbers = #tpu.dot_dimension_numbers<[1], [0], [0], [1], [0, 0, 1, 1], [], []>} : vector<8x32xf32>, vector<32x32xf32>, vector<8x32xf32> -> vector<8x32xf32>
    %c1_35 = arith.constant 1 : index
    %c0_36 = arith.constant 0 : index
    %42 = vector.load %arg7[%c1_35, %c0_36] : memref<3x32xf32, #tpu.memory_space<vmem>>, vector<1x32xf32>
    %43 = vector.broadcast %42 : vector<1x32xf32> to vector<8x32xf32>
    %44 = arith.addf %41, %43 : vector<8x32xf32>
    %cst_37 = arith.constant 0.000000e+00 : f32
    %45 = vector.broadcast %cst_37 : f32 to vector<8x32xf32>
    %46 = arith.cmpf oge, %44, %45 : vector<8x32xf32>
    %cst_38 = arith.constant 2.500000e-01 : f32
    %47 = vector.broadcast %cst_38 : f32 to vector<8x32xf32>
    %48 = arith.mulf %47, %44 : vector<8x32xf32>
    %49 = arith.select %46, %44, %48 : vector<8x32xi1>, vector<8x32xf32>
    %c1_39 = arith.constant 1 : index
    %c0_40 = arith.constant 0 : index
    %c0_41 = arith.constant 0 : index
    %50 = vector.load %arg6[%c1_39, %c0_40, %c0_41] : memref<3x32x32xf32, #tpu.memory_space<vmem>>, vector<1x32x32xf32>
    %51 = vector.shape_cast %50 : vector<1x32x32xf32> to vector<32x32xf32>
    %cst_42 = arith.constant dense<0.000000e+00> : vector<8x32xf32>
    %52 = tpu.matmul %49, %51, %cst_42 {dimension_numbers = #tpu.dot_dimension_numbers<[1], [0], [0], [1], [0, 0, 1, 1], [], []>} : vector<8x32xf32>, vector<32x32xf32>, vector<8x32xf32> -> vector<8x32xf32>
    %c1_43 = arith.constant 1 : index
    %c0_44 = arith.constant 0 : index
    %53 = vector.load %arg8[%c1_43, %c0_44] : memref<3x32xf32, #tpu.memory_space<vmem>>, vector<1x32xf32>
    %54 = vector.broadcast %53 : vector<1x32xf32> to vector<8x32xf32>
    %55 = arith.addf %52, %54 : vector<8x32xf32>
    %cst_45 = arith.constant 0.000000e+00 : f32
    %56 = vector.broadcast %cst_45 : f32 to vector<8x32xf32>
    %57 = arith.cmpf oge, %55, %56 : vector<8x32xf32>
    %cst_46 = arith.constant 2.500000e-01 : f32
    %58 = vector.broadcast %cst_46 : f32 to vector<8x32xf32>
    %59 = arith.mulf %58, %55 : vector<8x32xf32>
    %60 = arith.select %57, %55, %59 : vector<8x32xi1>, vector<8x32xf32>
    %c1_47 = arith.constant 1 : index
    %c0_48 = arith.constant 0 : index
    %c0_49 = arith.constant 0 : index
    %61 = vector.load %arg9[%c1_47, %c0_48, %c0_49] : memref<3x32x48xf32, #tpu.memory_space<vmem>>, vector<1x32x48xf32>
    %62 = vector.shape_cast %61 : vector<1x32x48xf32> to vector<32x48xf32>
    %cst_50 = arith.constant dense<0.000000e+00> : vector<8x48xf32>
    %63 = tpu.matmul %60, %62, %cst_50 {dimension_numbers = #tpu.dot_dimension_numbers<[1], [0], [0], [1], [0, 0, 1, 1], [], []>} : vector<8x32xf32>, vector<32x48xf32>, vector<8x48xf32> -> vector<8x48xf32>
    %64 = arith.addf %31, %63 : vector<8x48xf32>
    %c0_51 = arith.constant 0 : index
    %c0_52 = arith.constant 0 : index
    %c0_53 = arith.constant 0 : index
    %65 = vector.load %arg3[%c0_51, %c0_52, %c0_53] : memref<8x4x32xf32, #tpu.memory_space<vmem>>, vector<8x4x32xf32>
    %c2 = arith.constant 2 : index
    %c0_54 = arith.constant 0 : index
    %c0_55 = arith.constant 0 : index
    %66 = vector.load %arg4[%c2, %c0_54, %c0_55] : memref<3x4x32xf32, #tpu.memory_space<vmem>>, vector<1x4x32xf32>
    %67 = vector.shape_cast %66 : vector<1x4x32xf32> to vector<4x32xf32>
    %68 = vector.shape_cast %67 : vector<4x32xf32> to vector<1x4x32xf32>
    %69 = vector.broadcast %68 : vector<1x4x32xf32> to vector<8x4x32xf32>
    %70 = arith.mulf %65, %69 : vector<8x4x32xf32>
    %cst_56 = arith.constant dense<0.000000e+00> : vector<8x32xf32>
    %71 = vector.multi_reduction <add>, %70, %cst_56 [1] : vector<8x4x32xf32> to vector<8x32xf32>
    %c2_57 = arith.constant 2 : index
    %c0_58 = arith.constant 0 : index
    %c0_59 = arith.constant 0 : index
    %72 = vector.load %arg5[%c2_57, %c0_58, %c0_59] : memref<3x32x32xf32, #tpu.memory_space<vmem>>, vector<1x32x32xf32>
    %73 = vector.shape_cast %72 : vector<1x32x32xf32> to vector<32x32xf32>
    %cst_60 = arith.constant dense<0.000000e+00> : vector<8x32xf32>
    %74 = tpu.matmul %71, %73, %cst_60 {dimension_numbers = #tpu.dot_dimension_numbers<[1], [0], [0], [1], [0, 0, 1, 1], [], []>} : vector<8x32xf32>, vector<32x32xf32>, vector<8x32xf32> -> vector<8x32xf32>
    %c2_61 = arith.constant 2 : index
    %c0_62 = arith.constant 0 : index
    %75 = vector.load %arg7[%c2_61, %c0_62] : memref<3x32xf32, #tpu.memory_space<vmem>>, vector<1x32xf32>
    %76 = vector.broadcast %75 : vector<1x32xf32> to vector<8x32xf32>
    %77 = arith.addf %74, %76 : vector<8x32xf32>
    %cst_63 = arith.constant 0.000000e+00 : f32
    %78 = vector.broadcast %cst_63 : f32 to vector<8x32xf32>
    %79 = arith.cmpf oge, %77, %78 : vector<8x32xf32>
    %cst_64 = arith.constant 2.500000e-01 : f32
    %80 = vector.broadcast %cst_64 : f32 to vector<8x32xf32>
    %81 = arith.mulf %80, %77 : vector<8x32xf32>
    %82 = arith.select %79, %77, %81 : vector<8x32xi1>, vector<8x32xf32>
    %c2_65 = arith.constant 2 : index
    %c0_66 = arith.constant 0 : index
    %c0_67 = arith.constant 0 : index
    %83 = vector.load %arg6[%c2_65, %c0_66, %c0_67] : memref<3x32x32xf32, #tpu.memory_space<vmem>>, vector<1x32x32xf32>
    %84 = vector.shape_cast %83 : vector<1x32x32xf32> to vector<32x32xf32>
    %cst_68 = arith.constant dense<0.000000e+00> : vector<8x32xf32>
    %85 = tpu.matmul %82, %84, %cst_68 {dimension_numbers = #tpu.dot_dimension_numbers<[1], [0], [0], [1], [0, 0, 1, 1], [], []>} : vector<8x32xf32>, vector<32x32xf32>, vector<8x32xf32> -> vector<8x32xf32>
    %c2_69 = arith.constant 2 : index
    %c0_70 = arith.constant 0 : index
    %86 = vector.load %arg8[%c2_69, %c0_70] : memref<3x32xf32, #tpu.memory_space<vmem>>, vector<1x32xf32>
    %87 = vector.broadcast %86 : vector<1x32xf32> to vector<8x32xf32>
    %88 = arith.addf %85, %87 : vector<8x32xf32>
    %cst_71 = arith.constant 0.000000e+00 : f32
    %89 = vector.broadcast %cst_71 : f32 to vector<8x32xf32>
    %90 = arith.cmpf oge, %88, %89 : vector<8x32xf32>
    %cst_72 = arith.constant 2.500000e-01 : f32
    %91 = vector.broadcast %cst_72 : f32 to vector<8x32xf32>
    %92 = arith.mulf %91, %88 : vector<8x32xf32>
    %93 = arith.select %90, %88, %92 : vector<8x32xi1>, vector<8x32xf32>
    %c2_73 = arith.constant 2 : index
    %c0_74 = arith.constant 0 : index
    %c0_75 = arith.constant 0 : index
    %94 = vector.load %arg9[%c2_73, %c0_74, %c0_75] : memref<3x32x48xf32, #tpu.memory_space<vmem>>, vector<1x32x48xf32>
    %95 = vector.shape_cast %94 : vector<1x32x48xf32> to vector<32x48xf32>
    %cst_76 = arith.constant dense<0.000000e+00> : vector<8x48xf32>
    %96 = tpu.matmul %93, %95, %cst_76 {dimension_numbers = #tpu.dot_dimension_numbers<[1], [0], [0], [1], [0, 0, 1, 1], [], []>} : vector<8x32xf32>, vector<32x48xf32>, vector<8x48xf32> -> vector<8x48xf32>
    %97 = arith.addf %64, %96 : vector<8x48xf32>
    %cst_77 = arith.constant 0.000000e+00 : f32
    %98 = vector.broadcast %cst_77 : f32 to vector<8x48xf32>
    %99 = arith.cmpf oge, %97, %98 : vector<8x48xf32>
    %cst_78 = arith.constant 2.500000e-01 : f32
    %100 = vector.broadcast %cst_78 : f32 to vector<8x48xf32>
    %101 = arith.mulf %100, %97 : vector<8x48xf32>
    %102 = arith.select %99, %97, %101 : vector<8x48xi1>, vector<8x48xf32>
    %cst_79 = arith.constant 5.000000e-01 : f32
    %103 = vector.broadcast %cst_79 : f32 to vector<8x48xf32>
    %104 = arith.mulf %103, %102 : vector<8x48xf32>
    %cst_80 = arith.constant 5.000000e-01 : f32
    %105 = vector.broadcast %cst_80 : f32 to vector<8x48xf32>
    %106 = arith.mulf %105, %97 : vector<8x48xf32>
    %107 = arith.addf %104, %106 : vector<8x48xf32>
    %c0_81 = arith.constant 0 : index
    %c0_82 = arith.constant 0 : index
    %108 = vector.load %arg10[%c0_81, %c0_82] : memref<48x48xf32, #tpu.memory_space<vmem>>, vector<48x48xf32>
    %cst_83 = arith.constant dense<0.000000e+00> : vector<8x48xf32>
    %109 = tpu.matmul %107, %108, %cst_83 {dimension_numbers = #tpu.dot_dimension_numbers<[1], [0], [0], [1], [0, 0, 1, 1], [], []>} : vector<8x48xf32>, vector<48x48xf32>, vector<8x48xf32> -> vector<8x48xf32>
    %110 = arith.addf %109, %102 : vector<8x48xf32>
    %cst_84 = arith.constant 0.000000e+00 : f32
    %111 = vector.broadcast %cst_84 : f32 to vector<8x48xf32>
    %112 = arith.cmpf oge, %110, %111 : vector<8x48xf32>
    %cst_85 = arith.constant 2.500000e-01 : f32
    %113 = vector.broadcast %cst_85 : f32 to vector<8x48xf32>
    %114 = arith.mulf %113, %110 : vector<8x48xf32>
    %115 = arith.select %112, %110, %114 : vector<8x48xi1>, vector<8x48xf32>
    %c0_86 = arith.constant 0 : index
    %c0_87 = arith.constant 0 : index
    %116 = vector.load %arg11[%c0_86, %c0_87] : memref<48x48xf32, #tpu.memory_space<vmem>>, vector<48x48xf32>
    %cst_88 = arith.constant dense<0.000000e+00> : vector<8x48xf32>
    %117 = tpu.matmul %115, %116, %cst_88 {dimension_numbers = #tpu.dot_dimension_numbers<[1], [0], [0], [1], [0, 0, 1, 1], [], []>} : vector<8x48xf32>, vector<48x48xf32>, vector<8x48xf32> -> vector<8x48xf32>
    %118 = arith.addf %117, %115 : vector<8x48xf32>
    %c0_89 = arith.constant 0 : index
    %c0_90 = arith.constant 0 : index
    %119 = vector.load %arg12[%c0_89, %c0_90] : memref<48x24xf32, #tpu.memory_space<vmem>>, vector<48x24xf32>
    %cst_91 = arith.constant dense<0.000000e+00> : vector<8x24xf32>
    %120 = tpu.matmul %118, %119, %cst_91 {dimension_numbers = #tpu.dot_dimension_numbers<[1], [0], [0], [1], [0, 0, 1, 1], [], []>} : vector<8x48xf32>, vector<48x24xf32>, vector<8x24xf32> -> vector<8x24xf32>
    %cst_92 = arith.constant 0.000000e+00 : f32
    %121 = vector.broadcast %cst_92 : f32 to vector<8x24xf32>
    %122 = arith.cmpf oge, %120, %121 : vector<8x24xf32>
    %cst_93 = arith.constant 2.500000e-01 : f32
    %123 = vector.broadcast %cst_93 : f32 to vector<8x24xf32>
    %124 = arith.mulf %123, %120 : vector<8x24xf32>
    %125 = arith.select %122, %120, %124 : vector<8x24xi1>, vector<8x24xf32>
    %cst_94 = arith.constant 5.000000e-01 : f32
    %126 = vector.broadcast %cst_94 : f32 to vector<8x24xf32>
    %127 = arith.mulf %126, %125 : vector<8x24xf32>
    %cst_95 = arith.constant 5.000000e-01 : f32
    %128 = vector.broadcast %cst_95 : f32 to vector<8x24xf32>
    %129 = arith.mulf %128, %120 : vector<8x24xf32>
    %130 = arith.addf %127, %129 : vector<8x24xf32>
    %c0_96 = arith.constant 0 : index
    %c0_97 = arith.constant 0 : index
    %131 = vector.load %arg13[%c0_96, %c0_97] : memref<24x24xf32, #tpu.memory_space<vmem>>, vector<24x24xf32>
    %cst_98 = arith.constant dense<0.000000e+00> : vector<8x24xf32>
    %132 = tpu.matmul %130, %131, %cst_98 {dimension_numbers = #tpu.dot_dimension_numbers<[1], [0], [0], [1], [0, 0, 1, 1], [], []>} : vector<8x24xf32>, vector<24x24xf32>, vector<8x24xf32> -> vector<8x24xf32>
    %133 = arith.addf %132, %125 : vector<8x24xf32>
    %cst_99 = arith.constant 0.000000e+00 : f32
    %134 = vector.broadcast %cst_99 : f32 to vector<8x24xf32>
    %135 = arith.cmpf oge, %133, %134 : vector<8x24xf32>
    %cst_100 = arith.constant 2.500000e-01 : f32
    %136 = vector.broadcast %cst_100 : f32 to vector<8x24xf32>
    %137 = arith.mulf %136, %133 : vector<8x24xf32>
    %138 = arith.select %135, %133, %137 : vector<8x24xi1>, vector<8x24xf32>
    %c0_101 = arith.constant 0 : index
    %c0_102 = arith.constant 0 : index
    %139 = vector.load %arg14[%c0_101, %c0_102] : memref<24x24xf32, #tpu.memory_space<vmem>>, vector<24x24xf32>
    %cst_103 = arith.constant dense<0.000000e+00> : vector<8x24xf32>
    %140 = tpu.matmul %138, %139, %cst_103 {dimension_numbers = #tpu.dot_dimension_numbers<[1], [0], [0], [1], [0, 0, 1, 1], [], []>} : vector<8x24xf32>, vector<24x24xf32>, vector<8x24xf32> -> vector<8x24xf32>
    %141 = arith.addf %140, %138 : vector<8x24xf32>
    %c0_104 = arith.constant 0 : index
    %c0_105 = arith.constant 0 : index
    %142 = vector.load %arg15[%c0_104, %c0_105] : memref<24x32xf32, #tpu.memory_space<vmem>>, vector<24x32xf32>
    %cst_106 = arith.constant dense<0.000000e+00> : vector<8x32xf32>
    %143 = tpu.matmul %141, %142, %cst_106 {dimension_numbers = #tpu.dot_dimension_numbers<[1], [0], [0], [1], [0, 0, 1, 1], [], []>} : vector<8x24xf32>, vector<24x32xf32>, vector<8x32xf32> -> vector<8x32xf32>
    %cst_107 = arith.constant 0.000000e+00 : f32
    %144 = vector.broadcast %cst_107 : f32 to vector<8x32xf32>
    %145 = arith.cmpf oge, %143, %144 : vector<8x32xf32>
    %cst_108 = arith.constant 2.500000e-01 : f32
    %146 = vector.broadcast %cst_108 : f32 to vector<8x32xf32>
    %147 = arith.mulf %146, %143 : vector<8x32xf32>
    %148 = arith.select %145, %143, %147 : vector<8x32xi1>, vector<8x32xf32>
    %cst_109 = arith.constant 5.000000e-01 : f32
    %149 = vector.broadcast %cst_109 : f32 to vector<8x32xf32>
    %150 = arith.mulf %149, %148 : vector<8x32xf32>
    %cst_110 = arith.constant 5.000000e-01 : f32
    %151 = vector.broadcast %cst_110 : f32 to vector<8x32xf32>
    %152 = arith.mulf %151, %143 : vector<8x32xf32>
    %153 = arith.addf %150, %152 : vector<8x32xf32>
    %c0_111 = arith.constant 0 : index
    %c0_112 = arith.constant 0 : index
    %154 = vector.load %arg16[%c0_111, %c0_112] : memref<32x32xf32, #tpu.memory_space<vmem>>, vector<32x32xf32>
    %cst_113 = arith.constant dense<0.000000e+00> : vector<8x32xf32>
    %155 = tpu.matmul %153, %154, %cst_113 {dimension_numbers = #tpu.dot_dimension_numbers<[1], [0], [0], [1], [0, 0, 1, 1], [], []>} : vector<8x32xf32>, vector<32x32xf32>, vector<8x32xf32> -> vector<8x32xf32>
    %156 = arith.addf %155, %148 : vector<8x32xf32>
    %cst_114 = arith.constant 0.000000e+00 : f32
    %157 = vector.broadcast %cst_114 : f32 to vector<8x32xf32>
    %158 = arith.cmpf oge, %156, %157 : vector<8x32xf32>
    %cst_115 = arith.constant 2.500000e-01 : f32
    %159 = vector.broadcast %cst_115 : f32 to vector<8x32xf32>
    %160 = arith.mulf %159, %156 : vector<8x32xf32>
    %161 = arith.select %158, %156, %160 : vector<8x32xi1>, vector<8x32xf32>
    %c0_116 = arith.constant 0 : index
    %c0_117 = arith.constant 0 : index
    %162 = vector.load %arg17[%c0_116, %c0_117] : memref<32x128xf32, #tpu.memory_space<vmem>>, vector<32x128xf32>
    %cst_118 = arith.constant dense<0.000000e+00> : vector<8x128xf32>
    %163 = tpu.matmul %161, %162, %cst_118 {dimension_numbers = #tpu.dot_dimension_numbers<[1], [0], [0], [1], [0, 0, 1, 1], [], []>} : vector<8x32xf32>, vector<32x128xf32>, vector<8x128xf32> -> vector<8x128xf32>
    %c0_119 = arith.constant 0 : index
    %c0_120 = arith.constant 0 : index
    %164 = vector.load %arg18[%c0_119, %c0_120] : memref<8x128xf32, #tpu.memory_space<vmem>>, vector<8x128xf32>
    tpu.vector_store %arg18[%c0_119, %c0_120], %163 {strides = array<i32>} : memref<8x128xf32, #tpu.memory_space<vmem>>, vector<8x128xf32>,
    return
  }
  func.func @transform_0(%arg0: i32) -> (i32, i32, i32) {
    %c0_i32 = arith.constant 0 : i32
    %c0_i32_0 = arith.constant 0 : i32
    %c0_i32_1 = arith.constant 0 : i32
    return %arg0, %c0_i32, %c0_i32_0 : i32, i32, i32
  }
  func.func @transform_1(%arg0: i32) -> (i32, i32, i32) {
    %c0_i32 = arith.constant 0 : i32
    %c0_i32_0 = arith.constant 0 : i32
    %c0_i32_1 = arith.constant 0 : i32
    return %arg0, %c0_i32, %c0_i32_0 : i32, i32, i32
  }
  func.func @transform_2(%arg0: i32) -> (i32, i32, i32) {
    %c0_i32 = arith.constant 0 : i32
    %c0_i32_0 = arith.constant 0 : i32
    %c0_i32_1 = arith.constant 0 : i32
    return %arg0, %c0_i32, %c0_i32_0 : i32, i32, i32
  }
  func.func @transform_3(%arg0: i32) -> (i32, i32, i32) {
    %c0_i32 = arith.constant 0 : i32
    %c0_i32_0 = arith.constant 0 : i32
    %c0_i32_1 = arith.constant 0 : i32
    %c0_i32_2 = arith.constant 0 : i32
    return %c0_i32, %c0_i32_0, %c0_i32_1 : i32, i32, i32
  }
  func.func @transform_4(%arg0: i32) -> (i32, i32, i32) {
    %c0_i32 = arith.constant 0 : i32
    %c0_i32_0 = arith.constant 0 : i32
    %c0_i32_1 = arith.constant 0 : i32
    %c0_i32_2 = arith.constant 0 : i32
    return %c0_i32, %c0_i32_0, %c0_i32_1 : i32, i32, i32
  }
  func.func @transform_5(%arg0: i32) -> (i32, i32, i32) {
    %c0_i32 = arith.constant 0 : i32
    %c0_i32_0 = arith.constant 0 : i32
    %c0_i32_1 = arith.constant 0 : i32
    %c0_i32_2 = arith.constant 0 : i32
    return %c0_i32, %c0_i32_0, %c0_i32_1 : i32, i32, i32
  }
  func.func @transform_6(%arg0: i32) -> (i32, i32) {
    %c0_i32 = arith.constant 0 : i32
    %c0_i32_0 = arith.constant 0 : i32
    %c0_i32_1 = arith.constant 0 : i32
    return %c0_i32, %c0_i32_0 : i32, i32
  }
  func.func @transform_7(%arg0: i32) -> (i32, i32) {
    %c0_i32 = arith.constant 0 : i32
    %c0_i32_0 = arith.constant 0 : i32
    %c0_i32_1 = arith.constant 0 : i32
    return %c0_i32, %c0_i32_0 : i32, i32
  }
  func.func @transform_8(%arg0: i32) -> (i32, i32, i32) {
    %c0_i32 = arith.constant 0 : i32
    %c0_i32_0 = arith.constant 0 : i32
    %c0_i32_1 = arith.constant 0 : i32
    %c0_i32_2 = arith.constant 0 : i32
    return %c0_i32, %c0_i32_0, %c0_i32_1 : i32, i32, i32
  }
  func.func @transform_9(%arg0: i32) -> (i32, i32) {
    %c0_i32 = arith.constant 0 : i32
    %c0_i32_0 = arith.constant 0 : i32
    %c0_i32_1 = arith.constant 0 : i32
    return %c0_i32, %c0_i32_0 : i32, i32
  }
  func.func @transform_10(%arg0: i32) -> (i32, i32) {
    %c0_i32 = arith.constant 0 : i32
    %c0_i32_0 = arith.constant 0 : i32
    %c0_i32_1 = arith.constant 0 : i32
    return %c0_i32, %c0_i32_0 : i32, i32
  }
  func.func @transform_11(%arg0: i32) -> (i32, i32) {
    %c0_i32 = arith.constant 0 : i32
    %c0_i32_0 = arith.constant 0 : i32
    %c0_i32_1 = arith.constant 0 : i32
    return %c0_i32, %c0_i32_0 : i32, i32
  }
  func.func @transform_12(%arg0: i32) -> (i32, i32) {
    %c0_i32 = arith.constant 0 : i32
    %c0_i32_0 = arith.constant 0 : i32
    %c0_i32_1 = arith.constant 0 : i32
    return %c0_i32, %c0_i32_0 : i32, i32
  }
  func.func @transform_13(%arg0: i32) -> (i32, i32) {
    %c0_i32 = arith.constant 0 : i32
    %c0_i32_0 = arith.constant 0 : i32
    %c0_i32_1 = arith.constant 0 : i32
    return %c0_i32, %c0_i32_0 : i32, i32
  }
  func.func @transform_14(%arg0: i32) -> (i32, i32) {
    %c0_i32 = arith.constant 0 : i32
    %c0_i32_0 = arith.constant 0 : i32
    %c0_i32_1 = arith.constant 0 : i32
    return %c0_i32, %c0_i32_0 : i32, i32
  }
  func.func @transform_15(%arg0: i32) -> (i32, i32) {
    %c0_i32 = arith.constant 0 : i32
    %c0_i32_0 = arith.constant 0 : i32
    %c0_i32_1 = arith.constant 0 : i32
    return %c0_i32, %c0_i32_0 : i32, i32
  }
  func.func @transform_16(%arg0: i32) -> (i32, i32) {
    %c0_i32 = arith.constant 0 : i32
    %c0_i32_0 = arith.constant 0 : i32
    %c0_i32_1 = arith.constant 0 : i32
    return %c0_i32, %c0_i32_0 : i32, i32
  }
  func.func @transform_17(%arg0: i32) -> (i32, i32) {
    %c0_i32 = arith.constant 0 : i32
    %c0_i32_0 = arith.constant 0 : i32
    return %arg0, %c0_i32 : i32, i32
  }
}

module attributes {stable_mosaic.version = 11 : i64} {
  func.func @kernel(%arg0: i32, %arg1: memref<8x4x32xf32, #tpu.memory_space<vmem>>, %arg2: memref<8x4x32xf32, #tpu.memory_space<vmem>>, %arg3: memref<8x4x32xf32, #tpu.memory_space<vmem>>, %arg4: memref<3x4x32xf32, #tpu.memory_space<vmem>>, %arg5: memref<3x32x32xf32, #tpu.memory_space<vmem>>, %arg6: memref<3x32x32xf32, #tpu.memory_space<vmem>>, %arg7: memref<3x32xf32, #tpu.memory_space<vmem>>, %arg8: memref<3x32xf32, #tpu.memory_space<vmem>>, %arg9: memref<3x32x48xf32, #tpu.memory_space<vmem>>, %arg10: memref<48x48xf32, #tpu.memory_space<vmem>>, %arg11: memref<48x48xf32, #tpu.memory_space<vmem>>, %arg12: memref<48x24xf32, #tpu.memory_space<vmem>>, %arg13: memref<24x24xf32, #tpu.memory_space<vmem>>, %arg14: memref<24x24xf32, #tpu.memory_space<vmem>>, %arg15: memref<24x32xf32, #tpu.memory_space<vmem>>, %arg16: memref<32x32xf32, #tpu.memory_space<vmem>>, %arg17: memref<32x128xf32, #tpu.memory_space<vmem>>, %arg18: memref<8x128xf32, #tpu.memory_space<vmem>>) attributes {dimension_semantics = [#tpu.dimension_semantics<parallel>], iteration_bounds = array<i64: 2>, scalar_prefetch = 0 : i64, scratch_operands = 0 : i64, tpu.core_type = #tpu.core_type<tc>, window_params = [{transform_indices = @transform_0, window_bounds = array<i64: 8, 4, 32>}, {transform_indices = @transform_1, window_bounds = array<i64: 8, 4, 32>}, {transform_indices = @transform_2, window_bounds = array<i64: 8, 4, 32>}, {pipeline_mode = #tpu.pipeline_mode<synchronous>, transform_indices = @transform_3, window_bounds = array<i64: 3, 4, 32>}, {pipeline_mode = #tpu.pipeline_mode<synchronous>, transform_indices = @transform_4, window_bounds = array<i64: 3, 32, 32>}, {pipeline_mode = #tpu.pipeline_mode<synchronous>, transform_indices = @transform_5, window_bounds = array<i64: 3, 32, 32>}, {pipeline_mode = #tpu.pipeline_mode<synchronous>, transform_indices = @transform_6, window_bounds = array<i64: 3, 32>}, {pipeline_mode = #tpu.pipeline_mode<synchronous>, transform_indices = @transform_7, window_bounds = array<i64: 3, 32>}, {pipeline_mode = #tpu.pipeline_mode<synchronous>, transform_indices = @transform_8, window_bounds = array<i64: 3, 32, 48>}, {pipeline_mode = #tpu.pipeline_mode<synchronous>, transform_indices = @transform_9, window_bounds = array<i64: 48, 48>}, {pipeline_mode = #tpu.pipeline_mode<synchronous>, transform_indices = @transform_10, window_bounds = array<i64: 48, 48>}, {pipeline_mode = #tpu.pipeline_mode<synchronous>, transform_indices = @transform_11, window_bounds = array<i64: 48, 24>}, {pipeline_mode = #tpu.pipeline_mode<synchronous>, transform_indices = @transform_12, window_bounds = array<i64: 24, 24>}, {pipeline_mode = #tpu.pipeline_mode<synchronous>, transform_indices = @transform_13, window_bounds = array<i64: 24, 24>}, {pipeline_mode = #tpu.pipeline_mode<synchronous>, transform_indices = @transform_14, window_bounds = array<i64: 24, 32>}, {pipeline_mode = #tpu.pipeline_mode<synchronous>, transform_indices = @transform_15, window_bounds = array<i64: 32, 32>}, {pipeline_mode = #tpu.pipeline_mode<synchronous>, transform_indices = @transform_16, window_bounds = array<i64: 32, 128>}, {transform_indices = @transform_17, window_bounds = array<i64: 8, 128>}]} {
    %c0 = arith.constant 0 : index
    %c0_0 = arith.constant 0 : index
    %c0_1 = arith.constant 0 : index
    %0 = vector.load %arg1[%c0, %c0_0, %c0_1] : memref<8x4x32xf32, #tpu.memory_space<vmem>>, vector<8x4x32xf32>
    %c0_2 = arith.constant 0 : index
    %c0_3 = arith.constant 0 : index
    %c0_4 = arith.constant 0 : index
    %1 = vector.load %arg4[%c0_2, %c0_3, %c0_4] : memref<3x4x32xf32, #tpu.memory_space<vmem>>, vector<1x4x32xf32>
    %2 = vector.shape_cast %1 : vector<1x4x32xf32> to vector<4x32xf32>
    %3 = vector.shape_cast %2 : vector<4x32xf32> to vector<1x4x32xf32>
    %4 = vector.broadcast %3 : vector<1x4x32xf32> to vector<8x4x32xf32>
    %5 = arith.mulf %0, %4 : vector<8x4x32xf32>
    %cst = arith.constant dense<0.000000e+00> : vector<8x32xf32>
    %6 = vector.multi_reduction <add>, %5, %cst [1] : vector<8x4x32xf32> to vector<8x32xf32>
    %c0_5 = arith.constant 0 : index
    %c0_6 = arith.constant 0 : index
    %c0_7 = arith.constant 0 : index
    %7 = vector.load %arg5[%c0_5, %c0_6, %c0_7] : memref<3x32x32xf32, #tpu.memory_space<vmem>>, vector<1x32x32xf32>
    %8 = vector.shape_cast %7 : vector<1x32x32xf32> to vector<32x32xf32>
    %cst_8 = arith.constant dense<0.000000e+00> : vector<8x32xf32>
    %9 = tpu.matmul %6, %8, %cst_8 {dimension_numbers = #tpu.dot_dimension_numbers<[1], [0], [0], [1], [0, 0, 1, 1], [], []>} : vector<8x32xf32>, vector<32x32xf32>, vector<8x32xf32> -> vector<8x32xf32>
    %c0_9 = arith.constant 0 : index
    %c0_10 = arith.constant 0 : index
    %10 = vector.load %arg7[%c0_9, %c0_10] : memref<3x32xf32, #tpu.memory_space<vmem>>, vector<1x32xf32>
    %11 = vector.broadcast %10 : vector<1x32xf32> to vector<8x32xf32>
    %12 = arith.addf %9, %11 : vector<8x32xf32>
    %cst_11 = arith.constant 0.000000e+00 : f32
    %13 = vector.broadcast %cst_11 : f32 to vector<8x32xf32>
    %14 = arith.cmpf oge, %12, %13 : vector<8x32xf32>
    %cst_12 = arith.constant 2.500000e-01 : f32
    %15 = vector.broadcast %cst_12 : f32 to vector<8x32xf32>
    %16 = arith.mulf %15, %12 : vector<8x32xf32>
    %17 = arith.select %14, %12, %16 : vector<8x32xi1>, vector<8x32xf32>
    %c0_13 = arith.constant 0 : index
    %c0_14 = arith.constant 0 : index
    %c0_15 = arith.constant 0 : index
    %18 = vector.load %arg6[%c0_13, %c0_14, %c0_15] : memref<3x32x32xf32, #tpu.memory_space<vmem>>, vector<1x32x32xf32>
    %19 = vector.shape_cast %18 : vector<1x32x32xf32> to vector<32x32xf32>
    %cst_16 = arith.constant dense<0.000000e+00> : vector<8x32xf32>
    %20 = tpu.matmul %17, %19, %cst_16 {dimension_numbers = #tpu.dot_dimension_numbers<[1], [0], [0], [1], [0, 0, 1, 1], [], []>} : vector<8x32xf32>, vector<32x32xf32>, vector<8x32xf32> -> vector<8x32xf32>
    %c0_17 = arith.constant 0 : index
    %c0_18 = arith.constant 0 : index
    %21 = vector.load %arg8[%c0_17, %c0_18] : memref<3x32xf32, #tpu.memory_space<vmem>>, vector<1x32xf32>
    %22 = vector.broadcast %21 : vector<1x32xf32> to vector<8x32xf32>
    %23 = arith.addf %20, %22 : vector<8x32xf32>
    %cst_19 = arith.constant 0.000000e+00 : f32
    %24 = vector.broadcast %cst_19 : f32 to vector<8x32xf32>
    %25 = arith.cmpf oge, %23, %24 : vector<8x32xf32>
    %cst_20 = arith.constant 2.500000e-01 : f32
    %26 = vector.broadcast %cst_20 : f32 to vector<8x32xf32>
    %27 = arith.mulf %26, %23 : vector<8x32xf32>
    %28 = arith.select %25, %23, %27 : vector<8x32xi1>, vector<8x32xf32>
    %c0_21 = arith.constant 0 : index
    %c0_22 = arith.constant 0 : index
    %c0_23 = arith.constant 0 : index
    %29 = vector.load %arg9[%c0_21, %c0_22, %c0_23] : memref<3x32x48xf32, #tpu.memory_space<vmem>>, vector<1x32x48xf32>
    %30 = vector.shape_cast %29 : vector<1x32x48xf32> to vector<32x48xf32>
    %cst_24 = arith.constant dense<0.000000e+00> : vector<8x48xf32>
    %31 = tpu.matmul %28, %30, %cst_24 {dimension_numbers = #tpu.dot_dimension_numbers<[1], [0], [0], [1], [0, 0, 1, 1], [], []>} : vector<8x32xf32>, vector<32x48xf32>, vector<8x48xf32> -> vector<8x48xf32>
    %c0_25 = arith.constant 0 : index
    %c0_26 = arith.constant 0 : index
    %c0_27 = arith.constant 0 : index
    %32 = vector.load %arg2[%c0_25, %c0_26, %c0_27] : memref<8x4x32xf32, #tpu.memory_space<vmem>>, vector<8x4x32xf32>
    %c1 = arith.constant 1 : index
    %c0_28 = arith.constant 0 : index
    %c0_29 = arith.constant 0 : index
    %33 = vector.load %arg4[%c1, %c0_28, %c0_29] : memref<3x4x32xf32, #tpu.memory_space<vmem>>, vector<1x4x32xf32>
    %34 = vector.shape_cast %33 : vector<1x4x32xf32> to vector<4x32xf32>
    %35 = vector.shape_cast %34 : vector<4x32xf32> to vector<1x4x32xf32>
    %36 = vector.broadcast %35 : vector<1x4x32xf32> to vector<8x4x32xf32>
    %37 = arith.mulf %32, %36 : vector<8x4x32xf32>
    %cst_30 = arith.constant dense<0.000000e+00> : vector<8x32xf32>
    %38 = vector.multi_reduction <add>, %37, %cst_30 [1] : vector<8x4x32xf32> to vector<8x32xf32>
    %c1_31 = arith.constant 1 : index
    %c0_32 = arith.constant 0 : index
    %c0_33 = arith.constant 0 : index
    %39 = vector.load %arg5[%c1_31, %c0_32, %c0_33] : memref<3x32x32xf32, #tpu.memory_space<vmem>>, vector<1x32x32xf32>
    %40 = vector.shape_cast %39 : vector<1x32x32xf32> to vector<32x32xf32>
    %cst_34 = arith.constant dense<0.000000e+00> : vector<8x32xf32>
    %41 = tpu.matmul %38, %40, %cst_34 {dimension_numbers = #tpu.dot_dimension_numbers<[1], [0], [0], [1], [0, 0, 1, 1], [], []>} : vector<8x32xf32>, vector<32x32xf32>, vector<8x32xf32> -> vector<8x32xf32>
    %c1_35 = arith.constant 1 : index
    %c0_36 = arith.constant 0 : index
    %42 = vector.load %arg7[%c1_35, %c0_36] : memref<3x32xf32, #tpu.memory_space<vmem>>, vector<1x32xf32>
    %43 = vector.broadcast %42 : vector<1x32xf32> to vector<8x32xf32>
    %44 = arith.addf %41, %43 : vector<8x32xf32>
    %cst_37 = arith.constant 0.000000e+00 : f32
    %45 = vector.broadcast %cst_37 : f32 to vector<8x32xf32>
    %46 = arith.cmpf oge, %44, %45 : vector<8x32xf32>
    %cst_38 = arith.constant 2.500000e-01 : f32
    %47 = vector.broadcast %cst_38 : f32 to vector<8x32xf32>
    %48 = arith.mulf %47, %44 : vector<8x32xf32>
    %49 = arith.select %46, %44, %48 : vector<8x32xi1>, vector<8x32xf32>
    %c1_39 = arith.constant 1 : index
    %c0_40 = arith.constant 0 : index
    %c0_41 = arith.constant 0 : index
    %50 = vector.load %arg6[%c1_39, %c0_40, %c0_41] : memref<3x32x32xf32, #tpu.memory_space<vmem>>, vector<1x32x32xf32>
    %51 = vector.shape_cast %50 : vector<1x32x32xf32> to vector<32x32xf32>
    %cst_42 = arith.constant dense<0.000000e+00> : vector<8x32xf32>
    %52 = tpu.matmul %49, %51, %cst_42 {dimension_numbers = #tpu.dot_dimension_numbers<[1], [0], [0], [1], [0, 0, 1, 1], [], []>} : vector<8x32xf32>, vector<32x32xf32>, vector<8x32xf32> -> vector<8x32xf32>
    %c1_43 = arith.constant 1 : index
    %c0_44 = arith.constant 0 : index
    %53 = vector.load %arg8[%c1_43, %c0_44] : memref<3x32xf32, #tpu.memory_space<vmem>>, vector<1x32xf32>
    %54 = vector.broadcast %53 : vector<1x32xf32> to vector<8x32xf32>
    %55 = arith.addf %52, %54 : vector<8x32xf32>
    %cst_45 = arith.constant 0.000000e+00 : f32
    %56 = vector.broadcast %cst_45 : f32 to vector<8x32xf32>
    %57 = arith.cmpf oge, %55, %56 : vector<8x32xf32>
    %cst_46 = arith.constant 2.500000e-01 : f32
    %58 = vector.broadcast %cst_46 : f32 to vector<8x32xf32>
    %59 = arith.mulf %58, %55 : vector<8x32xf32>
    %60 = arith.select %57, %55, %59 : vector<8x32xi1>, vector<8x32xf32>
    %c1_47 = arith.constant 1 : index
    %c0_48 = arith.constant 0 : index
    %c0_49 = arith.constant 0 : index
    %61 = vector.load %arg9[%c1_47, %c0_48, %c0_49] : memref<3x32x48xf32, #tpu.memory_space<vmem>>, vector<1x32x48xf32>
    %62 = vector.shape_cast %61 : vector<1x32x48xf32> to vector<32x48xf32>
    %cst_50 = arith.constant dense<0.000000e+00> : vector<8x48xf32>
    %63 = tpu.matmul %60, %62, %cst_50 {dimension_numbers = #tpu.dot_dimension_numbers<[1], [0], [0], [1], [0, 0, 1, 1], [], []>} : vector<8x32xf32>, vector<32x48xf32>, vector<8x48xf32> -> vector<8x48xf32>
    %64 = arith.addf %31, %63 : vector<8x48xf32>
    %c0_51 = arith.constant 0 : index
    %c0_52 = arith.constant 0 : index
    %c0_53 = arith.constant 0 : index
    %65 = vector.load %arg3[%c0_51, %c0_52, %c0_53] : memref<8x4x32xf32, #tpu.memory_space<vmem>>, vector<8x4x32xf32>
    %c2 = arith.constant 2 : index
    %c0_54 = arith.constant 0 : index
    %c0_55 = arith.constant 0 : index
    %66 = vector.load %arg4[%c2, %c0_54, %c0_55] : memref<3x4x32xf32, #tpu.memory_space<vmem>>, vector<1x4x32xf32>
    %67 = vector.shape_cast %66 : vector<1x4x32xf32> to vector<4x32xf32>
    %68 = vector.shape_cast %67 : vector<4x32xf32> to vector<1x4x32xf32>
    %69 = vector.broadcast %68 : vector<1x4x32xf32> to vector<8x4x32xf32>
    %70 = arith.mulf %65, %69 : vector<8x4x32xf32>
    %cst_56 = arith.constant dense<0.000000e+00> : vector<8x32xf32>
    %71 = vector.multi_reduction <add>, %70, %cst_56 [1] : vector<8x4x32xf32> to vector<8x32xf32>
    %c2_57 = arith.constant 2 : index
    %c0_58 = arith.constant 0 : index
    %c0_59 = arith.constant 0 : index
    %72 = vector.load %arg5[%c2_57, %c0_58, %c0_59] : memref<3x32x32xf32, #tpu.memory_space<vmem>>, vector<1x32x32xf32>
    %73 = vector.shape_cast %72 : vector<1x32x32xf32> to vector<32x32xf32>
    %cst_60 = arith.constant dense<0.000000e+00> : vector<8x32xf32>
    %74 = tpu.matmul %71, %73, %cst_60 {dimension_numbers = #tpu.dot_dimension_numbers<[1], [0], [0], [1], [0, 0, 1, 1], [], []>} : vector<8x32xf32>, vector<32x32xf32>, vector<8x32xf32> -> vector<8x32xf32>
    %c2_61 = arith.constant 2 : index
    %c0_62 = arith.constant 0 : index
    %75 = vector.load %arg7[%c2_61, %c0_62] : memref<3x32xf32, #tpu.memory_space<vmem>>, vector<1x32xf32>
    %76 = vector.broadcast %75 : vector<1x32xf32> to vector<8x32xf32>
    %77 = arith.addf %74, %76 : vector<8x32xf32>
    %cst_63 = arith.constant 0.000000e+00 : f32
    %78 = vector.broadcast %cst_63 : f32 to vector<8x32xf32>
    %79 = arith.cmpf oge, %77, %78 : vector<8x32xf32>
    %cst_64 = arith.constant 2.500000e-01 : f32
    %80 = vector.broadcast %cst_64 : f32 to vector<8x32xf32>
    %81 = arith.mulf %80, %77 : vector<8x32xf32>
    %82 = arith.select %79, %77, %81 : vector<8x32xi1>, vector<8x32xf32>
    %c2_65 = arith.constant 2 : index
    %c0_66 = arith.constant 0 : index
    %c0_67 = arith.constant 0 : index
    %83 = vector.load %arg6[%c2_65, %c0_66, %c0_67] : memref<3x32x32xf32, #tpu.memory_space<vmem>>, vector<1x32x32xf32>
    %84 = vector.shape_cast %83 : vector<1x32x32xf32> to vector<32x32xf32>
    %cst_68 = arith.constant dense<0.000000e+00> : vector<8x32xf32>
    %85 = tpu.matmul %82, %84, %cst_68 {dimension_numbers = #tpu.dot_dimension_numbers<[1], [0], [0], [1], [0, 0, 1, 1], [], []>} : vector<8x32xf32>, vector<32x32xf32>, vector<8x32xf32> -> vector<8x32xf32>
    %c2_69 = arith.constant 2 : index
    %c0_70 = arith.constant 0 : index
    %86 = vector.load %arg8[%c2_69, %c0_70] : memref<3x32xf32, #tpu.memory_space<vmem>>, vector<1x32xf32>
    %87 = vector.broadcast %86 : vector<1x32xf32> to vector<8x32xf32>
    %88 = arith.addf %85, %87 : vector<8x32xf32>
    %cst_71 = arith.constant 0.000000e+00 : f32
    %89 = vector.broadcast %cst_71 : f32 to vector<8x32xf32>
    %90 = arith.cmpf oge, %88, %89 : vector<8x32xf32>
    %cst_72 = arith.constant 2.500000e-01 : f32
    %91 = vector.broadcast %cst_72 : f32 to vector<8x32xf32>
    %92 = arith.mulf %91, %88 : vector<8x32xf32>
    %93 = arith.select %90, %88, %92 : vector<8x32xi1>, vector<8x32xf32>
    %c2_73 = arith.constant 2 : index
    %c0_74 = arith.constant 0 : index
    %c0_75 = arith.constant 0 : index
    %94 = vector.load %arg9[%c2_73, %c0_74, %c0_75] : memref<3x32x48xf32, #tpu.memory_space<vmem>>, vector<1x32x48xf32>
    %95 = vector.shape_cast %94 : vector<1x32x48xf32> to vector<32x48xf32>
    %cst_76 = arith.constant dense<0.000000e+00> : vector<8x48xf32>
    %96 = tpu.matmul %93, %95, %cst_76 {dimension_numbers = #tpu.dot_dimension_numbers<[1], [0], [0], [1], [0, 0, 1, 1], [], []>} : vector<8x32xf32>, vector<32x48xf32>, vector<8x48xf32> -> vector<8x48xf32>
    %97 = arith.addf %64, %96 : vector<8x48xf32>
    %cst_77 = arith.constant 0.000000e+00 : f32
    %98 = vector.broadcast %cst_77 : f32 to vector<8x48xf32>
    %99 = arith.cmpf oge, %97, %98 : vector<8x48xf32>
    %cst_78 = arith.constant 2.500000e-01 : f32
    %100 = vector.broadcast %cst_78 : f32 to vector<8x48xf32>
    %101 = arith.mulf %100, %97 : vector<8x48xf32>
    %102 = arith.select %99, %97, %101 : vector<8x48xi1>, vector<8x48xf32>
    %cst_79 = arith.constant 5.000000e-01 : f32
    %103 = vector.broadcast %cst_79 : f32 to vector<8x48xf32>
    %104 = arith.mulf %103, %102 : vector<8x48xf32>
    %cst_80 = arith.constant 5.000000e-01 : f32
    %105 = vector.broadcast %cst_80 : f32 to vector<8x48xf32>
    %106 = arith.mulf %105, %97 : vector<8x48xf32>
    %107 = arith.addf %104, %106 : vector<8x48xf32>
    %c0_81 = arith.constant 0 : index
    %c0_82 = arith.constant 0 : index
    %108 = vector.load %arg10[%c0_81, %c0_82] : memref<48x48xf32, #tpu.memory_space<vmem>>, vector<48x48xf32>
    %cst_83 = arith.constant dense<0.000000e+00> : vector<8x48xf32>
    %109 = tpu.matmul %107, %108, %cst_83 {dimension_numbers = #tpu.dot_dimension_numbers<[1], [0], [0], [1], [0, 0, 1, 1], [], []>} : vector<8x48xf32>, vector<48x48xf32>, vector<8x48xf32> -> vector<8x48xf32>
    %110 = arith.addf %109, %102 : vector<8x48xf32>
    %cst_84 = arith.constant 0.000000e+00 : f32
    %111 = vector.broadcast %cst_84 : f32 to vector<8x48xf32>
    %112 = arith.cmpf oge, %110, %111 : vector<8x48xf32>
    %cst_85 = arith.constant 2.500000e-01 : f32
    %113 = vector.broadcast %cst_85 : f32 to vector<8x48xf32>
    %114 = arith.mulf %113, %110 : vector<8x48xf32>
    %115 = arith.select %112, %110, %114 : vector<8x48xi1>, vector<8x48xf32>
    %c0_86 = arith.constant 0 : index
    %c0_87 = arith.constant 0 : index
    %116 = vector.load %arg11[%c0_86, %c0_87] : memref<48x48xf32, #tpu.memory_space<vmem>>, vector<48x48xf32>
    %cst_88 = arith.constant dense<0.000000e+00> : vector<8x48xf32>
    %117 = tpu.matmul %115, %116, %cst_88 {dimension_numbers = #tpu.dot_dimension_numbers<[1], [0], [0], [1], [0, 0, 1, 1], [], []>} : vector<8x48xf32>, vector<48x48xf32>, vector<8x48xf32> -> vector<8x48xf32>
    %118 = arith.addf %117, %115 : vector<8x48xf32>
    %c0_89 = arith.constant 0 : index
    %c0_90 = arith.constant 0 : index
    %119 = vector.load %arg12[%c0_89, %c0_90] : memref<48x24xf32, #tpu.memory_space<vmem>>, vector<48x24xf32>
    %cst_91 = arith.constant dense<0.000000e+00> : vector<8x24xf32>
    %120 = tpu.matmul %118, %119, %cst_91 {dimension_numbers = #tpu.dot_dimension_numbers<[1], [0], [0], [1], [0, 0, 1, 1], [], []>} : vector<8x48xf32>, vector<48x24xf32>, vector<8x24xf32> -> vector<8x24xf32>
    %cst_92 = arith.constant 0.000000e+00 : f32
    %121 = vector.broadcast %cst_92 : f32 to vector<8x24xf32>
    %122 = arith.cmpf oge, %120, %121 : vector<8x24xf32>
    %cst_93 = arith.constant 2.500000e-01 : f32
    %123 = vector.broadcast %cst_93 : f32 to vector<8x24xf32>
    %124 = arith.mulf %123, %120 : vector<8x24xf32>
    %125 = arith.select %122, %120, %124 : vector<8x24xi1>, vector<8x24xf32>
    %cst_94 = arith.constant 5.000000e-01 : f32
    %126 = vector.broadcast %cst_94 : f32 to vector<8x24xf32>
    %127 = arith.mulf %126, %125 : vector<8x24xf32>
    %cst_95 = arith.constant 5.000000e-01 : f32
    %128 = vector.broadcast %cst_95 : f32 to vector<8x24xf32>
    %129 = arith.mulf %128, %120 : vector<8x24xf32>
    %130 = arith.addf %127, %129 : vector<8x24xf32>
    %c0_96 = arith.constant 0 : index
    %c0_97 = arith.constant 0 : index
    %131 = vector.load %arg13[%c0_96, %c0_97] : memref<24x24xf32, #tpu.memory_space<vmem>>, vector<24x24xf32>
    %cst_98 = arith.constant dense<0.000000e+00> : vector<8x24xf32>
    %132 = tpu.matmul %130, %131, %cst_98 {dimension_numbers = #tpu.dot_dimension_numbers<[1], [0], [0], [1], [0, 0, 1, 1], [], []>} : vector<8x24xf32>, vector<24x24xf32>, vector<8x24xf32> -> vector<8x24xf32>
    %133 = arith.addf %132, %125 : vector<8x24xf32>
    %cst_99 = arith.constant 0.000000e+00 : f32
    %134 = vector.broadcast %cst_99 : f32 to vector<8x24xf32>
    %135 = arith.cmpf oge, %133, %134 : vector<8x24xf32>
    %cst_100 = arith.constant 2.500000e-01 : f32
    %136 = vector.broadcast %cst_100 : f32 to vector<8x24xf32>
    %137 = arith.mulf %136, %133 : vector<8x24xf32>
    %138 = arith.select %135, %133, %137 : vector<8x24xi1>, vector<8x24xf32>
    %c0_101 = arith.constant 0 : index
    %c0_102 = arith.constant 0 : index
    %139 = vector.load %arg14[%c0_101, %c0_102] : memref<24x24xf32, #tpu.memory_space<vmem>>, vector<24x24xf32>
    %cst_103 = arith.constant dense<0.000000e+00> : vector<8x24xf32>
    %140 = tpu.matmul %138, %139, %cst_103 {dimension_numbers = #tpu.dot_dimension_numbers<[1], [0], [0], [1], [0, 0, 1, 1], [], []>} : vector<8x24xf32>, vector<24x24xf32>, vector<8x24xf32> -> vector<8x24xf32>
    %141 = arith.addf %140, %138 : vector<8x24xf32>
    %c0_104 = arith.constant 0 : index
    %c0_105 = arith.constant 0 : index
    %142 = vector.load %arg15[%c0_104, %c0_105] : memref<24x32xf32, #tpu.memory_space<vmem>>, vector<24x32xf32>
    %cst_106 = arith.constant dense<0.000000e+00> : vector<8x32xf32>
    %143 = tpu.matmul %141, %142, %cst_106 {dimension_numbers = #tpu.dot_dimension_numbers<[1], [0], [0], [1], [0, 0, 1, 1], [], []>} : vector<8x24xf32>, vector<24x32xf32>, vector<8x32xf32> -> vector<8x32xf32>
    %cst_107 = arith.constant 0.000000e+00 : f32
    %144 = vector.broadcast %cst_107 : f32 to vector<8x32xf32>
    %145 = arith.cmpf oge, %143, %144 : vector<8x32xf32>
    %cst_108 = arith.constant 2.500000e-01 : f32
    %146 = vector.broadcast %cst_108 : f32 to vector<8x32xf32>
    %147 = arith.mulf %146, %143 : vector<8x32xf32>
    %148 = arith.select %145, %143, %147 : vector<8x32xi1>, vector<8x32xf32>
    %cst_109 = arith.constant 5.000000e-01 : f32
    %149 = vector.broadcast %cst_109 : f32 to vector<8x32xf32>
    %150 = arith.mulf %149, %148 : vector<8x32xf32>
    %cst_110 = arith.constant 5.000000e-01 : f32
    %151 = vector.broadcast %cst_110 : f32 to vector<8x32xf32>
    %152 = arith.mulf %151, %143 : vector<8x32xf32>
    %153 = arith.addf %150, %152 : vector<8x32xf32>
    %c0_111 = arith.constant 0 : index
    %c0_112 = arith.constant 0 : index
    %154 = vector.load %arg16[%c0_111, %c0_112] : memref<32x32xf32, #tpu.memory_space<vmem>>, vector<32x32xf32>
    %cst_113 = arith.constant dense<0.000000e+00> : vector<8x32xf32>
    %155 = tpu.matmul %153, %154, %cst_113 {dimension_numbers = #tpu.dot_dimension_numbers<[1], [0], [0], [1], [0, 0, 1, 1], [], []>} : vector<8x32xf32>, vector<32x32xf32>, vector<8x32xf32> -> vector<8x32xf32>
    %156 = arith.addf %155, %148 : vector<8x32xf32>
    %cst_114 = arith.constant 0.000000e+00 : f32
    %157 = vector.broadcast %cst_114 : f32 to vector<8x32xf32>
    %158 = arith.cmpf oge, %156, %157 : vector<8x32xf32>
    %cst_115 = arith.constant 2.500000e-01 : f32
    %159 = vector.broadcast %cst_115 : f32 to vector<8x32xf32>
    %160 = arith.mulf %159, %156 : vector<8x32xf32>
    %161 = arith.select %158, %156, %160 : vector<8x32xi1>, vector<8x32xf32>
    %c0_116 = arith.constant 0 : index
    %c0_117 = arith.constant 0 : index
    %162 = vector.load %arg17[%c0_116, %c0_117] : memref<32x128xf32, #tpu.memory_space<vmem>>, vector<32x128xf32>
    %cst_118 = arith.constant dense<0.000000e+00> : vector<8x128xf32>
    %163 = tpu.matmul %161, %162, %cst_118 {dimension_numbers = #tpu.dot_dimension_numbers<[1], [0], [0], [1], [0, 0, 1, 1], [], []>} : vector<8x32xf32>, vector<32x128xf32>, vector<8x128xf32> -> vector<8x128xf32>
    %c0_119 = arith.constant 0 : index
    %c0_120 = arith.constant 0 : index
    %164 = vector.load %arg18[%c0_119, %c0_120] : memref<8x128xf32, #tpu.memory_space<vmem>>, vector<8x128xf32>
    tpu.vector_store %arg18[%c0_119, %c0_120], %163 {strides = array<i32>} : memref<8x128xf32, #tpu.memory_space<vmem>>, vector<8x128xf32>,
    return
  }
  func.func @transform_0(%arg0: i32) -> (i32, i32, i32) {
    %c0_i32 = arith.constant 0 : i32
    %c0_i32_0 = arith.constant 0 : i32
    %c0_i32_1 = arith.constant 0 : i32
    return %arg0, %c0_i32, %c0_i32_0 : i32, i32, i32
  }
  func.func @transform_1(%arg0: i32) -> (i32, i32, i32) {
    %c0_i32 = arith.constant 0 : i32
    %c0_i32_0 = arith.constant 0 : i32
    %c0_i32_1 = arith.constant 0 : i32
    return %arg0, %c0_i32, %c0_i32_0 : i32, i32, i32
  }
  func.func @transform_2(%arg0: i32) -> (i32, i32, i32) {
    %c0_i32 = arith.constant 0 : i32
    %c0_i32_0 = arith.constant 0 : i32
    %c0_i32_1 = arith.constant 0 : i32
    return %arg0, %c0_i32, %c0_i32_0 : i32, i32, i32
  }
  func.func @transform_3(%arg0: i32) -> (i32, i32, i32) {
    %c0_i32 = arith.constant 0 : i32
    %c0_i32_0 = arith.constant 0 : i32
    %c0_i32_1 = arith.constant 0 : i32
    %c0_i32_2 = arith.constant 0 : i32
    return %c0_i32, %c0_i32_0, %c0_i32_1 : i32, i32, i32
  }
  func.func @transform_4(%arg0: i32) -> (i32, i32, i32) {
    %c0_i32 = arith.constant 0 : i32
    %c0_i32_0 = arith.constant 0 : i32
    %c0_i32_1 = arith.constant 0 : i32
    %c0_i32_2 = arith.constant 0 : i32
    return %c0_i32, %c0_i32_0, %c0_i32_1 : i32, i32, i32
  }
  func.func @transform_5(%arg0: i32) -> (i32, i32, i32) {
    %c0_i32 = arith.constant 0 : i32
    %c0_i32_0 = arith.constant 0 : i32
    %c0_i32_1 = arith.constant 0 : i32
    %c0_i32_2 = arith.constant 0 : i32
    return %c0_i32, %c0_i32_0, %c0_i32_1 : i32, i32, i32
  }
  func.func @transform_6(%arg0: i32) -> (i32, i32) {
    %c0_i32 = arith.constant 0 : i32
    %c0_i32_0 = arith.constant 0 : i32
    %c0_i32_1 = arith.constant 0 : i32
    return %c0_i32, %c0_i32_0 : i32, i32
  }
  func.func @transform_7(%arg0: i32) -> (i32, i32) {
    %c0_i32 = arith.constant 0 : i32
    %c0_i32_0 = arith.constant 0 : i32
    %c0_i32_1 = arith.constant 0 : i32
    return %c0_i32, %c0_i32_0 : i32, i32
  }
  func.func @transform_8(%arg0: i32) -> (i32, i32, i32) {
    %c0_i32 = arith.constant 0 : i32
    %c0_i32_0 = arith.constant 0 : i32
    %c0_i32_1 = arith.constant 0 : i32
    %c0_i32_2 = arith.constant 0 : i32
    return %c0_i32, %c0_i32_0, %c0_i32_1 : i32, i32, i32
  }
  func.func @transform_9(%arg0: i32) -> (i32, i32) {
    %c0_i32 = arith.constant 0 : i32
    %c0_i32_0 = arith.constant 0 : i32
    %c0_i32_1 = arith.constant 0 : i32
    return %c0_i32, %c0_i32_0 : i32, i32
  }
  func.func @transform_10(%arg0: i32) -> (i32, i32) {
    %c0_i32 = arith.constant 0 : i32
    %c0_i32_0 = arith.constant 0 : i32
    %c0_i32_1 = arith.constant 0 : i32
    return %c0_i32, %c0_i32_0 : i32, i32
  }
  func.func @transform_11(%arg0: i32) -> (i32, i32) {
    %c0_i32 = arith.constant 0 : i32
    %c0_i32_0 = arith.constant 0 : i32
    %c0_i32_1 = arith.constant 0 : i32
    return %c0_i32, %c0_i32_0 : i32, i32
  }
  func.func @transform_12(%arg0: i32) -> (i32, i32) {
    %c0_i32 = arith.constant 0 : i32
    %c0_i32_0 = arith.constant 0 : i32
    %c0_i32_1 = arith.constant 0 : i32
    return %c0_i32, %c0_i32_0 : i32, i32
  }
  func.func @transform_13(%arg0: i32) -> (i32, i32) {
    %c0_i32 = arith.constant 0 : i32
    %c0_i32_0 = arith.constant 0 : i32
    %c0_i32_1 = arith.constant 0 : i32
    return %c0_i32, %c0_i32_0 : i32, i32
  }
  func.func @transform_14(%arg0: i32) -> (i32, i32) {
    %c0_i32 = arith.constant 0 : i32
    %c0_i32_0 = arith.constant 0 : i32
    %c0_i32_1 = arith.constant 0 : i32
    return %c0_i32, %c0_i32_0 : i32, i32
  }
  func.func @transform_15(%arg0: i32) -> (i32, i32) {
    %c0_i32 = arith.constant 0 : i32
    %c0_i32_0 = arith.constant 0 : i32
    %c0_i32_1 = arith.constant 0 : i32
    return %c0_i32, %c0_i32_0 : i32, i32
  }
  func.func @transform_16(%arg0: i32) -> (i32, i32) {
    %c0_i32 = arith.constant 0 : i32
    %c0_i32_0 = arith.constant 0 : i32
    %c0_i32_1 = arith.constant 0 : i32
    return %c0_i32, %c0_i32_0 : i32, i32
  }
  func.func @transform_17(%arg0: i32) -> (i32, i32) {
    %c0_i32 = arith.constant 0 : i32
    %c0_i32_0 = arith.constant 0 : i32
    return %arg0, %c0_i32 : i32, i32
  }
}

</mosaic_0001>

<bundles_post_ra>
// kernel: tpu_custom_call.1
= control target key start
LH: loop header
LB: loop body
LE: loop exit
PB: predicated region body
PF: predicated region fallthrough
CT: control target
= control target key end

     0   :  { %s4720_s0 = inlined_call_operand.hbm [shape: f32[16,4,32], index: 0, kind: input, shape index: {}]   ;;  %s4721_s1 = inlined_call_operand.hbm [shape: f32[16,4,32], index: 1, kind: input, shape index: {}]   ;;  %s4722_s2 = inlined_call_operand.hbm [shape: f32[16,4,32], index: 2, kind: input, shape index: {}]   ;;  %s4723_s3 = inlined_call_operand.hbm [shape: f32[3,4,32], index: 3, kind: input, shape index: {}]   ;;  %s4724_s4 = inlined_call_operand.hbm [shape: f32[3,32,32], index: 4, kind: input, shape index: {}]   ;;  %s4725_s5 = inlined_call_operand.hbm [shape: f32[3,32,32], index: 5, kind: input, shape index: {}]   ;;  %s4726_s6 = inlined_call_operand.hbm [shape: f32[3,32], index: 6, kind: input, shape index: {}]   ;;  %s4727_s7 = inlined_call_operand.hbm [shape: f32[3,32], index: 7, kind: input, shape index: {}]   ;;  %s4728_s8 = inlined_call_operand.vmem [shape: f32[3,32,48], index: 8, kind: input, shape index: {}]   ;;  %s4729_s9 = inlined_call_operand.hbm [shape: f32[48,48], index: 9, kind: input, shape index: {}]   ;;  %s4730_s10 = inlined_call_operand.hbm [shape: f32[48,48], index: 10, kind: input, shape index: {}]   ;;  %s4731_s11 = inlined_call_operand.vmem [shape: f32[48,24], index: 11, kind: input, shape index: {}]   ;;  %s4732_s12 = inlined_call_operand.hbm [shape: f32[24,24], index: 12, kind: input, shape index: {}]   ;;  %s4733_s13 = inlined_call_operand.hbm [shape: f32[24,24], index: 13, kind: input, shape index: {}]   ;;  %s4734_s14 = inlined_call_operand.hbm [shape: f32[24,32], index: 14, kind: input, shape index: {}]   ;;  %s4735_s15 = inlined_call_operand.vmem [shape: f32[32,32], index: 15, kind: input, shape index: {}]   ;;  %s4736_s16 = inlined_call_operand.hbm [shape: f32[32,128], index: 16, kind: input, shape index: {}]   ;;  %s4737_s17 = inlined_call_operand.hbm [shape: f32[16,128], index: 17, kind: output, shape index: {}]  }
   0x1   :  { %4778 = sst [smem:[#allocation43_spill]] %s4720_s0 }
   0x2   :  { %4779 = sst [smem:[#allocation44_spill]] %s4721_s1 }
   0x3   :  { %4780 = sst [smem:[#allocation45_spill]] %s4722_s2 }
   0x4   :  { %4781 = sst [smem:[#allocation46_spill]] %s4723_s3 }
   0x5   :  { %4782 = sst [smem:[#allocation47_spill]] %s4724_s4 }
   0x6   :  { %4783 = sst [smem:[#allocation48_spill]] %s4725_s5 }
   0x7   :  { %4784 = sst [smem:[#allocation49_spill]] %s4727_s7 }
   0x8   :  { %4785 = sst [smem:[#allocation50_spill]] %s4728_s8 }
   0x9   :  { %4786 = sst [smem:[#allocation51_spill]] %s4730_s10 }
   0xa   :  { %4787 = sst [smem:[#allocation52_spill]] %s4731_s11 }
   0xb   :  { %4788 = sst [smem:[#allocation53_spill]] %s4733_s13 }
   0xc   :  { %4789 = sst [smem:[#allocation54_spill]] %s4735_s15 }
   0xd   :  { %4790 = sst [smem:[#allocation55_spill]] %s4736_s16 }
   0xe   :  { %4791 = sst [smem:[#allocation56_spill]] %s4737_s17 }
   0xf   :  { %22 = vsyncpa [#allocation3], 0 }
  0x10   :  { %24 = vsyncpa [#allocation3 + $0x1], 0 }
  0x11   :  { %25 = vsyncpa [#allocation6], 0 }
  0x12   :  { %27 = vsyncpa [#allocation6 + $0x1], 0 }
  0x13   :  { %28 = vsyncpa [#allocation9], 0 }
  0x14   :  { %29 = vsyncpa [#allocation12], 0 }
  0x15   :  { %30 = vsyncpa [#allocation15], 0 }
  0x16   :  { %31 = vsyncpa [#allocation18], 0 }
  0x17   :  { %32 = vsyncpa [#allocation21], 0 }
  0x18   :  { %33 = vsyncpa [#allocation24], 0 }
  0x19   :  { %34 = vsyncpa [#allocation4], 0 }
  0x1a   :  { %36 = vsyncpa [#allocation4 + $0x1], 0  ;;  %s3948_s24 = smov 0   ;;  %s3950_s25 = smov 0  }
  0x1b   :  { %s3952_s26 = smov 0   ;;  %s3954_s27 = smov 0  }
  0x1c LB: > { %4792 = sst [smem:[#allocation35_spill]] %s3822_s24  ;;  %s3836_s28 = smov [#allocation8]   ;;  %s3834_s27 = sphi %s3954_s27, %s4855_s27   ;;  %s3830_s26 = sphi %s3952_s26, %s4859_s26   ;;  %s3826_s25 = sphi %s3950_s25, %s4858_s25   ;;  %s3822_s24 = sphi %s3948_s24, %s4857_s24  }
  0x1d   : > { %4793 = sst [smem:[#allocation36_spill]] %s3834_s27  ;;  %s457_s29 = sshll.u32 %s3836_s28, 4  ;;  %s3974_s29 = int_to_ptr.vmem [resolvable:$true] %s457_s29 }
  0x1e   : > { %s3969_s0 = sadd.s32 4294967295, %s3834_s27   ;;  %p2705_p0 = scmp.ge.s32.totalorder %s3834_s27, 1 }
  0x1f   : > { %4794 = sst [smem:[#allocation37_spill]] %s3969_s0  ;;  %p4749_p1 = scmp.eq.s32.totalorder %s3969_s0, 0 }
  0x20   : > { %p445_p2 = scmp.lt.s32.totalorder %s3834_s27, 3  ;;  %s3837_s19 = smov [#allocation11]  }
  0x21   : > { %s483_s1 = sshll.u32 %s3837_s19, 4  ;;  %s3838_s20 = smov [#allocation14]   ;;  %s3989_s1 = int_to_ptr.vmem [resolvable:$true] %s483_s1 }
  0x22   : > { %p3976_p3 = pnand %p2705_p0, %p445_p2  ;;  %s3991_s21 = sshll.u32 %s3838_s20, 4  ;;  %s509_s21 = int_to_ptr.vmem [resolvable:$true] %s3991_s21 }
  0x23   : > { %s4798_s3 = sld [smem:[#allocation46_spill]] }
  0x24   : > { %s4795_s30 = scalar_select %p3976_p3, 1, 0 }
  0x25   : > { %p3220_p5 = pneg %p3976_p3 }
  0x26   : > { %4796 = sst [smem:[#allocation38_spill]] %s4795_s30 }
  0x27   : > { %p3985_p6 = pnand %p3220_p5, %p4749_p1 }
  0x29   : > { %s4797_s18 = scalar_select %p3985_p6, 1, 0 }
  0x2a   : > { %s3342_s28 = scalar_lea.hbm %s4798_s3, 192  ;;  %p4001_p8 = pneg %p3985_p6 }
  0x2b   : > { %p3343_p7 = scmp.ne.s32.totalorder %s4798_s3, %s3342_s28  ;;  %p3349_p11 = scmp.lt.u32.totalorder %s3342_s28, %s4798_s3 }
  0x2c   : > { %s4799_s11 = scalar_select %p4001_p8, 1, 0 }
  0x2d   : > { %p3345_p9 = pnand %p4001_p8, %p3343_p7 }
  0x2f   : > { %p3346_p10 = pneg %p3345_p9 }
  0x31   : > { %p3351_p12 = pnand %p3349_p11, %p3346_p10 }
  0x33   : > { %3354 = shalt.err (!%p3351_p12)
}
  0x34   : > { %s3355_s15 = scalar_lea.vmem %s3974_s29, 192  ;;  %p3363_p5 = scmp.lt.s32.totalorder %s3974_s29, %s3974_s29 }
  0x35   : > { %p3356_p13 = scmp.ne.s32.totalorder %s3974_s29, %s3355_s15  ;;  %p3364_p4 = scmp.lt.s32.totalorder %s3355_s15, %s3355_s15 }
  0x37   : > { %p3358_p0 = pnand %p3356_p13, %p4001_p8  ;;  %p3365_p7 = por %p3364_p4, %p3363_p5 }
  0x39   : > { %p3359_p2 = pneg %p3358_p0 }
  0x3b   : > { %p3366_p9 = pnand %p3365_p7, %p3359_p2 }
  0x3d   : > { %3369 = shalt.err (!%p3366_p9)
}
  0x3e   : > { %s4747_s17 = smov 64   ;;  %s4751_s22 = smov 4  }
  0x3f   : > { %3223 = dma.hbm_to_vmem [thread:$0]  (!%p3985_p6), %s4798_s3, 192, %s3974_s29, [#allocation9], %s4747_s17, %s4747_s17, %s4751_s22  }
  0x40   : > { %s4800_s5 = sld [smem:[#allocation48_spill]] }
  0x46   : > { %s3370_s15 = scalar_lea.hbm %s4800_s5, 1536 }
  0x47   : > { %p3371_p4 = scmp.ne.s32.totalorder %s4800_s5, %s3370_s15  ;;  %p3377_p12 = scmp.lt.u32.totalorder %s3370_s15, %s4800_s5 }
  0x49   : > { %p3373_p10 = pnand %p3371_p4, %p4001_p8 }
  0x4b   : > { %p3374_p11 = pneg %p3373_p10 }
  0x4d   : > { %p3379_p13 = pnand %p3377_p12, %p3374_p11 }
  0x4f   : > { %3382 = shalt.err (!%p3379_p13)
}
  0x50   : > { %s3383_s29 = scalar_lea.vmem %s3989_s1, 1536  ;;  %p3391_p7 = scmp.lt.s32.totalorder %s3989_s1, %s3989_s1 }
  0x51   : > { %p3384_p0 = scmp.ne.s32.totalorder %s3989_s1, %s3383_s29  ;;  %p3392_p9 = scmp.lt.s32.totalorder %s3383_s29, %s3383_s29 }
  0x53   : > { %p3386_p2 = pnand %p3384_p0, %p4001_p8  ;;  %p3393_p4 = por %p3392_p9, %p3391_p7 }
  0x55   : > { %p3387_p5 = pneg %p3386_p2 }
  0x57   : > { %p3394_p10 = pnand %p3393_p4, %p3387_p5 }
  0x59   : > { %3397 = shalt.err (!%p3394_p10)
}
  0x5a   : > { %s4753_s8 = smov 128   ;;  %s4755_s2 = smov 8  }
  0x5b   : > { %3229 = dma.hbm_to_vmem [thread:$0]  (!%p3985_p6), %s4800_s5, 1536, %s3989_s1, [#allocation12], %s4753_s8, %s4753_s8, %s4755_s2  }
  0x5c   : > { %s4801_s7 = sld [smem:[#allocation49_spill]] }
  0x62   : > { %s3398_s19 = scalar_lea.hbm %s4801_s7, 64 }
  0x63   : > { %p3399_p11 = scmp.ne.s32.totalorder %s4801_s7, %s3398_s19  ;;  %p3405_p0 = scmp.lt.u32.totalorder %s3398_s19, %s4801_s7 }
  0x65   : > { %p3401_p12 = pnand %p3399_p11, %p4001_p8 }
  0x67   : > { %p3402_p13 = pneg %p3401_p12 }
  0x69   : > { %p3407_p2 = pnand %p3405_p0, %p3402_p13 }
  0x6b   : > { %3410 = shalt.err (!%p3407_p2)
}
  0x6c   : > { %s3411_s16 = scalar_lea.vmem %s509_s21, 64  ;;  %p3419_p4 = scmp.lt.s32.totalorder %s509_s21, %s509_s21 }
  0x6d   : > { %p3412_p5 = scmp.ne.s32.totalorder %s509_s21, %s3411_s16  ;;  %p3420_p10 = scmp.lt.s32.totalorder %s3411_s16, %s3411_s16 }
  0x6f   : > { %p3414_p7 = pnand %p3412_p5, %p4001_p8  ;;  %p3421_p1 = por %p3420_p10, %p3419_p4 }
  0x71   : > { %p3415_p9 = pneg %p3414_p7 }
  0x73   : > { %p3422_p3 = pnand %p3421_p1, %p3415_p9 }
  0x75   : > { %3425 = shalt.err (!%p3422_p3)
}
  0x76   : > { %3235 = dma.hbm_to_vmem [thread:$0]  (!%p3985_p6), %s4801_s7, 64, %s509_s21, [#allocation15]  }
  0x77   : > { %s3843_s17 = smov [#allocation17]   ;;  %s3844_s28 = smov [#allocation20]  }
  0x78   : > { %s534_s23 = sshll.u32 %s3843_s17, 4  ;;  %s563_s19 = sshll.u32 %s3844_s28, 4  ;;  %s535_s23 = int_to_ptr.vmem [resolvable:$true] %s534_s23  ;;  %s564_s19 = int_to_ptr.vmem [resolvable:$true] %s563_s19 }
  0x79   : > { %s4802_s10 = sld [smem:[#allocation51_spill]] }
  0x7f   : > { %s3426_s29 = scalar_lea.hbm %s4802_s10, 768 }
  0x80   : > { %p3427_p1 = scmp.ne.s32.totalorder %s4802_s10, %s3426_s29  ;;  %p3433_p12 = scmp.lt.u32.totalorder %s3426_s29, %s4802_s10 }
  0x82   : > { %p3429_p3 = pnand %p3427_p1, %p4001_p8 }
  0x84   : > { %p3430_p11 = pneg %p3429_p3 }
  0x86   : > { %p3435_p13 = pnand %p3433_p12, %p3430_p11 }
  0x88   : > { %3438 = shalt.err (!%p3435_p13)
}
  0x89   : > { %s3439_s21 = scalar_lea.vmem %s535_s23, 768  ;;  %p3447_p7 = scmp.lt.s32.totalorder %s535_s23, %s535_s23 }
  0x8a   : > { %p3440_p0 = scmp.ne.s32.totalorder %s535_s23, %s3439_s21  ;;  %p3448_p9 = scmp.lt.s32.totalorder %s3439_s21, %s3439_s21 }
  0x8c   : > { %p3442_p2 = pnand %p3440_p0, %p4001_p8  ;;  %p3449_p4 = por %p3448_p9, %p3447_p7 }
  0x8e   : > { %p3443_p5 = pneg %p3442_p2 }
  0x90   : > { %p3450_p10 = pnand %p3449_p4, %p3443_p5 }
  0x92   : > { %3453 = shalt.err (!%p3450_p10)
}
  0x93   : > { %s4803_s22 = smov 128   ;;  %s4804_s13 = sld [smem:[#allocation53_spill]] }
  0x94   : > { %3241 = dma.hbm_to_vmem [thread:$0]  (!%p3985_p6), %s4802_s10, 768, %s535_s23, [#allocation18], %s4803_s22, %s4803_s22, %s4755_s2  }
  0x99   : > { %s3454_s20 = scalar_lea.hbm %s4804_s13, 384 }
  0x9a   : > { %p3455_p1 = scmp.ne.s32.totalorder %s4804_s13, %s3454_s20  ;;  %p3461_p12 = scmp.lt.u32.totalorder %s3454_s20, %s4804_s13 }
  0x9c   : > { %p3457_p3 = pnand %p3455_p1, %p4001_p8 }
  0x9e   : > { %p3458_p11 = pneg %p3457_p3 }
  0xa0   : > { %p3463_p13 = pnand %p3461_p12, %p3458_p11 }
  0xa2   : > { %3466 = shalt.err (!%p3463_p13)
}
  0xa3   : > { %s3467_s21 = scalar_lea.vmem %s564_s19, 384  ;;  %p3475_p7 = scmp.lt.s32.totalorder %s564_s19, %s564_s19 }
  0xa4   : > { %p3468_p0 = scmp.ne.s32.totalorder %s564_s19, %s3467_s21  ;;  %p3476_p9 = scmp.lt.s32.totalorder %s3467_s21, %s3467_s21 }
  0xa6   : > { %p3470_p2 = pnand %p3468_p0, %p4001_p8  ;;  %p3477_p4 = por %p3476_p9, %p3475_p7 }
  0xa8   : > { %p3471_p5 = pneg %p3470_p2 }
  0xaa   : > { %p3478_p10 = pnand %p3477_p4, %p3471_p5 }
  0xac   : > { %3481 = shalt.err (!%p3478_p10)
}
  0xad   : > { %3247 = dma.hbm_to_vmem [thread:$0]  (!%p3985_p6), %s4804_s13, 384, %s564_s19, [#allocation21], %s4803_s22, %s4803_s22, %s4755_s2  }
  0xae   : > { %s2704_s30 = sadd.s32 4294967294, %s3834_s27   ;;  %s4114_s17 = sadd.s32 1, %s3834_s27  }
  0xaf   : > { %4805 = sst [smem:[#allocation39_spill]] %s4114_s17  ;;  %s49_s28 = sadd.s32 1, %s3830_s26 }
  0xb0   : > { %s46_s20 = ssub.s32 %s3834_s27, %s4114_s17  ;;  %p56_p1 = scmp.ne.s32.totalorder %s3830_s26, %s3826_s25 }
  0xb1   : > { %p47_p3 = scmp.eq.s32.totalorder %s46_s20, 0  ;;  %p57_p11 = scmp.eq.s32.totalorder %s3834_s27, 0 }
  0xb2   : > { %p62_p12 = scmp.ne.s32.totalorder %s3826_s25, %s3822_s24  ;;  %p432_p13 = scmp.eq.s32.totalorder %s3969_s0, 1 }
  0xb3   : > { %s4126_s15 = scalar_select %p47_p3, %s3830_s26, %s49_s28  }
  0xb4   : > { %p58_p0 = por %p57_p11, %p56_p1  ;;  %p4807_p2 = scmp.eq.s32.totalorder %s3969_s0, 0 }
  0xb5   : > { %4806 = sst [smem:[#allocation40_spill]] %s4126_s15  ;;  %p4134_p7 = por %p432_p13, %p56_p1 }
  0xb6   : > { %p4130_p5 = por %p4807_p2, %p62_p12  ;;  %p438_p9 = scmp.eq.s32.totalorder %s2704_s30, 1 }
  0xb7   : > { %s4809_s29 = scalar_select %p4134_p7, 1, 0 }
  0xb8   : > { %s4808_s19 = scalar_select %p4130_p5, 1, 0 }
  0xb9   : > { %4810 = sst [smem:[#allocation41_spill]] %s4809_s29  ;;  %p3279_p4 = scmp.lt.s32.totalorder %s3834_s27, 2 }
  0xba   : > { %s4757_s16 = sand.u32 1, %s3830_s26   ;;  %p4140_p10 = por %p438_p9, %p62_p12 }
  0xbb   : > { %s4146_s21 = sshll.u32 %s4757_s16, 5  ;;  %s4149_s23 = sshll.u32 %s3834_s27, 9 }
  0xbc   : > { %s4811_s1 = scalar_select %p4140_p10, 1, 0 }
  0xbd   : > { %p4151_p3 = pnand %p3279_p4, %p58_p0  ;;  %s627_s28 = sand.u32 1, %s3834_s27  }
  0xbe   : > { %4812 = sst [smem:[#allocation42_spill]] %s4811_s1  ;;  %s4814_s2 = sld [smem:[#allocation44_spill]] }
  0xbf   : > { %s4813_s8 = scalar_select %p4151_p3, 1, 0 }
  0xc0   : > { %s631_s16 = scalar_lea.vmem [#allocation5], %s4146_s21  ;;  %s4165_s7 = scalar_lea.sflag [#allocation6], %s627_s28 }
  0xc1   : > { %s638_s5 = sshll.u32 %s631_s16, 4  ;;  %p4171_p11 = pneg %p4151_p3  ;;  %s4163_s5 = int_to_ptr.vmem [resolvable:$true] %s638_s5 }
  0xc3   : > { %s4815_s13 = scalar_select %p4171_p11, 1, 0 }
  0xc4   : > { %s4160_s3 = scalar_lea.hbm %s4814_s2, %s4149_s23  ;;  %s3487_s15 = scalar_lea.hbm %s4814_s2, 1024 }
  0xc5   : > { %s3482_s10 = scalar_lea.hbm %s4160_s3, 512  ;;  %p3488_p0 = scmp.lt.u32.totalorder %s4160_s3, %s4814_s2 }
  0xc6   : > { %p3483_p1 = scmp.ne.s32.totalorder %s4160_s3, %s3482_s10  ;;  %p3489_p2 = scmp.lt.u32.totalorder %s3487_s15, %s3482_s10 }
  0xc7   : > { %p3491_p4 = scmp.lt.u32.totalorder %s3482_s10, %s4160_s3 }
  0xc8   : > { %p3485_p12 = pnand %p4171_p11, %p3483_p1  ;;  %p3490_p9 = por %p3489_p2, %p3488_p0 }
  0xca   : > { %p3486_p13 = pneg %p3485_p12  ;;  %p3492_p10 = por %p3491_p4, %p3490_p9 }
  0xcc   : > { %p3493_p7 = pnand %p3492_p10, %p3486_p13 }
  0xce   : > { %3496 = shalt.err (!%p3493_p7)
}
  0xcf   : > { %s3497_s28 = scalar_lea.vmem %s4163_s5, 512  ;;  %s3845_s30 = smov [#allocation5]  }
  0xd0   : > { %p3498_p1 = scmp.ne.s32.totalorder %s4163_s5, %s3497_s28  ;;  %s3502_s20 = sshll.u32 %s3845_s30, 4  ;;  %s3503_s20 = int_to_ptr.vmem [resolvable:$false] %s3502_s20 }
  0xd1   : > { %s3504_s17 = scalar_lea.vmem %s3503_s20, 1024  ;;  %p3505_p6 = scmp.lt.s32.totalorder %s4163_s5, %s3503_s20 }
  0xd2   : > { %p3500_p12 = pnand %p3498_p1, %p4171_p11  ;;  %p3506_p8 = scmp.lt.s32.totalorder %s3504_s17, %s3497_s28 }
  0xd4   : > { %p3501_p5 = pneg %p3500_p12  ;;  %p3507_p0 = por %p3506_p8, %p3505_p6 }
  0xd6   : > { %p3508_p2 = pnand %p3507_p0, %p3501_p5 }
  0xd8   : > { %3511 = shalt.err (!%p3508_p2)
}
  0xd9   : > { %s4816_s10 = smov 4   ;;  %s4817_s15 = smov 64  }
  0xda   : > { %3260 = dma.hbm_to_vmem [thread:$0]  (!%p4151_p3), %s4160_s3, 512, %s4163_s5, %s4165_s7, %s4817_s15, %s4817_s15, %s4816_s10  }
  0xdb   : > { %s3846_s16 = smov [#allocation10]   ;;  %s3847_s30 = smov [#allocation13]  }
  0xdc   : > { %s470_s2 = sshll.u32 %s3846_s16, 4  ;;  %s497_s27 = sshll.u32 %s3847_s30, 4  ;;  %s471_s2 = int_to_ptr.vmem [resolvable:$true] %s470_s2  ;;  %s498_s27 = int_to_ptr.vmem [resolvable:$true] %s497_s27 }
  0xdd   : > { %s4818_s4 = sld [smem:[#allocation47_spill]]  ;;  %p4819_p8 = scmp.ne.s32.totalorder %s4799_s11, 0 }
  0xe3   : > { %s3512_s17 = scalar_lea.hbm %s4818_s4, 1536 }
  0xe4   : > { %p3513_p6 = scmp.ne.s32.totalorder %s4818_s4, %s3512_s17  ;;  %p3519_p10 = scmp.lt.u32.totalorder %s3512_s17, %s4818_s4 }
  0xe6   : > { %p3515_p5 = pnand %p3513_p6, %p4819_p8 }
  0xe8   : > { %p3516_p7 = pneg %p3515_p5 }
  0xea   : > { %p3521_p13 = pnand %p3519_p10, %p3516_p7 }
  0xec   : > { %3524 = shalt.err (!%p3521_p13)
}
  0xed   : > { %s3525_s3 = scalar_lea.vmem %s471_s2, 1536  ;;  %p3533_p12 = scmp.lt.s32.totalorder %s471_s2, %s471_s2 }
  0xee   : > { %p3526_p9 = scmp.ne.s32.totalorder %s471_s2, %s3525_s3  ;;  %p3534_p0 = scmp.lt.s32.totalorder %s3525_s3, %s3525_s3 }
  0xf0   : > { %p3528_p4 = pnand %p3526_p9, %p4819_p8  ;;  %p3535_p2 = por %p3534_p0, %p3533_p12 }
  0xf2   : > { %p3529_p1 = pneg %p3528_p4 }
  0xf4   : > { %p3536_p3 = pnand %p3535_p2, %p3529_p1 }
  0xf6   : > { %3539 = shalt.err (!%p3536_p3)
}
  0xf7   : > { %p4820_p6 = scmp.ne.s32.totalorder %s4797_s18, 0  ;;  %s4821_s5 = smov 8  }
  0xf8   : > { %s3540_s16 = scalar_lea.hbm %s4726_s6, 64 }
  0xf9   : > { %3226 = dma.hbm_to_vmem [thread:$0]  (!%p4820_p6), %s4818_s4, 1536, %s471_s2, [#allocation9], %s4803_s22, %s4803_s22, %s4821_s5  }
  0xfa   : > { %p3541_p5 = scmp.ne.s32.totalorder %s4726_s6, %s3540_s16  ;;  %p3547_p10 = scmp.lt.u32.totalorder %s3540_s16, %s4726_s6 }
  0xfc   : > { %p3543_p3 = pnand %p3541_p5, %p4819_p8 }
  0xfe   : > { %p3544_p7 = pneg %p3543_p3 }
 0x100   : > { %p3549_p13 = pnand %p3547_p10, %p3544_p7 }
 0x102   : > { %3552 = shalt.err (!%p3549_p13)
}
 0x103   : > { %s3553_s3 = scalar_lea.vmem %s498_s27, 64  ;;  %p3561_p12 = scmp.lt.s32.totalorder %s498_s27, %s498_s27 }
 0x104   : > { %p3554_p9 = scmp.ne.s32.totalorder %s498_s27, %s3553_s3  ;;  %p3562_p0 = scmp.lt.s32.totalorder %s3553_s3, %s3553_s3 }
 0x106   : > { %p3556_p4 = pnand %p3554_p9, %p4819_p8  ;;  %p3563_p2 = por %p3562_p0, %p3561_p12 }
 0x108   : > { %p3557_p1 = pneg %p3556_p4 }
 0x10a   : > { %p3564_p11 = pnand %p3563_p2, %p3557_p1 }
 0x10c   : > { %3567 = shalt.err (!%p3564_p11)
}
 0x10d   : > { %3232 = dma.hbm_to_vmem [thread:$0]  (!%p4820_p6), %s4726_s6, 64, %s498_s27, [#allocation12]  }
 0x10e   : > { %s3848_s0 = smov [#allocation16]   ;;  %s3849_s1 = smov [#allocation19]  }
 0x10f   : > { %s521_s29 = sshll.u32 %s3848_s0, 4  ;;  %s550_s16 = sshll.u32 %s3849_s1, 4  ;;  %s522_s29 = int_to_ptr.vmem [resolvable:$true] %s521_s29  ;;  %s551_s16 = int_to_ptr.vmem [resolvable:$true] %s550_s16 }
 0x110   : > { %s3568_s28 = scalar_lea.hbm %s4729_s9, 768 }
 0x111   : > { %p3569_p11 = scmp.ne.s32.totalorder %s4729_s9, %s3568_s28  ;;  %p3575_p7 = scmp.lt.u32.totalorder %s3568_s28, %s4729_s9 }
 0x113   : > { %p3571_p5 = pnand %p3569_p11, %p4819_p8 }
 0x115   : > { %p3572_p3 = pneg %p3571_p5 }
 0x117   : > { %p3577_p10 = pnand %p3575_p7, %p3572_p3 }
 0x119   : > { %3580 = shalt.err (!%p3577_p10)
}
 0x11a   : > { %s3581_s27 = scalar_lea.vmem %s522_s29, 768  ;;  %p3589_p1 = scmp.lt.s32.totalorder %s522_s29, %s522_s29 }
 0x11b   : > { %p3582_p13 = scmp.ne.s32.totalorder %s522_s29, %s3581_s27  ;;  %p3590_p12 = scmp.lt.s32.totalorder %s3581_s27, %s3581_s27 }
 0x11d   : > { %p3584_p9 = pnand %p3582_p13, %p4819_p8  ;;  %p3591_p0 = por %p3590_p12, %p3589_p1 }
 0x11f   : > { %p3585_p4 = pneg %p3584_p9 }
 0x121   : > { %p3592_p2 = pnand %p3591_p0, %p3585_p4 }
 0x123   : > { %3595 = shalt.err (!%p3592_p2)
}
 0x124   : > { %3238 = dma.hbm_to_vmem [thread:$0]  (!%p4820_p6), %s4729_s9, 768, %s522_s29, [#allocation15], %s4803_s22, %s4803_s22, %s4821_s5  }
 0x125   : > { %s3596_s30 = scalar_lea.hbm %s4732_s12, 384 }
 0x126   : > { %p3597_p11 = scmp.ne.s32.totalorder %s4732_s12, %s3596_s30  ;;  %p3603_p7 = scmp.lt.u32.totalorder %s3596_s30, %s4732_s12 }
 0x128   : > { %p3599_p5 = pnand %p3597_p11, %p4819_p8 }
 0x12a   : > { %p3600_p3 = pneg %p3599_p5 }
 0x12c   : > { %p3605_p10 = pnand %p3603_p7, %p3600_p3 }
 0x12e   : > { %3608 = shalt.err (!%p3605_p10)
}
 0x12f   : > { %s3609_s2 = scalar_lea.vmem %s551_s16, 384  ;;  %p3617_p1 = scmp.lt.s32.totalorder %s551_s16, %s551_s16 }
 0x130   : > { %p3610_p13 = scmp.ne.s32.totalorder %s551_s16, %s3609_s2  ;;  %p3618_p12 = scmp.lt.s32.totalorder %s3609_s2, %s3609_s2 }
 0x132   : > { %p3612_p9 = pnand %p3610_p13, %p4819_p8  ;;  %p3619_p0 = por %p3618_p12, %p3617_p1 }
 0x134   : > { %p3613_p4 = pneg %p3612_p9 }
 0x136   : > { %p3620_p2 = pnand %p3619_p0, %p3613_p4 }
 0x138   : > { %3623 = shalt.err (!%p3620_p2)
}
 0x139   : > { %3244 = dma.hbm_to_vmem [thread:$0]  (!%p4820_p6), %s4732_s12, 384, %s551_s16, [#allocation18], %s4803_s22, %s4803_s22, %s4821_s5  }
 0x13a   : > { %s3850_s4 = smov [#allocation22]   ;;  %s3851_s0 = smov [#allocation23]  }
 0x13b   : > { %s576_s24 = sshll.u32 %s3850_s4, 4  ;;  %s592_s1 = sshll.u32 %s3851_s0, 4  ;;  %s577_s24 = int_to_ptr.vmem [resolvable:$true] %s576_s24  ;;  %s593_s1 = int_to_ptr.vmem [resolvable:$true] %s592_s1 }
 0x13c   : > { %s3624_s28 = scalar_lea.hbm %s4734_s14, 384 }
 0x13d   : > { %p3625_p11 = scmp.ne.s32.totalorder %s4734_s14, %s3624_s28  ;;  %p3631_p7 = scmp.lt.u32.totalorder %s3624_s28, %s4734_s14 }
 0x13f   : > { %p3627_p5 = pnand %p3625_p11, %p4819_p8 }
 0x141   : > { %p3628_p3 = pneg %p3627_p5 }
 0x143   : > { %p3633_p10 = pnand %p3631_p7, %p3628_p3 }
 0x145   : > { %3636 = shalt.err (!%p3633_p10)
}
 0x146   : > { %s3637_s16 = scalar_lea.vmem %s577_s24, 384  ;;  %p3645_p1 = scmp.lt.s32.totalorder %s577_s24, %s577_s24 }
 0x147   : > { %p3638_p13 = scmp.ne.s32.totalorder %s577_s24, %s3637_s16  ;;  %p3646_p12 = scmp.lt.s32.totalorder %s3637_s16, %s3637_s16 }
 0x149   : > { %p3640_p9 = pnand %p3638_p13, %p4819_p8  ;;  %p3647_p0 = por %p3646_p12, %p3645_p1 }
 0x14b   : > { %p3641_p4 = pneg %p3640_p9 }
 0x14d   : > { %p3648_p2 = pnand %p3647_p0, %p3641_p4 }
 0x14f   : > { %3651 = shalt.err (!%p3648_p2)
}
 0x150   : > { %3250 = dma.hbm_to_vmem [thread:$0]  (!%p4820_p6), %s4734_s14, 384, %s577_s24, [#allocation21], %s4803_s22, %s4803_s22, %s4821_s5  }
 0x151   : > { %s4822_s20 = sld [smem:[#allocation55_spill]] }
 0x157   : > { %s3652_s28 = scalar_lea.hbm %s4822_s20, 512 }
 0x158   : > { %p3653_p11 = scmp.ne.s32.totalorder %s4822_s20, %s3652_s28  ;;  %p3659_p7 = scmp.lt.u32.totalorder %s3652_s28, %s4822_s20 }
 0x15a   : > { %p3655_p5 = pnand %p3653_p11, %p4819_p8 }
 0x15c   : > { %p3656_p3 = pneg %p3655_p5 }
 0x15e   : > { %p3661_p10 = pnand %p3659_p7, %p3656_p3 }
 0x160   : > { %3664 = shalt.err (!%p3661_p10)
}
 0x161   : > { %s3665_s16 = scalar_lea.vmem %s593_s1, 512  ;;  %p3673_p1 = scmp.lt.s32.totalorder %s593_s1, %s593_s1 }
 0x162   : > { %p3666_p13 = scmp.ne.s32.totalorder %s593_s1, %s3665_s16  ;;  %p3674_p12 = scmp.lt.s32.totalorder %s3665_s16, %s3665_s16 }
 0x164   : > { %p3668_p9 = pnand %p3666_p13, %p4819_p8  ;;  %p3675_p0 = por %p3674_p12, %p3673_p1 }
 0x166   : > { %p3669_p4 = pneg %p3668_p9 }
 0x168   : > { %p3676_p2 = pnand %p3675_p0, %p3669_p4 }
 0x16a   : > { %3679 = shalt.err (!%p3676_p2)
}
 0x16b   : > { %3253 = dma.hbm_to_vmem [thread:$0]  (!%p4820_p6), %s4822_s20, 512, %s593_s1, [#allocation24], %s4803_s22, %s4803_s22, %s4821_s5  }
 0x16c   : > { %s4823_s0 = sld [smem:[#allocation43_spill]]  ;;  %s610_s18 = scalar_lea.vmem [#allocation2], %s4146_s21 }
 0x16d   : > { %s617_s28 = sshll.u32 %s610_s18, 4  ;;  %s4824_s2 = sld [smem:[#allocation45_spill]]  ;;  %s4328_s28 = int_to_ptr.vmem [resolvable:$true] %s617_s28 }
 0x16e   : > { %s4825_s16 = sand.u32 1, %s3830_s26   ;;  %p4826_p6 = scmp.ne.s32.totalorder %s4815_s13, 0 }
 0x16f   : > { %s4338_s22 = scalar_lea.sflag [#allocation3], %s4825_s16 }
 0x172   : > { %s4325_s30 = scalar_lea.hbm %s4823_s0, %s4149_s23  ;;  %s3685_s27 = scalar_lea.hbm %s4823_s0, 1024 }
 0x173   : > { %s4334_s29 = scalar_lea.hbm %s4824_s2, %s4149_s23  ;;  %s3680_s5 = scalar_lea.hbm %s4325_s30, 512 }
 0x174   : > { %p3681_p8 = scmp.ne.s32.totalorder %s4325_s30, %s3680_s5  ;;  %p3686_p3 = scmp.lt.u32.totalorder %s4325_s30, %s4823_s0 }
 0x175   : > { %p3687_p7 = scmp.lt.u32.totalorder %s3685_s27, %s3680_s5  ;;  %p3689_p13 = scmp.lt.u32.totalorder %s3680_s5, %s4325_s30 }
 0x176   : > { %p3683_p11 = pnand %p3681_p8, %p4826_p6 }
 0x177   : > { %p3688_p10 = por %p3687_p7, %p3686_p3 }
 0x178   : > { %p3684_p5 = pneg %p3683_p11 }
 0x179   : > { %p3690_p9 = por %p3689_p13, %p3688_p10 }
 0x17b   : > { %p3691_p4 = pnand %p3690_p9, %p3684_p5 }
 0x17d   : > { %3694 = shalt.err (!%p3691_p4)
}
 0x17e   : > { %s3695_s23 = scalar_lea.vmem %s4328_s28, 512  ;;  %s3852_s18 = smov [#allocation2]  }
 0x17f   : > { %p3696_p1 = scmp.ne.s32.totalorder %s4328_s28, %s3695_s23  ;;  %s3700_s17 = sshll.u32 %s3852_s18, 4  ;;  %s3701_s17 = int_to_ptr.vmem [resolvable:$false] %s3700_s17 }
 0x180   : > { %s3702_s3 = scalar_lea.vmem %s3701_s17, 1024  ;;  %p3703_p2 = scmp.lt.s32.totalorder %s4328_s28, %s3701_s17 }
 0x181   : > { %p3698_p12 = pnand %p3696_p1, %p4826_p6  ;;  %p3704_p8 = scmp.lt.s32.totalorder %s3702_s3, %s3695_s23 }
 0x183   : > { %p3699_p0 = pneg %p3698_p12  ;;  %p3705_p11 = por %p3704_p8, %p3703_p2 }
 0x185   : > { %p3706_p3 = pnand %p3705_p11, %p3699_p0 }
 0x187   : > { %3709 = shalt.err (!%p3706_p3)
}
 0x188   : > { %p4827_p5 = scmp.ne.s32.totalorder %s4813_s8, 0  ;;  %s652_s16 = scalar_lea.vmem [#allocation7], %s4146_s21 }
 0x189   : > { %s659_s5 = sshll.u32 %s652_s16, 4  ;;  %s3710_s1 = scalar_lea.hbm %s4334_s29, 512  ;;  %s4366_s5 = int_to_ptr.vmem [resolvable:$true] %s659_s5 }
 0x18a   : > { %3257 = dma.hbm_to_vmem [thread:$0]  (!%p4827_p5), %s4325_s30, 512, %s4328_s28, %s4338_s22, %s4817_s15, %s4817_s15, %s4816_s10  }
 0x18b   : > { %p3711_p7 = scmp.ne.s32.totalorder %s4334_s29, %s3710_s1  ;;  %s3715_s11 = scalar_lea.hbm %s4824_s2, 1024 }
 0x18c   : > { %p3716_p9 = scmp.lt.u32.totalorder %s4334_s29, %s4824_s2  ;;  %p3717_p4 = scmp.lt.u32.totalorder %s3715_s11, %s3710_s1 }
 0x18d   : > { %p3713_p10 = pnand %p3711_p7, %p4826_p6  ;;  %p3719_p12 = scmp.lt.u32.totalorder %s3710_s1, %s4334_s29 }
 0x18e   : > { %p3718_p1 = por %p3717_p4, %p3716_p9 }
 0x18f   : > { %p3714_p13 = pneg %p3713_p10 }
 0x190   : > { %p3720_p0 = por %p3719_p12, %p3718_p1 }
 0x192   : > { %p3721_p2 = pnand %p3720_p0, %p3714_p13 }
 0x194   : > { %3724 = shalt.err (!%p3721_p2)
}
 0x195   : > { %s3725_s21 = scalar_lea.vmem %s4366_s5, 512  ;;  %s3853_s30 = smov [#allocation7]  }
 0x196   : > { %p3726_p8 = scmp.ne.s32.totalorder %s4366_s5, %s3725_s21  ;;  %s3730_s28 = sshll.u32 %s3853_s30, 4  ;;  %s3731_s28 = int_to_ptr.vmem [resolvable:$false] %s3730_s28 }
 0x197   : > { %s3732_s22 = scalar_lea.vmem %s3731_s28, 1024  ;;  %p3733_p7 = scmp.lt.s32.totalorder %s4366_s5, %s3731_s28 }
 0x198   : > { %p3728_p11 = pnand %p3726_p8, %p4826_p6  ;;  %p3734_p10 = scmp.lt.s32.totalorder %s3732_s22, %s3725_s21 }
 0x19a   : > { %p3729_p3 = pneg %p3728_p11  ;;  %p3735_p9 = por %p3734_p10, %p3733_p7 }
 0x19c   : > { %p3736_p4 = pnand %p3735_p9, %p3729_p3 }
 0x19e   : > { %3739 = shalt.err (!%p3736_p4)
}
 0x19f   : > { %3263 = dma.hbm_to_vmem [thread:$0]  (!%p4827_p5), %s4334_s29, 512, %s4366_s5, %s4165_s7, %s4817_s15, %s4817_s15, %s4816_s10  }
 0x1a0   : > { %s4828_s13 = sld [smem:[#allocation38_spill]] }
 0x1a6   : > { %p4829_p6 = scmp.ne.s32.totalorder %s4828_s13, 0 }
 0x1a7   : > { %s4396_s18 = sand.u32 (!%p4829_p6), 1, %s3826_s25   ;;  %p4830_p13 = scmp.ne.s32.totalorder (!%p4829_p6), %s4808_s19, 0 }
 0x1a8   : > { %671 = sbr.rel (%p4829_p6) target bundleno = 3127 (0xc37), region = 88  ;;  %s2728_s17 = sshll.u32 (!%p4829_p6), %s4396_s18, 5 }
 0x1a9   : > { %s674_s3 = scalar_lea.sflag (!%p4829_p6), [#allocation3], %s4396_s18  ;;  %s4400_s16 = scalar_lea.vmem (!%p4829_p6), [#allocation2], %s2728_s17 }
 0x1af   : > { %3785 = dma.done.wait (%p4830_p13), %s674_s3, 512  }
 0x1b0   : > { %3787 = vsyncadd (%p4830_p13), %s674_s3, 4294966784  ;;  %s4831_s8 = sld [smem:[#allocation37_spill]]  ;;  %s4407_s15 = scalar_lea.vmem [#allocation5], %s2728_s17 }
 0x1b6   : > { %s682_s7 = sand.u32 1, %s4831_s8  }
 0x1b7   : > { %s683_s10 = scalar_lea.sflag [#allocation6], %s682_s7 }
 0x1b8   : > { %3789 = dma.done.wait (%p4830_p13), %s683_s10, 1024  }
 0x1b9   : > { %3791 = vsyncadd (%p4830_p13), %s683_s10, 4294966272  ;;  %s4413_s29 = scalar_lea.vmem [#allocation7], %s2728_s17  ;;  %p4832_p5 = scmp.eq.s32.totalorder %s4831_s8, 0 }
 0x1bb   : > { %3793 = dma.done.wait (%p4832_p5), [#allocation9], 1728   ;;  %p4833_p1 = pmov %p4832_p5 }
 0x1bd   : > { %3795 = vsyncadd (%p4833_p1), [#allocation9], 4294965568  ;;  %p4834_p12 = pmov %p4833_p1 }
 0x1be   : > { %p4835_p0 = pmov %p4833_p1 }
 0x1bf   : > { %3797 = dma.done.wait (%p4834_p12), [#allocation12], 1600  }
 0x1c0   : > { %3799 = vsyncadd (%p4835_p0), [#allocation12], 4294965696  ;;  %p4836_p2 = pmov %p4835_p0 }
 0x1c1   : > { %p4837_p8 = pmov %p4835_p0 }
 0x1c2   : > { %3801 = dma.done.wait (%p4836_p2), [#allocation15], 832  }
 0x1c3   : > { %3803 = vsyncadd (%p4837_p8), [#allocation15], 4294966464  ;;  %p4838_p11 = pmov %p4835_p0 }
 0x1c4   : > { %p4839_p3 = pmov %p4835_p0 }
 0x1c5   : > { %3805 = dma.done.wait (%p4838_p11), [#allocation18], 1152  }
 0x1c6   : > { %3807 = vsyncadd (%p4839_p3), [#allocation18], 4294966144  ;;  %p4840_p7 = pmov %p4835_p0 }
 0x1c7   : > { %p4841_p10 = pmov %p4835_p0 }
 0x1c8   : > { %3809 = dma.done.wait (%p4840_p7), [#allocation21], 768  }
 0x1c9   : > { %3811 = vsyncadd (%p4841_p10), [#allocation21], 4294966528  ;;  %p4842_p9 = pmov %p4835_p0 }
 0x1ca   : > { %p4843_p4 = pmov %p4835_p0 }
 0x1cb   : > { %3813 = dma.done.wait (%p4842_p9), [#allocation24], 512  }
 0x1cc   : > { %3815 = vsyncadd (%p4843_p4), [#allocation24], 4294966784  ;;  %v3854_v0 = vmov 0.0|0.0   ;;  %vm3855_vm0 = vmmov 0   ;;  %v3856_v1 = vmov 0.0   ;;  %v877_v2 = vld [vmem:[#allocation10] sm:$0xff] }
 0x1cd   : > { %3062 = vmatprep.subr.bf16.mxu0 %v3854_v0  ;;  %2877 = vmatprep.mubr.msk.f32.mxu0 %vm3855_vm0, %v3856_v1  ;;  %v878_v3 = vld [vmem:[#allocation10 + $0x8] sm:$0xff]  ;;  %v879_v4 = vld [vmem:[#allocation10 + $0x10] sm:$0xff]  ;;  %v880_v6 = vld [vmem:[#allocation10 + $0x18] sm:$0xff]  ;;  %vm820_vm1 = vcmask 257024   ;;  %vm894_vm2 = vcmask 1041409   ;;  %vm896_vm3 = vcmask 1042434  }
 0x1ce   : > { %3068 = vmatprep.subr.bf16.mxu1 %v3854_v0  ;;  %2888 = vmatprep.mubr.msk.f32.mxu1 %vm3855_vm0, %v3856_v1  ;;  %v3063_v5 = vpack.c.bf16 %v878_v3, %v877_v2  ;;  %v803_v7 = vld [vmem:[%s4400_s16] sm:$0xf]  ;;  %v804_v8 = vld [vmem:[%s4400_s16 + $0x4] sm:$0xf]  ;;  %v805_v9 = vld [vmem:[%s4400_s16 + $0x8] sm:$0xf]  ;;  %v3066_v12 = vpack.c.bf16 %v880_v6, %v879_v4 }
 0x1cf   : > { %v806_v10 = vld [vmem:[%s4400_s16 + $0xc] sm:$0xf]  ;;  %v807_v11 = vld [vmem:[%s4400_s16 + $0x10] sm:$0xf]  ;;  %v808_v13 = vld [vmem:[%s4400_s16 + $0x14] sm:$0xf] }
 0x1d0   : > { %3064 = vmatpush3.bf16.msra.mxu0 %v3063_v5  ;;  %v809_v14 = vld [vmem:[%s4400_s16 + $0x18] sm:$0xf]  ;;  %v810_v15 = vld [vmem:[%s4400_s16 + $0x1c] sm:$0xf]  ;;  %v811_v16 = vld [vmem:[#allocation8] sm:$0xf] }
 0x1d1   : > { %3065 = vmatprep.subr.bf16.mxu0 %v3854_v0  ;;  %v812_v17 = vmul.f32 %v811_v16, %v803_v7  ;;  %v813_v18 = vmul.f32 %v811_v16, %v804_v8  ;;  %v814_v19 = vmul.f32 %v811_v16, %v805_v9  ;;  %v815_v20 = vmul.f32 %v811_v16, %v806_v10  ;;  %v4463_v61 = vld [vmem:[#allocation10 + $0x20] sm:$0xff]  ;;  %v1149_v4 = vld [vmem:[#allocation10 + $0x28] sm:$0xff]  ;;  %v4465_v5 = vld [vmem:[#allocation10 + $0x30] sm:$0xff]  ;;  %s4844_s1 = sld [smem:[#allocation50_spill]]  ;;  %s4845_s21 = sld [smem:[#allocation52_spill]] }
 0x1d2   : > { %v816_v21 = vmul.f32 %v811_v16, %v807_v11  ;;  %v817_v22 = vmul.f32 %v811_v16, %v808_v13  ;;  %v818_v23 = vmul.f32 %v811_v16, %v809_v14  ;;  %v819_v24 = vmul.f32 %v811_v16, %v810_v15  ;;  %v4467_v10 = vld [vmem:[#allocation10 + $0x38] sm:$0xff]  ;;  %v1073_v11 = vld [vmem:[%s4407_s15] sm:$0xf]  ;;  %s4846_s5 = sld [smem:[#allocation54_spill]]  ;;  %s4847_s28 = sld [smem:[#allocation41_spill]] }
 0x1d3   : > { %v821_v25 = vsel %vm820_vm1, %v812_v17, 0.0  ;;  %v828_v26 = vsel %vm820_vm1, %v813_v18, 0.0  ;;  %v835_v27 = vsel %vm820_vm1, %v814_v19, 0.0  ;;  %v842_v28 = vsel %vm820_vm1, %v815_v20, 0.0  ;;  %v1074_v17 = vld [vmem:[%s4407_s15 + $0x4] sm:$0xf] }
 0x1d4   : > { %3067 = vmatpush3.bf16.msra.mxu0 %v3066_v12  ;;  %v822_v29 = vrot.slane %v821_v25, 4  ;;  %v829_v30 = vrot.slane %v828_v26, 4  ;;  %v836_v31 = vrot.slane %v835_v27, 4  ;;  %v843_v32 = vrot.slane %v842_v28, 4  ;;  %v1082_v12 = vld [vmem:[#allocation8 + $0x4] sm:$0xf] }
 0x1d5   : > { %3074 = vmatprep.subr.bf16.mxu0 %v3854_v0  ;;  %v849_v33 = vsel %vm820_vm1, %v816_v21, 0.0  ;;  %v856_v34 = vsel %vm820_vm1, %v817_v22, 0.0  ;;  %v863_v35 = vsel %vm820_vm1, %v818_v23, 0.0  ;;  %v870_v36 = vsel %vm820_vm1, %v819_v24, 0.0  ;;  %v1075_v18 = vld [vmem:[%s4407_s15 + $0x8] sm:$0xf] }
 0x1d6   : > { %v823_v37 = vadd.f32 %v822_v29, %v821_v25  ;;  %v830_v38 = vadd.f32 %v829_v30, %v828_v26  ;;  %v837_v39 = vadd.f32 %v836_v31, %v835_v27  ;;  %v844_v40 = vadd.f32 %v843_v32, %v842_v28  ;;  %v1076_v23 = vld [vmem:[%s4407_s15 + $0xc] sm:$0xf]  ;;  %v1077_v27 = vld [vmem:[%s4407_s15 + $0x10] sm:$0xf]  ;;  %v1078_v28 = vld [vmem:[%s4407_s15 + $0x14] sm:$0xf] }
 0x1d7   : > { %v850_v41 = vrot.slane %v849_v33, 4  ;;  %v857_v42 = vrot.slane %v856_v34, 4  ;;  %v864_v43 = vrot.slane %v863_v35, 4  ;;  %v871_v44 = vrot.slane %v870_v36, 4  ;;  %v1079_v29 = vld [vmem:[%s4407_s15 + $0x18] sm:$0xf] }
 0x1d8   : > { %v824_v45 = vrot.slane %v823_v37, 2  ;;  %v831_v46 = vrot.slane %v830_v38, 2  ;;  %v838_v47 = vrot.slane %v837_v39, 2  ;;  %v845_v48 = vrot.slane %v844_v40, 2  ;;  %s2742_s22 = sshll.u32 %s4396_s18, 3  ;;  %s2775_s3 = sshll.u32 %s4831_s8, 7 }
 0x1d9   : > { %vm898_vm4 = vcmask 1043459   ;;  %v851_v49 = vadd.f32 %v850_v41, %v849_v33  ;;  %v858_v50 = vadd.f32 %v857_v42, %v856_v34  ;;  %v865_v51 = vadd.f32 %v864_v43, %v863_v35  ;;  %v1080_v35 = vld [vmem:[%s4407_s15 + $0x1c] sm:$0xf]  ;;  %s799_s13 = scalar_lea.vmem [#allocation25], %s2742_s22  ;;  %s4848_s10 = sld [smem:[#allocation56_spill]] }
 0x1da   : > { %v872_v52 = vadd.f32 %v871_v44, %v870_v36  ;;  %vm900_vm5 = vcmask 1044484   ;;  %v825_v53 = vadd.f32 %v824_v45, %v823_v37  ;;  %v832_v54 = vadd.f32 %v831_v46, %v830_v38  ;;  %s2486_s17 = sshll.u32 %s799_s13, 4  ;;  %p4849_p13 = scmp.ne.s32.totalorder %s4847_s28, 0  ;;  %s4673_s17 = int_to_ptr.vmem [resolvable:$true] %s2486_s17 }
 0x1db   : > { %v839_v55 = vadd.f32 %v838_v47, %v837_v39  ;;  %v846_v56 = vadd.f32 %v845_v48, %v844_v40  ;;  %vm902_vm6 = vcmask 1045509   ;;  %v852_v57 = vrot.slane %v851_v49, 2  ;;  %s3740_s19 = scalar_lea.vmem %s4673_s17, 128  ;;  %s3857_s8 = smov [#allocation25]  }
 0x1dc   : > { %v859_v58 = vrot.slane %v858_v50, 2  ;;  %v866_v59 = vrot.slane %v865_v51, 2  ;;  %v873_v60 = vrot.slane %v872_v52, 2  ;;  %vm904_vm7 = vcmask 1046534   ;;  %p3741_p6 = scmp.ne.s32.totalorder %s4673_s17, %s3740_s19  ;;  %s3744_s24 = sshll.u32 %s3857_s8, 4  ;;  %s3745_s24 = int_to_ptr.vmem [resolvable:$false] %s3744_s24 }
 0x1dd   : > { %v826_v62 = vrot.slane %v825_v53, 1  ;;  %v833_v63 = vrot.slane %v832_v54, 1  ;;  %v840_v2 = vrot.slane %v839_v55, 1  ;;  %v847_v3 = vrot.slane %v846_v56, 1  ;;  %s3746_s27 = scalar_lea.vmem %s3745_s24, 256  ;;  %p3747_p12 = scmp.lt.s32.totalorder %s4673_s17, %s3745_s24 }
 0x1de   : > { %vm906_vm8 = vcmask 1047559   ;;  %v853_v6 = vadd.f32 %v852_v57, %v851_v49  ;;  %v860_v7 = vadd.f32 %v859_v58, %v858_v50  ;;  %v867_v8 = vadd.f32 %v866_v59, %v865_v51  ;;  %p3742_p5 = pnand %p3741_p6, %p4849_p13  ;;  %p3748_p0 = scmp.lt.s32.totalorder %s3746_s27, %s3740_s19 }
 0x1df   : > { %v874_v9 = vadd.f32 %v873_v60, %v872_v52  ;;  %vm908_vm9 = vcmask 261120   ;;  %v827_v13 = vadd.f32 %v826_v62, %v825_v53  ;;  %v834_v14 = vadd.f32 %v833_v63, %v832_v54  ;;  %s4678_s15 = scalar_lea.hbm %s4848_s10, %s2775_s3 }
 0x1e0   : > { %v841_v15 = vadd.f32 %v840_v2, %v839_v55  ;;  %v848_v16 = vadd.f32 %v847_v3, %v846_v56  ;;  %v854_v19 = vrot.slane %v853_v6, 1  ;;  %v861_v20 = vrot.slane %v860_v7, 1  ;;  %p3743_p1 = pneg %p3742_p5  ;;  %p3749_p2 = por %p3748_p0, %p3747_p12 }
 0x1e1   : > { %v868_v21 = vrot.slane %v867_v8, 1  ;;  %v875_v22 = vrot.slane %v874_v9, 1  ;;  %v895_v24 = vsel %vm894_vm2, %v834_v14, %v827_v13  ;;  %v3075_v25 = vpack.c.bf16 %v1149_v4, %v4463_v61 }
 0x1e2   : > { %v3078_v26 = vpack.c.bf16 %v4467_v10, %v4465_v5  ;;  %v1083_v30 = vmul.f32 %v1082_v12, %v1073_v11  ;;  %v855_v31 = vadd.f32 %v854_v19, %v853_v6  ;;  %v862_v32 = vadd.f32 %v861_v20, %v860_v7  ;;  %p3750_p8 = pnand %p3749_p2, %p3743_p1 }
 0x1e3   : > { %v869_v33 = vadd.f32 %v868_v21, %v867_v8  ;;  %v876_v34 = vadd.f32 %v875_v22, %v874_v9  ;;  %v897_v36 = vsel %vm896_vm3, %v841_v15, %v895_v24  ;;  %v1084_v37 = vmul.f32 %v1082_v12, %v1074_v17 }
 0x1e4   : > { %v1085_v38 = vmul.f32 %v1082_v12, %v1075_v18  ;;  %v1086_v39 = vmul.f32 %v1082_v12, %v1076_v23  ;;  %v899_v40 = vsel %vm898_vm4, %v848_v16, %v897_v36  ;;  %v1087_v41 = vmul.f32 %v1082_v12, %v1077_v27  ;;  %v984_v27 = vld [vmem:[#allocation11] sm:$0xff] }
 0x1e5   : > { %v1088_v42 = vmul.f32 %v1082_v12, %v1078_v28  ;;  %v1089_v43 = vmul.f32 %v1082_v12, %v1079_v29  ;;  %v901_v44 = vsel %vm900_vm5, %v855_v31, %v899_v40  ;;  %v1090_v45 = vmul.f32 %v1082_v12, %v1080_v35  ;;  %v985_v28 = vld [vmem:[#allocation11 + $0x8] sm:$0xff] }
 0x1e6   : > { %v1091_v46 = vsel %vm820_vm1, %v1083_v30, 0.0  ;;  %v1098_v47 = vsel %vm820_vm1, %v1084_v37, 0.0  ;;  %v903_v48 = vsel %vm902_vm6, %v862_v32, %v901_v44  ;;  %v1105_v51 = vsel %vm820_vm1, %v1085_v38, 0.0 }
 0x1e7   : > { %v1092_v49 = vrot.slane %v1091_v46, 4  ;;  %v1099_v50 = vrot.slane %v1098_v47, 4  ;;  %v905_v52 = vsel %vm904_vm7, %v869_v33, %v903_v48  ;;  %v1106_v53 = vrot.slane %v1105_v51, 4 }
 0x1e8   : > { %v1112_v54 = vsel %vm820_vm1, %v1086_v39, 0.0  ;;  %v1119_v55 = vsel %vm820_vm1, %v1087_v41, 0.0  ;;  %v907_v56 = vsel %vm906_vm8, %v876_v34, %v905_v52  ;;  %v1126_v62 = vsel %vm820_vm1, %v1088_v42, 0.0 }
 0x1e9   : > { %v1093_v57 = vadd.f32 %v1092_v49, %v1091_v46  ;;  %v1100_v58 = vadd.f32 %v1099_v50, %v1098_v47  ;;  %v1113_v59 = vrot.slane %v1112_v54, 4  ;;  %2878 = vmatmul.mubr.msk.f32.vlgmr.msra.gmra.mrb[0].mxu0 %vm908_vm9, %v907_v56  ;;  %v1107_v60 = vadd.f32 %v1106_v53, %v1105_v51  ;;  %v986_v53 = vld [vmem:[#allocation11 + $0x10] sm:$0xff] }
 0x1ea   : > { %v1120_v61 = vrot.slane %v1119_v55, 4  ;;  %v1133_v63 = vsel %vm820_vm1, %v1089_v43, 0.0  ;;  %3076 = vmatpush3.bf16.msra.mxu0 %v3075_v25  ;;  %2899 = vmatprep.mubr.msk.f32.mxu0 %vm3855_vm0, %v3856_v1  ;;  %v1127_v5 = vrot.slane %v1126_v62, 4  ;;  %v1140_v9 = vsel %vm820_vm1, %v1090_v45, 0.0  ;;  %v1484_v56 = vld [vmem:[%s4413_s29] sm:$0xf] }
 0x1eb   : > { %v1094_v2 = vrot.slane %v1093_v57, 2  ;;  %v1101_v3 = vrot.slane %v1100_v58, 2  ;;  %v1114_v4 = vadd.f32 %v1113_v59, %v1112_v54  ;;  %3077 = vmatprep.subr.bf16.mxu0 %v3854_v0  ;;  %v1108_v6 = vrot.slane %v1107_v60, 2  ;;  %v987_v54 = vld [vmem:[#allocation11 + $0x18] sm:$0xff] }
 0x1ec   : > { %v1121_v7 = vadd.f32 %v1120_v61, %v1119_v55  ;;  %v1134_v8 = vrot.slane %v1133_v63, 4  ;;  %v1128_v13 = vadd.f32 %v1127_v5, %v1126_v62  ;;  %v1141_v17 = vrot.slane %v1140_v9, 4  ;;  %v1486_v59 = vld [vmem:[%s4413_s29 + $0x8] sm:$0xf]  ;;  %v1487_v62 = vld [vmem:[%s4413_s29 + $0xc] sm:$0xf] }
 0x1ed   : > { %v1095_v10 = vadd.f32 %v1094_v2, %v1093_v57  ;;  %v1102_v11 = vadd.f32 %v1101_v3, %v1100_v58  ;;  %v1115_v12 = vrot.slane %v1114_v4, 2  ;;  %v1109_v14 = vadd.f32 %v1108_v6, %v1107_v60  ;;  %v1485_v57 = vld [vmem:[%s4413_s29 + $0x4] sm:$0xf]  ;;  %v1493_v58 = vld [vmem:[#allocation8 + $0x8] sm:$0xf] }
 0x1ee   : > { %v1122_v15 = vrot.slane %v1121_v7, 2  ;;  %v1135_v16 = vadd.f32 %v1134_v8, %v1133_v63  ;;  %3079 = vmatpush3.bf16.msra.mxu0 %v3078_v26  ;;  %v1129_v21 = vrot.slane %v1128_v13, 2  ;;  %v1142_v25 = vadd.f32 %v1141_v17, %v1140_v9  ;;  %v1489_v9 = vld [vmem:[%s4413_s29 + $0x14] sm:$0xf] }
 0x1ef   : > { %v1096_v18 = vrot.slane %v1095_v10, 1  ;;  %v1103_v19 = vrot.slane %v1102_v11, 1  ;;  %v1116_v20 = vadd.f32 %v1115_v12, %v1114_v4  ;;  %v1110_v22 = vrot.slane %v1109_v14, 1  ;;  %3086 = vmatprep.subr.bf16.mxu0 %v3854_v0  ;;  %v1488_v4 = vld [vmem:[%s4413_s29 + $0x10] sm:$0xf] }
 0x1f0   : > { %v1123_v23 = vadd.f32 %v1122_v15, %v1121_v7  ;;  %v1136_v24 = vrot.slane %v1135_v16, 2  ;;  %v1130_v32 = vadd.f32 %v1129_v21, %v1128_v13  ;;  %v1143_v26 = vrot.slane %v1142_v25, 2  ;;  %v1490_v15 = vld [vmem:[%s4413_s29 + $0x18] sm:$0xf] }
 0x1f1   : > { %v1097_v29 = vadd.f32 %v1096_v18, %v1095_v10  ;;  %v1104_v30 = vadd.f32 %v1103_v19, %v1102_v11  ;;  %v1117_v31 = vrot.slane %v1116_v20, 1  ;;  %v1111_v33 = vadd.f32 %v1110_v22, %v1109_v14 }
 0x1f2   : > { %v1124_v34 = vrot.slane %v1123_v23, 1  ;;  %v1137_v35 = vadd.f32 %v1136_v24, %v1135_v16  ;;  %v1131_v37 = vrot.slane %v1130_v32, 1  ;;  %v3069_v39 = vpack.c.bf16 %v985_v28, %v984_v27 }
 0x1f3   : > { %v1118_v36 = vadd.f32 %v1117_v31, %v1116_v20  ;;  %v1165_v38 = vsel %vm894_vm2, %v1104_v30, %v1097_v29  ;;  %v1144_v42 = vadd.f32 %v1143_v26, %v1142_v25  ;;  %v3072_v55 = vpack.c.bf16 %v987_v54, %v986_v53  ;;  %v1491_v20 = vld [vmem:[%s4413_s29 + $0x1c] sm:$0xf]  ;;  %v2743_v30 = vld [vmem:[#allocation13] ss:$0 sm:$0xff]  ;;  %s2473_s29 = scalar_lea.sflag [#allocation4], %s4396_s18 }
 0x1f4   : > { %v1125_v40 = vadd.f32 %v1124_v34, %v1123_v23  ;;  %v1138_v41 = vrot.slane %v1137_v35, 1  ;;  %v1166_v43 = vsel %vm896_vm3, %v1111_v33, %v1165_v38  ;;  %v1132_v44 = vadd.f32 %v1131_v37, %v1130_v32  ;;  %3070 = vmatpush3.bf16.msra.mxu1 %v3069_v39  ;;  %v1249_v37 = vld [vmem:[#allocation11 + $0x28] sm:$0xff] }
 0x1f5   : > { %v1167_v45 = vsel %vm898_vm4, %v1118_v36, %v1166_v43  ;;  %v1145_v47 = vrot.slane %v1144_v42, 1  ;;  %3071 = vmatprep.subr.bf16.mxu1 %v3854_v0  ;;  %v1494_v60 = vmul.f32 %v1493_v58, %v1484_v56  ;;  %v1495_v61 = vmul.f32 %v1493_v58, %v1485_v57  ;;  %v1248_v36 = vld [vmem:[#allocation11 + $0x20] sm:$0xff] }
 0x1f6   : > { %v1139_v46 = vadd.f32 %v1138_v41, %v1137_v35  ;;  %v1168_v48 = vsel %vm900_vm5, %v1125_v40, %v1167_v45  ;;  %v1496_v63 = vmul.f32 %v1493_v58, %v1486_v59  ;;  %v1497_v5 = vmul.f32 %v1493_v58, %v1487_v62 }
 0x1f7   : > { %v1169_v49 = vsel %vm902_vm6, %v1132_v44, %v1168_v48  ;;  %v1146_v50 = vadd.f32 %v1145_v47, %v1144_v42  ;;  %v1502_v2 = vsel %vm820_vm1, %v1494_v60, 0.0  ;;  %v1509_v3 = vsel %vm820_vm1, %v1495_v61, 0.0 }
 0x1f8   : > { %v1170_v51 = vsel %vm904_vm7, %v1139_v46, %v1169_v49  ;;  %3073 = vmatpush3.bf16.msra.mxu1 %v3072_v55  ;;  %v1503_v6 = vrot.slane %v1502_v2, 4  ;;  %v1510_v7 = vrot.slane %v1509_v3, 4  ;;  %v1516_v8 = vsel %vm820_vm1, %v1496_v63, 0.0 }
 0x1f9   : > { %v1171_v52 = vsel %vm906_vm8, %v1146_v50, %v1170_v51  ;;  %3080 = vmatprep.subr.bf16.mxu1 %v3854_v0  ;;  %v1498_v10 = vmul.f32 %v1493_v58, %v1488_v4  ;;  %v1517_v11 = vrot.slane %v1516_v8, 4  ;;  %v1523_v12 = vsel %vm820_vm1, %v1497_v5, 0.0  ;;  %v1250_v50 = vld [vmem:[#allocation11 + $0x30] sm:$0xff]  ;;  %v1251_v51 = vld [vmem:[#allocation11 + $0x38] sm:$0xff] }
 0x1fa   : > { %2900 = vmatmul.mubr.msk.f32.vlgmr.msra.gmra.mrb[2].mxu0 %vm908_vm9, %v1171_v52  ;;  %v1504_v13 = vadd.f32 %v1503_v6, %v1502_v2  ;;  %v1511_v14 = vadd.f32 %v1510_v7, %v1509_v3  ;;  %v1499_v16 = vmul.f32 %v1493_v58, %v1489_v9  ;;  %v1524_v17 = vrot.slane %v1523_v12, 4 }
 0x1fb   : > { %2921 = vmatprep.mubr.msk.f32.mxu0 %vm3855_vm0, %v3856_v1  ;;  %v1530_v18 = vsel %vm820_vm1, %v1498_v10, 0.0  ;;  %v1518_v19 = vadd.f32 %v1517_v11, %v1516_v8  ;;  %v1500_v21 = vmul.f32 %v1493_v58, %v1490_v15  ;;  %v1501_v28 = vmul.f32 %v1493_v58, %v1491_v20 }
 0x1fc   : > { %v1505_v22 = vrot.slane %v1504_v13, 2  ;;  %v1512_v23 = vrot.slane %v1511_v14, 2  ;;  %v1531_v24 = vrot.slane %v1530_v18, 4  ;;  %v1537_v25 = vsel %vm820_vm1, %v1499_v16, 0.0 }
 0x1fd   : > { %v1525_v27 = vadd.f32 %v1524_v17, %v1523_v12  ;;  %v1519_v29 = vrot.slane %v1518_v19, 2  ;;  %v1538_v33 = vrot.slane %v1537_v25, 4  ;;  %v1544_v34 = vsel %vm820_vm1, %v1500_v21, 0.0  ;;  %v2747_v12 = vld [vmem:[#allocation13 + $0x1] ss:$0 sm:$0xff] }
 0x1fe   : > { %v1506_v31 = vadd.f32 %v1505_v22, %v1504_v13  ;;  %v1513_v32 = vadd.f32 %v1512_v23, %v1511_v14  ;;  %v1532_v35 = vadd.f32 %v1531_v24, %v1530_v18  ;;  %v1545_v42 = vrot.slane %v1544_v34, 4  ;;  %v1559_v17 = vld [vmem:[#allocation10 + $0x40] sm:$0xff]  ;;  %v1560_v18 = vld [vmem:[#allocation10 + $0x48] sm:$0xff] }
 0x1ff   : > { %v1526_v38 = vrot.slane %v1525_v27, 2  ;;  %v1520_v41 = vadd.f32 %v1519_v29, %v1518_v19  ;;  %v1551_v43 = vsel %vm820_vm1, %v1501_v28, 0.0  ;;  %v1539_v46 = vadd.f32 %v1538_v33, %v1537_v25  ;;  %v1561_v28 = vld [vmem:[#allocation10 + $0x50] sm:$0xff]  ;;  %v1562_v29 = vld [vmem:[#allocation10 + $0x58] sm:$0xff] }
 0x200   : > { %v1507_v44 = vrot.slane %v1506_v31, 1  ;;  %v1514_v45 = vrot.slane %v1513_v32, 1  ;;  %v3081_v48 = vpack.c.bf16 %v1249_v37, %v1248_v36  ;;  %v1533_v49 = vrot.slane %v1532_v35, 2  ;;  %v2751_v36 = vld [vmem:[%s4844_s1 + $0x20] sm:$0xff]  ;;  %v2752_v37 = vld [vmem:[%s4844_s1 + $0x28] sm:$0xff] }
 0x201   : > { %v1527_v52 = vadd.f32 %v1526_v38, %v1525_v27  ;;  %v1552_v53 = vrot.slane %v1551_v43, 4  ;;  %v1521_v55 = vrot.slane %v1520_v41, 1  ;;  %v1546_v56 = vadd.f32 %v1545_v42, %v1544_v34  ;;  %v1659_v42 = vld [vmem:[#allocation11 + $0x40] sm:$0xff] }
 0x202   : > { %v1508_v57 = vadd.f32 %v1507_v44, %v1506_v31  ;;  %v1515_v58 = vadd.f32 %v1514_v45, %v1513_v32  ;;  %v1540_v59 = vrot.slane %v1539_v46, 2  ;;  %v3084_v60 = vpack.c.bf16 %v1251_v51, %v1250_v50  ;;  %v1661_v45 = vld [vmem:[#allocation11 + $0x50] sm:$0xff]  ;;  %v2749_v50 = vld [vmem:[#allocation14 + $0x1] ss:$0 sm:$0xff] }
 0x203   : > { %v1534_v61 = vadd.f32 %v1533_v49, %v1532_v35  ;;  %v1528_v62 = vrot.slane %v1527_v52, 1  ;;  %v1553_v63 = vadd.f32 %v1552_v53, %v1551_v43  ;;  %v1522_v2 = vadd.f32 %v1521_v55, %v1520_v41  ;;  %v1660_v43 = vld [vmem:[#allocation11 + $0x48] sm:$0xff]  ;;  %v1070_v53 = vld [vmem:[%s4844_s1 + $0x8] sm:$0xff] }
 0x204   : > { %v1547_v3 = vrot.slane %v1546_v56, 2  ;;  %v1541_v4 = vadd.f32 %v1540_v59, %v1539_v46  ;;  %v1576_v5 = vsel %vm894_vm2, %v1515_v58, %v1508_v57  ;;  %v3099_v25 = vpack.c.bf16 %v1560_v18, %v1559_v17  ;;  %v1662_v46 = vld [vmem:[#allocation11 + $0x58] sm:$0xff]  ;;  %v1071_v59 = vld [vmem:[%s4844_s1 + $0x10] sm:$0xff]  ;;  %v1830_v17 = vld [vmem:[#allocation16 + $0x8] sm:$0xff] }
 0x205   : > { %v1535_v6 = vrot.slane %v1534_v61, 1  ;;  %v1529_v7 = vadd.f32 %v1528_v62, %v1527_v52  ;;  %v1554_v8 = vrot.slane %v1553_v63, 2  ;;  %v1577_v10 = vsel %vm896_vm3, %v1522_v2, %v1576_v5  ;;  %v1069_v52 = vld [vmem:[%s4844_s1] sm:$0xff]  ;;  %v2762_v5 = vld [vmem:[%s4844_s1 + $0x48] sm:$0xff] }
 0x206   : > { %v1548_v9 = vadd.f32 %v1547_v3, %v1546_v56  ;;  %v1542_v11 = vrot.slane %v1541_v4, 1  ;;  %v3102_v33 = vpack.c.bf16 %v1562_v29, %v1561_v28  ;;  %v3087_v38 = vpack.c.bf16 %v2752_v37, %v2751_v36  ;;  %v2745_v56 = vld [vmem:[#allocation14] ss:$0 sm:$0xff]  ;;  %v1833_v29 = vld [vmem:[#allocation16 + $0x20] sm:$0xff] }
 0x207   : > { %v1536_v13 = vadd.f32 %v1535_v6, %v1534_v61  ;;  %v1555_v14 = vadd.f32 %v1554_v8, %v1553_v63  ;;  %v1578_v15 = vsel %vm898_vm4, %v1529_v7, %v1577_v10  ;;  %v3105_v44 = vpack.c.bf16 %v1660_v43, %v1659_v42  ;;  %v2757_v63 = vld [vmem:[#allocation13 + $0x2] ss:$0 sm:$0xff] }
 0x208   : > { %v1549_v19 = vrot.slane %v1548_v9, 1  ;;  %v1543_v22 = vadd.f32 %v1542_v11, %v1541_v4  ;;  %3088 = vmatpush3.bf16.msra.mxu0 %v3087_v38  ;;  %v3093_v58 = vpack.c.bf16 %v1070_v53, %v1069_v52  ;;  %v2761_v4 = vld [vmem:[%s4844_s1 + $0x40] sm:$0xff]  ;;  %vm1835_vm2 = vcmask 392192  }
 0x209   : > { %v1579_v23 = vsel %vm900_vm5, %v1536_v13, %v1578_v15  ;;  %v1556_v27 = vrot.slane %v1555_v14, 1  ;;  %3089 = vmatprep.subr.bf16.mxu0 %v3854_v0  ;;  %v3111_v10 = vpack.c.bf16 %v2762_v5, %v2761_v4  ;;  %v2763_v13 = vld [vmem:[%s4844_s1 + $0x50] sm:$0xff]  ;;  %v2078_v5 = vld [vmem:[#allocation19 + $0x10] sm:$0xff]  ;;  %vm2079_vm5 = vcmask 195584  }
 0x20a   : > { %v1580_v32 = vsel %vm902_vm6, %v1543_v22, %v1579_v23 }
 0x20b   : > { %v1557_v34 = vadd.f32 %v1556_v27, %v1555_v14  ;;  %v2764_v14 = vld [vmem:[%s4844_s1 + $0x58] sm:$0xff]  ;;  %v1832_v27 = vld [vmem:[#allocation16 + $0x18] sm:$0xff] }
 0x20c   : > { %v3114_v15 = vpack.c.bf16 %v2764_v14, %v2763_v13  ;;  %v2156_v13 = vld [vmem:[#allocation20] sm:$0xff]  ;;  %v2157_v14 = vld [vmem:[#allocation20 + $0x8] sm:$0xff] }
 0x2bc   : > { %v977_v26 = vpop.f32.mrb[0].mxu0 }
 0x2bd   : > { %v978_v39 = vadd.f32 %v2743_v30, %v977_v26  ;;  %v2879_v40 = vpop.f32.mrb[1].mxu0  ;;  %v1550_v30 = vadd.f32 %v1549_v19, %v1548_v9  ;;  %v2759_v19 = vld [vmem:[#allocation14 + $0x2] ss:$0 sm:$0xff] }
 0x2be   : > { %v2754_v40 = vld [vmem:[%s4844_s1 + $0x38] sm:$0xff] }
 0x2bf   : > { %vm981_vm10 = vcmp.ge.f32.partialorder %v978_v39, 0.0  ;;  %v982_v47 = vmul.f32 0.25, %v978_v39  ;;  %v1581_v35 = vsel %vm904_vm7, %v1550_v30, %v1580_v32  ;;  %v1834_v30 = vld [vmem:[#allocation16 + $0x28] sm:$0xff]  ;;  %v1912_v32 = vld [vmem:[#allocation17] sm:$0xff] }
 0x2c0   : > { %v1582_v26 = vsel %vm906_vm8, %v1557_v34, %v1581_v35  ;;  %v1914_v34 = vld [vmem:[#allocation17 + $0x10] sm:$0xff] }
 0x2c1   : > { %v983_v54 = vsel %vm981_vm10, %v978_v39, %v982_v47  ;;  %v2753_v39 = vld [vmem:[%s4844_s1 + $0x30] sm:$0xff]  ;;  %v3108_v47 = vpack.c.bf16 %v1662_v46, %v1661_v45 }
 0x2c2   : > { %2889 = vmatmul.mubr.msk.f32.vlgmr.msra.gmra.mrb[0].mxu1 %vm908_vm9, %v983_v54  ;;  %v3090_v41 = vpack.c.bf16 %v2754_v40, %v2753_v39  ;;  %v1917_v45 = vld [vmem:[#allocation17 + $0x28] sm:$0xff] }
 0x2c3   : > { %3082 = vmatpush3.bf16.msra.mxu1 %v3081_v48  ;;  %2910 = vmatprep.mubr.msk.f32.mxu1 %vm3855_vm0, %v3856_v1 }
 0x2c4   : > { %3083 = vmatprep.subr.bf16.mxu1 %v3854_v0  ;;  %3091 = vmatpush3.bf16.msra.mxu0 %v3090_v41 }
 0x2c5   : > { %3092 = vmatprep.subr.bf16.mxu0 %v3854_v0 }
 0x2c7   : > { %3085 = vmatpush3.bf16.msra.mxu1 %v3084_v60  ;;  %v1072_v60 = vld [vmem:[%s4844_s1 + $0x18] sm:$0xff] }
 0x2c8   : > { %3098 = vmatprep.subr.bf16.mxu1 %v3854_v0  ;;  %v3096_v2 = vpack.c.bf16 %v1072_v60, %v1071_v59  ;;  %v1996_v59 = vld [vmem:[%s4845_s21 + $0x28] sm:$0xff] }
 0x2cd   : > { %v1240_v16 = vpop.f32.mrb[2].mxu0 }
 0x2ce   : > { %v1241_v20 = vadd.f32 %v2747_v12, %v1240_v16  ;;  %v2901_v21 = vpop.f32.mrb[3].mxu0  ;;  %v1829_v16 = vld [vmem:[#allocation16] sm:$0xff] }
 0x2cf   : > { %v3117_v18 = vpack.c.bf16 %v1830_v17, %v1829_v16  ;;  %v2158_v16 = vld [vmem:[#allocation20 + $0x10] sm:$0xff]  ;;  %v2232_v17 = vld [vmem:[#allocation22] sm:$0xff] }
 0x2d0   : > { %vm1244_vm11 = vcmp.ge.f32.partialorder %v1241_v20, 0.0  ;;  %v1245_v24 = vmul.f32 0.25, %v1241_v20 }
 0x2d2   : > { %v1246_v31 = vsel %vm1244_vm11, %v1241_v20, %v1245_v24 }
 0x2d3   : > { %2911 = vmatmul.mubr.msk.f32.vlgmr.msra.gmra.mrb[2].mxu1 %vm908_vm9, %v1246_v31  ;;  %v3123_v31 = vpack.c.bf16 %v1834_v30, %v1833_v29  ;;  %v2314_v30 = vld [vmem:[%s4846_s5] sm:$0xff] }
 0x2d4   : > { %3100 = vmatpush3.bf16.msra.mxu1 %v3099_v25  ;;  %2943 = vmatprep.mubr.msk.f32.mxu1 %vm3855_vm0, %v3856_v1  ;;  %v1831_v25 = vld [vmem:[#allocation16 + $0x10] sm:$0xff] }
 0x2d5   : > { %3101 = vmatprep.subr.bf16.mxu1 %v3854_v0  ;;  %v3120_v28 = vpack.c.bf16 %v1832_v27, %v1831_v25  ;;  %v2234_v25 = vld [vmem:[#allocation22 + $0x10] sm:$0xff] }
 0x2d8   : > { %3103 = vmatpush3.bf16.msra.mxu1 %v3102_v33  ;;  %v1913_v33 = vld [vmem:[#allocation17 + $0x8] sm:$0xff] }
 0x2d9   : > { %3104 = vmatprep.subr.bf16.mxu1 %v3854_v0  ;;  %v3126_v35 = vpack.c.bf16 %v1913_v33, %v1912_v32  ;;  %v2316_v33 = vld [vmem:[%s4846_s5 + $0x10] sm:$0xff] }
 0x2db   : > { %2944 = vmatmul.mubr.msk.f32.vlgmr.msra.gmra.mrb[4].mxu1 %vm908_vm9, %v1582_v26  ;;  %v1915_v26 = vld [vmem:[#allocation17 + $0x18] sm:$0xff] }
 0x2dc   : > { %2954 = vmatprep.mubr.msk.f32.mxu1 %vm3855_vm0, %v3856_v1  ;;  %3106 = vmatpush3.bf16.msra.mxu1 %v3105_v44  ;;  %v3129_v36 = vpack.c.bf16 %v1915_v26, %v1914_v34  ;;  %v1916_v44 = vld [vmem:[#allocation17 + $0x20] sm:$0xff] }
 0x2dd   : > { %3107 = vmatprep.subr.bf16.mxu1 %v3854_v0  ;;  %v3132_v46 = vpack.c.bf16 %v1917_v45, %v1916_v44  ;;  %v2395_v26 = vld [vmem:[#allocation23 + $0x8] sm:$0xff]  ;;  %v2396_v44 = vld [vmem:[#allocation23 + $0x10] sm:$0xff]  ;;  %v2397_v45 = vld [vmem:[#allocation23 + $0x18] sm:$0xff] }
 0x2e0   : > { %3109 = vmatpush3.bf16.msra.mxu1 %v3108_v47  ;;  %v1991_v47 = vld [vmem:[%s4845_s21] sm:$0xff] }
 0x2e1   : > { %3116 = vmatprep.subr.bf16.mxu1 %v3854_v0 }
 0x395   : > { %v1062_v48 = vpop.f32.mrb[0].mxu1 }
 0x396   : > { %v2890_v49 = vpop.f32.mrb[1].mxu1  ;;  %v1063_v61 = vadd.f32 %v2745_v56, %v1062_v48  ;;  %v1992_v48 = vld [vmem:[%s4845_s21 + $0x8] sm:$0xff] }
 0x397   : > { %v1993_v49 = vld [vmem:[%s4845_s21 + $0x10] sm:$0xff] }
 0x398   : > { %v1067_v6 = vmul.f32 0.25, %v1063_v61  ;;  %vm1066_vm13 = vcmp.ge.f32.partialorder %v1063_v61, 0.0 }
 0x39a   : > { %v1068_v11 = vsel %vm1066_vm13, %v1063_v61, %v1067_v6 }
 0x3a6   : > { %v1326_v51 = vpop.f32.mrb[2].mxu1 }
 0x3a7   : > { %v1327_v54 = vadd.f32 %v2749_v50, %v1326_v51  ;;  %v2912_v55 = vpop.f32.mrb[3].mxu1  ;;  %v3135_v50 = vpack.c.bf16 %v1992_v48, %v1991_v47  ;;  %v1994_v51 = vld [vmem:[%s4845_s21 + $0x18] sm:$0xff] }
 0x3a8   : > { %v3138_v52 = vpack.c.bf16 %v1994_v51, %v1993_v49 }
 0x3a9   : > { %vm1330_vm12 = vcmp.ge.f32.partialorder %v1327_v54, 0.0  ;;  %v1331_v57 = vmul.f32 0.25, %v1327_v54 }
 0x3ab   : > { %v1332_v62 = vsel %vm1330_vm12, %v1327_v54, %v1331_v57 }
 0x3ac   : > { %2922 = vmatmul.mubr.msk.f32.vlgmr.msra.gmra.mrb[4].mxu0 %vm908_vm9, %v1332_v62 }
 0x3ad   : > { %3094 = vmatpush3.bf16.msra.mxu0 %v3093_v58  ;;  %2932 = vmatprep.mubr.msk.f32.mxu0 %vm3855_vm0, %v3856_v1  ;;  %v1995_v58 = vld [vmem:[%s4845_s21 + $0x20] sm:$0xff] }
 0x3ae   : > { %v1651_v3 = vpop.f32.mrb[4].mxu1  ;;  %3095 = vmatprep.subr.bf16.mxu0 %v3854_v0  ;;  %v3141_v60 = vpack.c.bf16 %v1996_v59, %v1995_v58 }
 0x3af   : > { %v1652_v7 = vadd.f32 %v2757_v63, %v1651_v3  ;;  %v2945_v8 = vpop.f32.mrb[5].mxu1  ;;  %v2077_v3 = vld [vmem:[#allocation19 + $0x8] sm:$0xff] }
 0x3b1   : > { %vm1655_vm14 = vcmp.ge.f32.partialorder %v1652_v7, 0.0  ;;  %v1656_v9 = vmul.f32 0.25, %v1652_v7  ;;  %3097 = vmatpush3.bf16.msra.mxu0 %v3096_v2  ;;  %v2076_v2 = vld [vmem:[#allocation19] sm:$0xff] }
 0x3b2   : > { %3110 = vmatprep.subr.bf16.mxu0 %v3854_v0  ;;  %v3144_v4 = vpack.c.bf16 %v2077_v3, %v2076_v2 }
 0x3b3   : > { %v1657_v12 = vsel %vm1655_vm14, %v1652_v7, %v1656_v9 }
 0x3b4   : > { %2933 = vmatmul.mubr.msk.f32.vlgmr.msra.gmra.mrb[4].mxu0 %vm908_vm9, %v1068_v11  ;;  %2955 = vmatmul.mubr.msk.f32.vlgmr.msra.gmra.mrb[6].mxu1 %vm908_vm9, %v1657_v12 }
 0x3b5   : > { %3112 = vmatpush3.bf16.msra.mxu0 %v3111_v10  ;;  %2965 = vmatprep.mubr.msk.f32.mxu0 %vm3855_vm0, %v3856_v1 }
 0x3b6   : > { %3113 = vmatprep.subr.bf16.mxu0 %v3854_v0  ;;  %2980 = vmatprep.mubr.msk.f32.mxu1 %vm3855_vm0, %v3856_v1 }
 0x3b7   : > { %3118 = vmatpush3.bf16.msra.mxu1 %v3117_v18  ;;  %v2233_v18 = vld [vmem:[#allocation22 + $0x8] sm:$0xff] }
 0x3b8   : > { %3119 = vmatprep.subr.bf16.mxu1 %v3854_v0 }
 0x3b9   : > { %3115 = vmatpush3.bf16.msra.mxu0 %v3114_v15  ;;  %v3147_v15 = vpack.c.bf16 %v2157_v14, %v2156_v13 }
 0x3ba   : > { %3125 = vmatprep.subr.bf16.mxu0 %v3854_v0 }
 0x3bb   : > { %3121 = vmatpush3.bf16.msra.mxu1 %v3120_v28 }
 0x3bc   : > { %3122 = vmatprep.subr.bf16.mxu1 %v3854_v0 }
 0x3bf   : > { %3124 = vmatpush3.bf16.msra.mxu1 %v3123_v31  ;;  %v2315_v31 = vld [vmem:[%s4846_s5 + $0x8] sm:$0xff] }
 0x3c0   : > { %3134 = vmatprep.subr.bf16.mxu1 %v3854_v0  ;;  %v3153_v32 = vpack.c.bf16 %v2315_v31, %v2314_v30 }
 0x487   : > { %v1737_v20 = vpop.f32.mrb[6].mxu1 }
 0x488   : > { %v1738_v21 = vadd.f32 %v2759_v19, %v1737_v20  ;;  %v2956_v22 = vpop.f32.mrb[7].mxu1  ;;  %v3150_v19 = vpack.c.bf16 %v2233_v18, %v2232_v17 }
 0x48a   : > { %vm1741_vm15 = vcmp.ge.f32.partialorder %v1738_v21, 0.0  ;;  %v1742_v23 = vmul.f32 0.25, %v1738_v21 }
 0x48c   : > { %v1743_v24 = vsel %vm1741_vm15, %v1738_v21, %v1742_v23 }
 0x48d   : > { %2966 = vmatmul.mubr.msk.f32.vlgmr.msra.gmra.mrb[4].mxu0 %vm908_vm9, %v1743_v24 }
 0x48e   : > { %2995 = vmatprep.mubr.msk.f32.mxu0 %vm3855_vm0, %v3856_v1  ;;  %3127 = vmatpush3.bf16.msra.mxu0 %v3126_v35  ;;  %v2394_v35 = vld [vmem:[#allocation23] sm:$0xff] }
 0x48f   : > { %3128 = vmatprep.subr.bf16.mxu0 %v3854_v0 }
 0x492   : > { %3130 = vmatpush3.bf16.msra.mxu0 %v3129_v36  ;;  %v3159_v36 = vpack.c.bf16 %v2395_v26, %v2394_v35 }
 0x493   : > { %3131 = vmatprep.subr.bf16.mxu0 %v3854_v0 }
 0x496   : > { %3133 = vmatpush3.bf16.msra.mxu0 %v3132_v46  ;;  %v3162_v46 = vpack.c.bf16 %v2397_v45, %v2396_v44 }
 0x497   : > { %3143 = vmatprep.subr.bf16.mxu0 %v3854_v0 }
 0x560   : > { %v1818_v37 = vpop.f32.mrb[4].mxu0 }
 0x561   : > { %vm1823_vm1 = vcmp.ge.f32.partialorder %v1818_v37, 0.0  ;;  %v1824_v38 = vmul.f32 0.25, %v1818_v37  ;;  %v2967_v39 = vpop.f32.mrb[5].mxu0  ;;  %v1827_v42 = vmul.f32 0.5, %v1818_v37 }
 0x563   : > { %v1825_v40 = vsel %vm1823_vm1, %v1818_v37, %v1824_v38 }
 0x564   : > { %v1826_v41 = vmul.f32 0.5, %v1825_v40 }
 0x566   : > { %v1828_v43 = vadd.f32 %v1827_v42, %v1826_v41 }
 0x568   : > { %2981 = vmatmul.mubr.msk.f32.vlgmr.msra.gmra.mrb[8].mxu1 %vm1835_vm2, %v1828_v43 }
 0x569   : > { %3010 = vmatprep.mubr.msk.f32.mxu1 %vm3855_vm0, %v3856_v1  ;;  %3136 = vmatpush3.bf16.msra.mxu1 %v3135_v50 }
 0x56a   : > { %3137 = vmatprep.subr.bf16.mxu1 %v3854_v0 }
 0x56d   : > { %3139 = vmatpush3.bf16.msra.mxu1 %v3138_v52 }
 0x56e   : > { %3140 = vmatprep.subr.bf16.mxu1 %v3854_v0 }
 0x571   : > { %3142 = vmatpush3.bf16.msra.mxu1 %v3141_v60 }
 0x572   : > { %3146 = vmatprep.subr.bf16.mxu1 %v3854_v0 }
 0x63b   : > { %v1905_v53 = vpop.f32.mrb[8].mxu1 }
 0x63c   : > { %v1906_v54 = vadd.f32 %v1905_v53, %v1825_v40  ;;  %v2982_v55 = vpop.f32.mrb[9].mxu1 }
 0x63e   : > { %vm1909_vm3 = vcmp.ge.f32.partialorder %v1906_v54, 0.0  ;;  %v1910_v56 = vmul.f32 0.25, %v1906_v54 }
 0x640   : > { %v1911_v57 = vsel %vm1909_vm3, %v1906_v54, %v1910_v56 }
 0x641   : > { %2996 = vmatmul.mubr.msk.f32.vlgmr.msra.gmra.mrb[6].mxu0 %vm1835_vm2, %v1911_v57 }
 0x642   : > { %3019 = vmatprep.mubr.msk.f32.mxu0 %vm3855_vm0, %v3856_v1  ;;  %3145 = vmatpush3.bf16.msra.mxu0 %v3144_v4 }
 0x643   : > { %3017 = vmatprep.subr.mxu0 %v3856_v1 }
 0x646   : > { %3018 = vmatpush3.msra.mxu0 %v2078_v5 }
 0x647   : > { %3149 = vmatprep.subr.bf16.mxu0 %v3854_v0 }
 0x714   : > { %v1987_v61 = vpop.f32.mrb[6].mxu0 }
 0x715   : > { %v1988_v62 = vadd.f32 %v1987_v61, %v1911_v57  ;;  %v2997_v63 = vpop.f32.mrb[7].mxu0 }
 0x717   : > { %3011 = vmatmul.mubr.msk.f32.vlgmr.msra.gmra.mrb[10].mxu1 %vm1835_vm2, %v1988_v62 }
 0x718   : > { %3028 = vmatprep.mubr.msk.f32.mxu1 %vm3855_vm0, %v3856_v1  ;;  %3148 = vmatpush3.bf16.msra.mxu1 %v3147_v15 }
 0x719   : > { %3026 = vmatprep.subr.mxu1 %v3856_v1 }
 0x71c   : > { %3027 = vmatpush3.msra.mxu1 %v2158_v16 }
 0x71d   : > { %3152 = vmatprep.subr.bf16.mxu1 %v3854_v0 }
 0x7ea   : > { %v2066_v6 = vpop.f32.mrb[10].mxu1 }
 0x7eb   : > { %vm2070_vm4 = vcmp.ge.f32.partialorder %v2066_v6, 0.0  ;;  %v2071_v7 = vmul.f32 0.25, %v2066_v6  ;;  %v3012_v8 = vpop.f32.mrb[11].mxu1  ;;  %v2074_v11 = vmul.f32 0.5, %v2066_v6 }
 0x7ed   : > { %v2072_v9 = vsel %vm2070_vm4, %v2066_v6, %v2071_v7 }
 0x7ee   : > { %v2073_v10 = vmul.f32 0.5, %v2072_v9 }
 0x7f0   : > { %v2075_v12 = vadd.f32 %v2074_v11, %v2073_v10 }
 0x7f2   : > { %3020 = vmatmul.mubr.msk.f32.vlgmr.msra.gmra.mrb[8].mxu0 %vm2079_vm5, %v2075_v12 }
 0x7f3   : > { %3037 = vmatprep.mubr.msk.f32.mxu0 %vm3855_vm0, %v3856_v1  ;;  %3151 = vmatpush3.bf16.msra.mxu0 %v3150_v19 }
 0x7f4   : > { %3035 = vmatprep.subr.mxu0 %v3856_v1 }
 0x7f7   : > { %3036 = vmatpush3.msra.mxu0 %v2234_v25 }
 0x7f8   : > { %3158 = vmatprep.subr.bf16.mxu0 %v3854_v0 }
 0x8c5   : > { %v2149_v20 = vpop.f32.mrb[8].mxu0 }
 0x8c6   : > { %v2150_v21 = vadd.f32 %v2149_v20, %v2072_v9  ;;  %v3021_v22 = vpop.f32.mrb[9].mxu0 }
 0x8c8   : > { %vm2153_vm6 = vcmp.ge.f32.partialorder %v2150_v21, 0.0  ;;  %v2154_v23 = vmul.f32 0.25, %v2150_v21 }
 0x8ca   : > { %v2155_v24 = vsel %vm2153_vm6, %v2150_v21, %v2154_v23 }
 0x8cb   : > { %3029 = vmatmul.mubr.msk.f32.vlgmr.msra.gmra.mrb[12].mxu1 %vm2079_vm5, %v2155_v24 }
 0x8cc   : > { %3048 = vmatprep.mubr.msk.f32.mxu1 %vm3855_vm0, %v3856_v1  ;;  %3154 = vmatpush3.bf16.msra.mxu1 %v3153_v32 }
 0x8cd   : > { %3155 = vmatprep.subr.bf16.mxu1 %v3854_v0 }
 0x99e   : > { %v2228_v27 = vpop.f32.mrb[12].mxu1 }
 0x99f   : > { %v2229_v28 = vadd.f32 %v2228_v27, %v2155_v24  ;;  %v3030_v29 = vpop.f32.mrb[13].mxu1 }
 0x9a1   : > { %3038 = vmatmul.mubr.msk.f32.vlgmr.msra.gmra.mrb[10].mxu0 %vm2079_vm5, %v2229_v28 }
 0x9a2   : > { %3059 = vmatprep.mubr.msk.f32.mxu0 %vm3855_vm0, %v3856_v1  ;;  %v2317_v1 = vld [vmem:[%s4846_s5 + $0x18] sm:$0xff]  ;;  %3160 = vmatpush3.bf16.msra.mxu0 %v3159_v36 }
 0x9a3   : > { %v3156_v34 = vpack.c.bf16 %v2317_v1, %v2316_v33  ;;  %3161 = vmatprep.subr.bf16.mxu0 %v3854_v0 }
 0x9a5   : > { %3157 = vmatpush3.bf16.msra.mxu1 %v3156_v34 }
 0x9a6   : > { %3163 = vmatpush3.bf16.msra.mxu0 %v3162_v46 }
 0xa74   : > { %v2304_v37 = vpop.f32.mrb[10].mxu0 }
 0xa75   : > { %vm2308_vm0 = vcmp.ge.f32.partialorder %v2304_v37, 0.0  ;;  %v2309_v38 = vmul.f32 0.25, %v2304_v37  ;;  %v3039_v39 = vpop.f32.mrb[11].mxu0  ;;  %v2312_v42 = vmul.f32 0.5, %v2304_v37 }
 0xa77   : > { %v2310_v40 = vsel %vm2308_vm0, %v2304_v37, %v2309_v38 }
 0xa78   : > { %v2311_v41 = vmul.f32 0.5, %v2310_v40 }
 0xa7a   : > { %v2313_v43 = vadd.f32 %v2312_v42, %v2311_v41 }
 0xa7c   : > { %3049 = vmatmul.mubr.msk.f32.vlgmr.msra.gmra.mrb[14].mxu1 %vm908_vm9, %v2313_v43 }
 0xb4f   : > { %v2387_v47 = vpop.f32.mrb[14].mxu1 }
 0xb50   : > { %v2388_v48 = vadd.f32 %v2387_v47, %v2310_v40  ;;  %v3050_v0 = vpop.f32.mrb[15].mxu1 }
 0xb52   : > { %vm2391_vm7 = vcmp.ge.f32.partialorder %v2388_v48, 0.0  ;;  %v2392_v49 = vmul.f32 0.25, %v2388_v48 }
 0xb54   : > { %v2393_v50 = vsel %vm2391_vm7, %v2388_v48, %v2392_v49 }
 0xb55   : > { %3060 = vmatmul.mubr.msk.f32.vlgmr.msra.gmra.mrb[12].mxu0 %vm908_vm9, %v2393_v50 }
 0xc28   : > { %v2467_v51 = vpop.f32.mrb[12].mxu0 }
 0xc29   : > { %2471 = vst [vmem:[%s799_s13] sm:$0xff] %v2467_v51  ;;  %v3061_v52 = vpop.f32.mrb[13].mxu0 }
 0xc2a   : > { %3753 = shalt.err (!%p3750_p8)
}
 0xc2b   : > { %s3754_s18 = scalar_lea.hbm %s4678_s15, 128  ;;  %s3758_s23 = scalar_lea.hbm %s4848_s10, 256 }
 0xc2c   : > { %p3755_p11 = scmp.ne.s32.totalorder %s4678_s15, %s3754_s18  ;;  %p3759_p10 = scmp.lt.u32.totalorder %s4678_s15, %s4848_s10 }
 0xc2d   : > { %p3760_p9 = scmp.lt.u32.totalorder %s3758_s23, %s3754_s18  ;;  %p3762_p6 = scmp.lt.u32.totalorder %s3754_s18, %s4678_s15 }
 0xc2e   : > { %p3756_p3 = pnand %p3755_p11, %p4849_p13 }
 0xc2f   : > { %p3761_p4 = por %p3760_p9, %p3759_p10 }
 0xc30   : > { %p3757_p7 = pneg %p3756_p3 }
 0xc31   : > { %p3763_p5 = por %p3762_p6, %p3761_p4 }
 0xc33   : > { %p3764_p1 = pnand %p3763_p5, %p3757_p7 }
 0xc35   : > { %3767 = shalt.err (!%p3764_p1)
}
 0xc36   : > { %3218 = dma.vmem_to_hbm [thread:$0]  (%p4849_p13), %s4673_s17, 128, %s4678_s15, %s2473_s29  }
 0xc37 PF: > { %s4850_s13 = sld [smem:[#allocation35_spill]]  ;;  %s4851_s3 = sld [smem:[#allocation42_spill]] }
 0xc38   : > { %s4852_s16 = sld [smem:[#allocation36_spill]] }
 0xc3d   : > { %s2498_s7 = sand.u32 1, %s4850_s13   ;;  %p4853_p12 = scmp.ne.s32.totalorder %s4851_s3, 0 }
 0xc3e   : > { %p4854_p0 = scmp.ge.s32.totalorder %s4852_s16, 2  ;;  %s2499_s19 = scalar_lea.sflag [#allocation4], %s2498_s7 }
 0xc40   : > { %p3265_p2 = pnand %p4854_p0, %p4853_p12 }
 0xc42   : > { %3817 = dma.done.wait (!%p3265_p2), %s2499_s19, 128  }
 0xc43   : > { %3819 = vsyncadd (!%p3265_p2), %s2499_s19, 4294967168  ;;  %s4855_s27 = sld [smem:[#allocation39_spill]]  ;;  %s4856_s8 = sld [smem:[#allocation40_spill]] }
 0xc44   : > { %s4857_s24 = smov %s3826_s25  ;;  %s4858_s25 = smov %s3830_s26 }
 0xc49   : > { %p39_p8 = scmp.ge.s32.totalorder %s4855_s27, 4   ;;  %s4859_s26 = smov %s4856_s8 }
 0xc4b   :  { %41 = sbr.rel (!%p39_p8) target bundleno = 28 (0x1c), region = 209 }
 0xc52   :  { %2504 = vsyncpa [#allocation3], 1 }
 0xc53   :  { %2506 = vsyncpa [#allocation3 + $0x1], 1 }
 0xc54   :  { %2507 = vsyncpa [#allocation6], 1 }
 0xc55   :  { %2509 = vsyncpa [#allocation6 + $0x1], 1 }
 0xc56   :  { %2510 = vsyncpa [#allocation9], 1 }
 0xc57   :  { %2511 = vsyncpa [#allocation12], 1 }
 0xc58   :  { %2512 = vsyncpa [#allocation15], 1 }
 0xc59   :  { %2513 = vsyncpa [#allocation18], 1 }
 0xc5a   :  { %2514 = vsyncpa [#allocation21], 1 }
 0xc5b   :  { %2515 = vsyncpa [#allocation24], 1 }
 0xc5c   :  { %2516 = vsyncpa [#allocation4], 1 }
 0xc5d   :  { %2518 = vsyncpa [#allocation4 + $0x1], 1 }

// kernel: tpu_custom_call.1
= control target key start
LH: loop header
LB: loop body
LE: loop exit
PB: predicated region body
PF: predicated region fallthrough
CT: control target
= control target key end

     0   :  { %s4720_s0 = inlined_call_operand.hbm [shape: f32[16,4,32], index: 0, kind: input, shape index: {}]   ;;  %s4721_s1 = inlined_call_operand.hbm [shape: f32[16,4,32], index: 1, kind: input, shape index: {}]   ;;  %s4722_s2 = inlined_call_operand.hbm [shape: f32[16,4,32], index: 2, kind: input, shape index: {}]   ;;  %s4723_s3 = inlined_call_operand.hbm [shape: f32[3,4,32], index: 3, kind: input, shape index: {}]   ;;  %s4724_s4 = inlined_call_operand.hbm [shape: f32[3,32,32], index: 4, kind: input, shape index: {}]   ;;  %s4725_s5 = inlined_call_operand.hbm [shape: f32[3,32,32], index: 5, kind: input, shape index: {}]   ;;  %s4726_s6 = inlined_call_operand.hbm [shape: f32[3,32], index: 6, kind: input, shape index: {}]   ;;  %s4727_s7 = inlined_call_operand.hbm [shape: f32[3,32], index: 7, kind: input, shape index: {}]   ;;  %s4728_s8 = inlined_call_operand.vmem [shape: f32[3,32,48], index: 8, kind: input, shape index: {}]   ;;  %s4729_s9 = inlined_call_operand.hbm [shape: f32[48,48], index: 9, kind: input, shape index: {}]   ;;  %s4730_s10 = inlined_call_operand.hbm [shape: f32[48,48], index: 10, kind: input, shape index: {}]   ;;  %s4731_s11 = inlined_call_operand.vmem [shape: f32[48,24], index: 11, kind: input, shape index: {}]   ;;  %s4732_s12 = inlined_call_operand.hbm [shape: f32[24,24], index: 12, kind: input, shape index: {}]   ;;  %s4733_s13 = inlined_call_operand.hbm [shape: f32[24,24], index: 13, kind: input, shape index: {}]   ;;  %s4734_s14 = inlined_call_operand.hbm [shape: f32[24,32], index: 14, kind: input, shape index: {}]   ;;  %s4735_s15 = inlined_call_operand.vmem [shape: f32[32,32], index: 15, kind: input, shape index: {}]   ;;  %s4736_s16 = inlined_call_operand.hbm [shape: f32[32,128], index: 16, kind: input, shape index: {}]   ;;  %s4737_s17 = inlined_call_operand.hbm [shape: f32[16,128], index: 17, kind: output, shape index: {}]  }
   0x1   :  { %4778 = sst [smem:[#allocation43_spill]] %s4720_s0 }
   0x2   :  { %4779 = sst [smem:[#allocation44_spill]] %s4721_s1 }
   0x3   :  { %4780 = sst [smem:[#allocation45_spill]] %s4722_s2 }
   0x4   :  { %4781 = sst [smem:[#allocation46_spill]] %s4723_s3 }
   0x5   :  { %4782 = sst [smem:[#allocation47_spill]] %s4724_s4 }
   0x6   :  { %4783 = sst [smem:[#allocation48_spill]] %s4725_s5 }
   0x7   :  { %4784 = sst [smem:[#allocation49_spill]] %s4727_s7 }
   0x8   :  { %4785 = sst [smem:[#allocation50_spill]] %s4728_s8 }
   0x9   :  { %4786 = sst [smem:[#allocation51_spill]] %s4730_s10 }
   0xa   :  { %4787 = sst [smem:[#allocation52_spill]] %s4731_s11 }
   0xb   :  { %4788 = sst [smem:[#allocation53_spill]] %s4733_s13 }
   0xc   :  { %4789 = sst [smem:[#allocation54_spill]] %s4735_s15 }
   0xd   :  { %4790 = sst [smem:[#allocation55_spill]] %s4736_s16 }
   0xe   :  { %4791 = sst [smem:[#allocation56_spill]] %s4737_s17 }
   0xf   :  { %22 = vsyncpa [#allocation3], 0 }
  0x10   :  { %24 = vsyncpa [#allocation3 + $0x1], 0 }
  0x11   :  { %25 = vsyncpa [#allocation6], 0 }
  0x12   :  { %27 = vsyncpa [#allocation6 + $0x1], 0 }
  0x13   :  { %28 = vsyncpa [#allocation9], 0 }
  0x14   :  { %29 = vsyncpa [#allocation12], 0 }
  0x15   :  { %30 = vsyncpa [#allocation15], 0 }
  0x16   :  { %31 = vsyncpa [#allocation18], 0 }
  0x17   :  { %32 = vsyncpa [#allocation21], 0 }
  0x18   :  { %33 = vsyncpa [#allocation24], 0 }
  0x19   :  { %34 = vsyncpa [#allocation4], 0 }
  0x1a   :  { %36 = vsyncpa [#allocation4 + $0x1], 0  ;;  %s3948_s24 = smov 0   ;;  %s3950_s25 = smov 0  }
  0x1b   :  { %s3952_s26 = smov 0   ;;  %s3954_s27 = smov 0  }
  0x1c LB: > { %4792 = sst [smem:[#allocation35_spill]] %s3822_s24  ;;  %s3836_s28 = smov [#allocation8]   ;;  %s3834_s27 = sphi %s3954_s27, %s4855_s27   ;;  %s3830_s26 = sphi %s3952_s26, %s4859_s26   ;;  %s3826_s25 = sphi %s3950_s25, %s4858_s25   ;;  %s3822_s24 = sphi %s3948_s24, %s4857_s24  }
  0x1d   : > { %4793 = sst [smem:[#allocation36_spill]] %s3834_s27  ;;  %s457_s29 = sshll.u32 %s3836_s28, 4  ;;  %s3974_s29 = int_to_ptr.vmem [resolvable:$true] %s457_s29 }
  0x1e   : > { %s3969_s0 = sadd.s32 4294967295, %s3834_s27   ;;  %p2705_p0 = scmp.ge.s32.totalorder %s3834_s27, 1 }
  0x1f   : > { %4794 = sst [smem:[#allocation37_spill]] %s3969_s0  ;;  %p4749_p1 = scmp.eq.s32.totalorder %s3969_s0, 0 }
  0x20   : > { %p445_p2 = scmp.lt.s32.totalorder %s3834_s27, 3  ;;  %s3837_s19 = smov [#allocation11]  }
  0x21   : > { %s483_s1 = sshll.u32 %s3837_s19, 4  ;;  %s3838_s20 = smov [#allocation14]   ;;  %s3989_s1 = int_to_ptr.vmem [resolvable:$true] %s483_s1 }
  0x22   : > { %p3976_p3 = pnand %p2705_p0, %p445_p2  ;;  %s3991_s21 = sshll.u32 %s3838_s20, 4  ;;  %s509_s21 = int_to_ptr.vmem [resolvable:$true] %s3991_s21 }
  0x23   : > { %s4798_s3 = sld [smem:[#allocation46_spill]] }
  0x24   : > { %s4795_s30 = scalar_select %p3976_p3, 1, 0 }
  0x25   : > { %p3220_p5 = pneg %p3976_p3 }
  0x26   : > { %4796 = sst [smem:[#allocation38_spill]] %s4795_s30 }
  0x27   : > { %p3985_p6 = pnand %p3220_p5, %p4749_p1 }
  0x29   : > { %s4797_s18 = scalar_select %p3985_p6, 1, 0 }
  0x2a   : > { %s3342_s28 = scalar_lea.hbm %s4798_s3, 192  ;;  %p4001_p8 = pneg %p3985_p6 }
  0x2b   : > { %p3343_p7 = scmp.ne.s32.totalorder %s4798_s3, %s3342_s28  ;;  %p3349_p11 = scmp.lt.u32.totalorder %s3342_s28, %s4798_s3 }
  0x2c   : > { %s4799_s11 = scalar_select %p4001_p8, 1, 0 }
  0x2d   : > { %p3345_p9 = pnand %p4001_p8, %p3343_p7 }
  0x2f   : > { %p3346_p10 = pneg %p3345_p9 }
  0x31   : > { %p3351_p12 = pnand %p3349_p11, %p3346_p10 }
  0x33   : > { %3354 = shalt.err (!%p3351_p12)
}
  0x34   : > { %s3355_s15 = scalar_lea.vmem %s3974_s29, 192  ;;  %p3363_p5 = scmp.lt.s32.totalorder %s3974_s29, %s3974_s29 }
  0x35   : > { %p3356_p13 = scmp.ne.s32.totalorder %s3974_s29, %s3355_s15  ;;  %p3364_p4 = scmp.lt.s32.totalorder %s3355_s15, %s3355_s15 }
  0x37   : > { %p3358_p0 = pnand %p3356_p13, %p4001_p8  ;;  %p3365_p7 = por %p3364_p4, %p3363_p5 }
  0x39   : > { %p3359_p2 = pneg %p3358_p0 }
  0x3b   : > { %p3366_p9 = pnand %p3365_p7, %p3359_p2 }
  0x3d   : > { %3369 = shalt.err (!%p3366_p9)
}
  0x3e   : > { %s4747_s17 = smov 64   ;;  %s4751_s22 = smov 4  }
  0x3f   : > { %3223 = dma.hbm_to_vmem [thread:$0]  (!%p3985_p6), %s4798_s3, 192, %s3974_s29, [#allocation9], %s4747_s17, %s4747_s17, %s4751_s22  }
  0x40   : > { %s4800_s5 = sld [smem:[#allocation48_spill]] }
  0x46   : > { %s3370_s15 = scalar_lea.hbm %s4800_s5, 1536 }
  0x47   : > { %p3371_p4 = scmp.ne.s32.totalorder %s4800_s5, %s3370_s15  ;;  %p3377_p12 = scmp.lt.u32.totalorder %s3370_s15, %s4800_s5 }
  0x49   : > { %p3373_p10 = pnand %p3371_p4, %p4001_p8 }
  0x4b   : > { %p3374_p11 = pneg %p3373_p10 }
  0x4d   : > { %p3379_p13 = pnand %p3377_p12, %p3374_p11 }
  0x4f   : > { %3382 = shalt.err (!%p3379_p13)
}
  0x50   : > { %s3383_s29 = scalar_lea.vmem %s3989_s1, 1536  ;;  %p3391_p7 = scmp.lt.s32.totalorder %s3989_s1, %s3989_s1 }
  0x51   : > { %p3384_p0 = scmp.ne.s32.totalorder %s3989_s1, %s3383_s29  ;;  %p3392_p9 = scmp.lt.s32.totalorder %s3383_s29, %s3383_s29 }
  0x53   : > { %p3386_p2 = pnand %p3384_p0, %p4001_p8  ;;  %p3393_p4 = por %p3392_p9, %p3391_p7 }
  0x55   : > { %p3387_p5 = pneg %p3386_p2 }
  0x57   : > { %p3394_p10 = pnand %p3393_p4, %p3387_p5 }
  0x59   : > { %3397 = shalt.err (!%p3394_p10)
}
  0x5a   : > { %s4753_s8 = smov 128   ;;  %s4755_s2 = smov 8  }
  0x5b   : > { %3229 = dma.hbm_to_vmem [thread:$0]  (!%p3985_p6), %s4800_s5, 1536, %s3989_s1, [#allocation12], %s4753_s8, %s4753_s8, %s4755_s2  }
  0x5c   : > { %s4801_s7 = sld [smem:[#allocation49_spill]] }
  0x62   : > { %s3398_s19 = scalar_lea.hbm %s4801_s7, 64 }
  0x63   : > { %p3399_p11 = scmp.ne.s32.totalorder %s4801_s7, %s3398_s19  ;;  %p3405_p0 = scmp.lt.u32.totalorder %s3398_s19, %s4801_s7 }
  0x65   : > { %p3401_p12 = pnand %p3399_p11, %p4001_p8 }
  0x67   : > { %p3402_p13 = pneg %p3401_p12 }
  0x69   : > { %p3407_p2 = pnand %p3405_p0, %p3402_p13 }
  0x6b   : > { %3410 = shalt.err (!%p3407_p2)
}
  0x6c   : > { %s3411_s16 = scalar_lea.vmem %s509_s21, 64  ;;  %p3419_p4 = scmp.lt.s32.totalorder %s509_s21, %s509_s21 }
  0x6d   : > { %p3412_p5 = scmp.ne.s32.totalorder %s509_s21, %s3411_s16  ;;  %p3420_p10 = scmp.lt.s32.totalorder %s3411_s16, %s3411_s16 }
  0x6f   : > { %p3414_p7 = pnand %p3412_p5, %p4001_p8  ;;  %p3421_p1 = por %p3420_p10, %p3419_p4 }
  0x71   : > { %p3415_p9 = pneg %p3414_p7 }
  0x73   : > { %p3422_p3 = pnand %p3421_p1, %p3415_p9 }
  0x75   : > { %3425 = shalt.err (!%p3422_p3)
}
  0x76   : > { %3235 = dma.hbm_to_vmem [thread:$0]  (!%p3985_p6), %s4801_s7, 64, %s509_s21, [#allocation15]  }
  0x77   : > { %s3843_s17 = smov [#allocation17]   ;;  %s3844_s28 = smov [#allocation20]  }
  0x78   : > { %s534_s23 = sshll.u32 %s3843_s17, 4  ;;  %s563_s19 = sshll.u32 %s3844_s28, 4  ;;  %s535_s23 = int_to_ptr.vmem [resolvable:$true] %s534_s23  ;;  %s564_s19 = int_to_ptr.vmem [resolvable:$true] %s563_s19 }
  0x79   : > { %s4802_s10 = sld [smem:[#allocation51_spill]] }
  0x7f   : > { %s3426_s29 = scalar_lea.hbm %s4802_s10, 768 }
  0x80   : > { %p3427_p1 = scmp.ne.s32.totalorder %s4802_s10, %s3426_s29  ;;  %p3433_p12 = scmp.lt.u32.totalorder %s3426_s29, %s4802_s10 }
  0x82   : > { %p3429_p3 = pnand %p3427_p1, %p4001_p8 }
  0x84   : > { %p3430_p11 = pneg %p3429_p3 }
  0x86   : > { %p3435_p13 = pnand %p3433_p12, %p3430_p11 }
  0x88   : > { %3438 = shalt.err (!%p3435_p13)
}
  0x89   : > { %s3439_s21 = scalar_lea.vmem %s535_s23, 768  ;;  %p3447_p7 = scmp.lt.s32.totalorder %s535_s23, %s535_s23 }
  0x8a   : > { %p3440_p0 = scmp.ne.s32.totalorder %s535_s23, %s3439_s21  ;;  %p3448_p9 = scmp.lt.s32.totalorder %s3439_s21, %s3439_s21 }
  0x8c   : > { %p3442_p2 = pnand %p3440_p0, %p4001_p8  ;;  %p3449_p4 = por %p3448_p9, %p3447_p7 }
  0x8e   : > { %p3443_p5 = pneg %p3442_p2 }
  0x90   : > { %p3450_p10 = pnand %p3449_p4, %p3443_p5 }
  0x92   : > { %3453 = shalt.err (!%p3450_p10)
}
  0x93   : > { %s4803_s22 = smov 128   ;;  %s4804_s13 = sld [smem:[#allocation53_spill]] }
  0x94   : > { %3241 = dma.hbm_to_vmem [thread:$0]  (!%p3985_p6), %s4802_s10, 768, %s535_s23, [#allocation18], %s4803_s22, %s4803_s22, %s4755_s2  }
  0x99   : > { %s3454_s20 = scalar_lea.hbm %s4804_s13, 384 }
  0x9a   : > { %p3455_p1 = scmp.ne.s32.totalorder %s4804_s13, %s3454_s20  ;;  %p3461_p12 = scmp.lt.u32.totalorder %s3454_s20, %s4804_s13 }
  0x9c   : > { %p3457_p3 = pnand %p3455_p1, %p4001_p8 }
  0x9e   : > { %p3458_p11 = pneg %p3457_p3 }
  0xa0   : > { %p3463_p13 = pnand %p3461_p12, %p3458_p11 }
  0xa2   : > { %3466 = shalt.err (!%p3463_p13)
}
  0xa3   : > { %s3467_s21 = scalar_lea.vmem %s564_s19, 384  ;;  %p3475_p7 = scmp.lt.s32.totalorder %s564_s19, %s564_s19 }
  0xa4   : > { %p3468_p0 = scmp.ne.s32.totalorder %s564_s19, %s3467_s21  ;;  %p3476_p9 = scmp.lt.s32.totalorder %s3467_s21, %s3467_s21 }
  0xa6   : > { %p3470_p2 = pnand %p3468_p0, %p4001_p8  ;;  %p3477_p4 = por %p3476_p9, %p3475_p7 }
  0xa8   : > { %p3471_p5 = pneg %p3470_p2 }
  0xaa   : > { %p3478_p10 = pnand %p3477_p4, %p3471_p5 }
  0xac   : > { %3481 = shalt.err (!%p3478_p10)
}
  0xad   : > { %3247 = dma.hbm_to_vmem [thread:$0]  (!%p3985_p6), %s4804_s13, 384, %s564_s19, [#allocation21], %s4803_s22, %s4803_s22, %s4755_s2  }
  0xae   : > { %s2704_s30 = sadd.s32 4294967294, %s3834_s27   ;;  %s4114_s17 = sadd.s32 1, %s3834_s27  }
  0xaf   : > { %4805 = sst [smem:[#allocation39_spill]] %s4114_s17  ;;  %s49_s28 = sadd.s32 1, %s3830_s26 }
  0xb0   : > { %s46_s20 = ssub.s32 %s3834_s27, %s4114_s17  ;;  %p56_p1 = scmp.ne.s32.totalorder %s3830_s26, %s3826_s25 }
  0xb1   : > { %p47_p3 = scmp.eq.s32.totalorder %s46_s20, 0  ;;  %p57_p11 = scmp.eq.s32.totalorder %s3834_s27, 0 }
  0xb2   : > { %p62_p12 = scmp.ne.s32.totalorder %s3826_s25, %s3822_s24  ;;  %p432_p13 = scmp.eq.s32.totalorder %s3969_s0, 1 }
  0xb3   : > { %s4126_s15 = scalar_select %p47_p3, %s3830_s26, %s49_s28  }
  0xb4   : > { %p58_p0 = por %p57_p11, %p56_p1  ;;  %p4807_p2 = scmp.eq.s32.totalorder %s3969_s0, 0 }
  0xb5   : > { %4806 = sst [smem:[#allocation40_spill]] %s4126_s15  ;;  %p4134_p7 = por %p432_p13, %p56_p1 }
  0xb6   : > { %p4130_p5 = por %p4807_p2, %p62_p12  ;;  %p438_p9 = scmp.eq.s32.totalorder %s2704_s30, 1 }
  0xb7   : > { %s4809_s29 = scalar_select %p4134_p7, 1, 0 }
  0xb8   : > { %s4808_s19 = scalar_select %p4130_p5, 1, 0 }
  0xb9   : > { %4810 = sst [smem:[#allocation41_spill]] %s4809_s29  ;;  %p3279_p4 = scmp.lt.s32.totalorder %s3834_s27, 2 }
  0xba   : > { %s4757_s16 = sand.u32 1, %s3830_s26   ;;  %p4140_p10 = por %p438_p9, %p62_p12 }
  0xbb   : > { %s4146_s21 = sshll.u32 %s4757_s16, 5  ;;  %s4149_s23 = sshll.u32 %s3834_s27, 9 }
  0xbc   : > { %s4811_s1 = scalar_select %p4140_p10, 1, 0 }
  0xbd   : > { %p4151_p3 = pnand %p3279_p4, %p58_p0  ;;  %s627_s28 = sand.u32 1, %s3834_s27  }
  0xbe   : > { %4812 = sst [smem:[#allocation42_spill]] %s4811_s1  ;;  %s4814_s2 = sld [smem:[#allocation44_spill]] }
  0xbf   : > { %s4813_s8 = scalar_select %p4151_p3, 1, 0 }
  0xc0   : > { %s631_s16 = scalar_lea.vmem [#allocation5], %s4146_s21  ;;  %s4165_s7 = scalar_lea.sflag [#allocation6], %s627_s28 }
  0xc1   : > { %s638_s5 = sshll.u32 %s631_s16, 4  ;;  %p4171_p11 = pneg %p4151_p3  ;;  %s4163_s5 = int_to_ptr.vmem [resolvable:$true] %s638_s5 }
  0xc3   : > { %s4815_s13 = scalar_select %p4171_p11, 1, 0 }
  0xc4   : > { %s4160_s3 = scalar_lea.hbm %s4814_s2, %s4149_s23  ;;  %s3487_s15 = scalar_lea.hbm %s4814_s2, 1024 }
  0xc5   : > { %s3482_s10 = scalar_lea.hbm %s4160_s3, 512  ;;  %p3488_p0 = scmp.lt.u32.totalorder %s4160_s3, %s4814_s2 }
  0xc6   : > { %p3483_p1 = scmp.ne.s32.totalorder %s4160_s3, %s3482_s10  ;;  %p3489_p2 = scmp.lt.u32.totalorder %s3487_s15, %s3482_s10 }
  0xc7   : > { %p3491_p4 = scmp.lt.u32.totalorder %s3482_s10, %s4160_s3 }
  0xc8   : > { %p3485_p12 = pnand %p4171_p11, %p3483_p1  ;;  %p3490_p9 = por %p3489_p2, %p3488_p0 }
  0xca   : > { %p3486_p13 = pneg %p3485_p12  ;;  %p3492_p10 = por %p3491_p4, %p3490_p9 }
  0xcc   : > { %p3493_p7 = pnand %p3492_p10, %p3486_p13 }
  0xce   : > { %3496 = shalt.err (!%p3493_p7)
}
  0xcf   : > { %s3497_s28 = scalar_lea.vmem %s4163_s5, 512  ;;  %s3845_s30 = smov [#allocation5]  }
  0xd0   : > { %p3498_p1 = scmp.ne.s32.totalorder %s4163_s5, %s3497_s28  ;;  %s3502_s20 = sshll.u32 %s3845_s30, 4  ;;  %s3503_s20 = int_to_ptr.vmem [resolvable:$false] %s3502_s20 }
  0xd1   : > { %s3504_s17 = scalar_lea.vmem %s3503_s20, 1024  ;;  %p3505_p6 = scmp.lt.s32.totalorder %s4163_s5, %s3503_s20 }
  0xd2   : > { %p3500_p12 = pnand %p3498_p1, %p4171_p11  ;;  %p3506_p8 = scmp.lt.s32.totalorder %s3504_s17, %s3497_s28 }
  0xd4   : > { %p3501_p5 = pneg %p3500_p12  ;;  %p3507_p0 = por %p3506_p8, %p3505_p6 }
  0xd6   : > { %p3508_p2 = pnand %p3507_p0, %p3501_p5 }
  0xd8   : > { %3511 = shalt.err (!%p3508_p2)
}
  0xd9   : > { %s4816_s10 = smov 4   ;;  %s4817_s15 = smov 64  }
  0xda   : > { %3260 = dma.hbm_to_vmem [thread:$0]  (!%p4151_p3), %s4160_s3, 512, %s4163_s5, %s4165_s7, %s4817_s15, %s4817_s15, %s4816_s10  }
  0xdb   : > { %s3846_s16 = smov [#allocation10]   ;;  %s3847_s30 = smov [#allocation13]  }
  0xdc   : > { %s470_s2 = sshll.u32 %s3846_s16, 4  ;;  %s497_s27 = sshll.u32 %s3847_s30, 4  ;;  %s471_s2 = int_to_ptr.vmem [resolvable:$true] %s470_s2  ;;  %s498_s27 = int_to_ptr.vmem [resolvable:$true] %s497_s27 }
  0xdd   : > { %s4818_s4 = sld [smem:[#allocation47_spill]]  ;;  %p4819_p8 = scmp.ne.s32.totalorder %s4799_s11, 0 }
  0xe3   : > { %s3512_s17 = scalar_lea.hbm %s4818_s4, 1536 }
  0xe4   : > { %p3513_p6 = scmp.ne.s32.totalorder %s4818_s4, %s3512_s17  ;;  %p3519_p10 = scmp.lt.u32.totalorder %s3512_s17, %s4818_s4 }
  0xe6   : > { %p3515_p5 = pnand %p3513_p6, %p4819_p8 }
  0xe8   : > { %p3516_p7 = pneg %p3515_p5 }
  0xea   : > { %p3521_p13 = pnand %p3519_p10, %p3516_p7 }
  0xec   : > { %3524 = shalt.err (!%p3521_p13)
}
  0xed   : > { %s3525_s3 = scalar_lea.vmem %s471_s2, 1536  ;;  %p3533_p12 = scmp.lt.s32.totalorder %s471_s2, %s471_s2 }
  0xee   : > { %p3526_p9 = scmp.ne.s32.totalorder %s471_s2, %s3525_s3  ;;  %p3534_p0 = scmp.lt.s32.totalorder %s3525_s3, %s3525_s3 }
  0xf0   : > { %p3528_p4 = pnand %p3526_p9, %p4819_p8  ;;  %p3535_p2 = por %p3534_p0, %p3533_p12 }
  0xf2   : > { %p3529_p1 = pneg %p3528_p4 }
  0xf4   : > { %p3536_p3 = pnand %p3535_p2, %p3529_p1 }
  0xf6   : > { %3539 = shalt.err (!%p3536_p3)
}
  0xf7   : > { %p4820_p6 = scmp.ne.s32.totalorder %s4797_s18, 0  ;;  %s4821_s5 = smov 8  }
  0xf8   : > { %s3540_s16 = scalar_lea.hbm %s4726_s6, 64 }
  0xf9   : > { %3226 = dma.hbm_to_vmem [thread:$0]  (!%p4820_p6), %s4818_s4, 1536, %s471_s2, [#allocation9], %s4803_s22, %s4803_s22, %s4821_s5  }
  0xfa   : > { %p3541_p5 = scmp.ne.s32.totalorder %s4726_s6, %s3540_s16  ;;  %p3547_p10 = scmp.lt.u32.totalorder %s3540_s16, %s4726_s6 }
  0xfc   : > { %p3543_p3 = pnand %p3541_p5, %p4819_p8 }
  0xfe   : > { %p3544_p7 = pneg %p3543_p3 }
 0x100   : > { %p3549_p13 = pnand %p3547_p10, %p3544_p7 }
 0x102   : > { %3552 = shalt.err (!%p3549_p13)
}
 0x103   : > { %s3553_s3 = scalar_lea.vmem %s498_s27, 64  ;;  %p3561_p12 = scmp.lt.s32.totalorder %s498_s27, %s498_s27 }
 0x104   : > { %p3554_p9 = scmp.ne.s32.totalorder %s498_s27, %s3553_s3  ;;  %p3562_p0 = scmp.lt.s32.totalorder %s3553_s3, %s3553_s3 }
 0x106   : > { %p3556_p4 = pnand %p3554_p9, %p4819_p8  ;;  %p3563_p2 = por %p3562_p0, %p3561_p12 }
 0x108   : > { %p3557_p1 = pneg %p3556_p4 }
 0x10a   : > { %p3564_p11 = pnand %p3563_p2, %p3557_p1 }
 0x10c   : > { %3567 = shalt.err (!%p3564_p11)
}
 0x10d   : > { %3232 = dma.hbm_to_vmem [thread:$0]  (!%p4820_p6), %s4726_s6, 64, %s498_s27, [#allocation12]  }
 0x10e   : > { %s3848_s0 = smov [#allocation16]   ;;  %s3849_s1 = smov [#allocation19]  }
 0x10f   : > { %s521_s29 = sshll.u32 %s3848_s0, 4  ;;  %s550_s16 = sshll.u32 %s3849_s1, 4  ;;  %s522_s29 = int_to_ptr.vmem [resolvable:$true] %s521_s29  ;;  %s551_s16 = int_to_ptr.vmem [resolvable:$true] %s550_s16 }
 0x110   : > { %s3568_s28 = scalar_lea.hbm %s4729_s9, 768 }
 0x111   : > { %p3569_p11 = scmp.ne.s32.totalorder %s4729_s9, %s3568_s28  ;;  %p3575_p7 = scmp.lt.u32.totalorder %s3568_s28, %s4729_s9 }
 0x113   : > { %p3571_p5 = pnand %p3569_p11, %p4819_p8 }
 0x115   : > { %p3572_p3 = pneg %p3571_p5 }
 0x117   : > { %p3577_p10 = pnand %p3575_p7, %p3572_p3 }
 0x119   : > { %3580 = shalt.err (!%p3577_p10)
}
 0x11a   : > { %s3581_s27 = scalar_lea.vmem %s522_s29, 768  ;;  %p3589_p1 = scmp.lt.s32.totalorder %s522_s29, %s522_s29 }
 0x11b   : > { %p3582_p13 = scmp.ne.s32.totalorder %s522_s29, %s3581_s27  ;;  %p3590_p12 = scmp.lt.s32.totalorder %s3581_s27, %s3581_s27 }
 0x11d   : > { %p3584_p9 = pnand %p3582_p13, %p4819_p8  ;;  %p3591_p0 = por %p3590_p12, %p3589_p1 }
 0x11f   : > { %p3585_p4 = pneg %p3584_p9 }
 0x121   : > { %p3592_p2 = pnand %p3591_p0, %p3585_p4 }
 0x123   : > { %3595 = shalt.err (!%p3592_p2)
}
 0x124   : > { %3238 = dma.hbm_to_vmem [thread:$0]  (!%p4820_p6), %s4729_s9, 768, %s522_s29, [#allocation15], %s4803_s22, %s4803_s22, %s4821_s5  }
 0x125   : > { %s3596_s30 = scalar_lea.hbm %s4732_s12, 384 }
 0x126   : > { %p3597_p11 = scmp.ne.s32.totalorder %s4732_s12, %s3596_s30  ;;  %p3603_p7 = scmp.lt.u32.totalorder %s3596_s30, %s4732_s12 }
 0x128   : > { %p3599_p5 = pnand %p3597_p11, %p4819_p8 }
 0x12a   : > { %p3600_p3 = pneg %p3599_p5 }
 0x12c   : > { %p3605_p10 = pnand %p3603_p7, %p3600_p3 }
 0x12e   : > { %3608 = shalt.err (!%p3605_p10)
}
 0x12f   : > { %s3609_s2 = scalar_lea.vmem %s551_s16, 384  ;;  %p3617_p1 = scmp.lt.s32.totalorder %s551_s16, %s551_s16 }
 0x130   : > { %p3610_p13 = scmp.ne.s32.totalorder %s551_s16, %s3609_s2  ;;  %p3618_p12 = scmp.lt.s32.totalorder %s3609_s2, %s3609_s2 }
 0x132   : > { %p3612_p9 = pnand %p3610_p13, %p4819_p8  ;;  %p3619_p0 = por %p3618_p12, %p3617_p1 }
 0x134   : > { %p3613_p4 = pneg %p3612_p9 }
 0x136   : > { %p3620_p2 = pnand %p3619_p0, %p3613_p4 }
 0x138   : > { %3623 = shalt.err (!%p3620_p2)
}
 0x139   : > { %3244 = dma.hbm_to_vmem [thread:$0]  (!%p4820_p6), %s4732_s12, 384, %s551_s16, [#allocation18], %s4803_s22, %s4803_s22, %s4821_s5  }
 0x13a   : > { %s3850_s4 = smov [#allocation22]   ;;  %s3851_s0 = smov [#allocation23]  }
 0x13b   : > { %s576_s24 = sshll.u32 %s3850_s4, 4  ;;  %s592_s1 = sshll.u32 %s3851_s0, 4  ;;  %s577_s24 = int_to_ptr.vmem [resolvable:$true] %s576_s24  ;;  %s593_s1 = int_to_ptr.vmem [resolvable:$true] %s592_s1 }
 0x13c   : > { %s3624_s28 = scalar_lea.hbm %s4734_s14, 384 }
 0x13d   : > { %p3625_p11 = scmp.ne.s32.totalorder %s4734_s14, %s3624_s28  ;;  %p3631_p7 = scmp.lt.u32.totalorder %s3624_s28, %s4734_s14 }
 0x13f   : > { %p3627_p5 = pnand %p3625_p11, %p4819_p8 }
 0x141   : > { %p3628_p3 = pneg %p3627_p5 }
 0x143   : > { %p3633_p10 = pnand %p3631_p7, %p3628_p3 }
 0x145   : > { %3636 = shalt.err (!%p3633_p10)
}
 0x146   : > { %s3637_s16 = scalar_lea.vmem %s577_s24, 384  ;;  %p3645_p1 = scmp.lt.s32.totalorder %s577_s24, %s577_s24 }
 0x147   : > { %p3638_p13 = scmp.ne.s32.totalorder %s577_s24, %s3637_s16  ;;  %p3646_p12 = scmp.lt.s32.totalorder %s3637_s16, %s3637_s16 }
 0x149   : > { %p3640_p9 = pnand %p3638_p13, %p4819_p8  ;;  %p3647_p0 = por %p3646_p12, %p3645_p1 }
 0x14b   : > { %p3641_p4 = pneg %p3640_p9 }
 0x14d   : > { %p3648_p2 = pnand %p3647_p0, %p3641_p4 }
 0x14f   : > { %3651 = shalt.err (!%p3648_p2)
}
 0x150   : > { %3250 = dma.hbm_to_vmem [thread:$0]  (!%p4820_p6), %s4734_s14, 384, %s577_s24, [#allocation21], %s4803_s22, %s4803_s22, %s4821_s5  }
 0x151   : > { %s4822_s20 = sld [smem:[#allocation55_spill]] }
 0x157   : > { %s3652_s28 = scalar_lea.hbm %s4822_s20, 512 }
 0x158   : > { %p3653_p11 = scmp.ne.s32.totalorder %s4822_s20, %s3652_s28  ;;  %p3659_p7 = scmp.lt.u32.totalorder %s3652_s28, %s4822_s20 }
 0x15a   : > { %p3655_p5 = pnand %p3653_p11, %p4819_p8 }
 0x15c   : > { %p3656_p3 = pneg %p3655_p5 }
 0x15e   : > { %p3661_p10 = pnand %p3659_p7, %p3656_p3 }
 0x160   : > { %3664 = shalt.err (!%p3661_p10)
}
 0x161   : > { %s3665_s16 = scalar_lea.vmem %s593_s1, 512  ;;  %p3673_p1 = scmp.lt.s32.totalorder %s593_s1, %s593_s1 }
 0x162   : > { %p3666_p13 = scmp.ne.s32.totalorder %s593_s1, %s3665_s16  ;;  %p3674_p12 = scmp.lt.s32.totalorder %s3665_s16, %s3665_s16 }
 0x164   : > { %p3668_p9 = pnand %p3666_p13, %p4819_p8  ;;  %p3675_p0 = por %p3674_p12, %p3673_p1 }
 0x166   : > { %p3669_p4 = pneg %p3668_p9 }
 0x168   : > { %p3676_p2 = pnand %p3675_p0, %p3669_p4 }
 0x16a   : > { %3679 = shalt.err (!%p3676_p2)
}
 0x16b   : > { %3253 = dma.hbm_to_vmem [thread:$0]  (!%p4820_p6), %s4822_s20, 512, %s593_s1, [#allocation24], %s4803_s22, %s4803_s22, %s4821_s5  }
 0x16c   : > { %s4823_s0 = sld [smem:[#allocation43_spill]]  ;;  %s610_s18 = scalar_lea.vmem [#allocation2], %s4146_s21 }
 0x16d   : > { %s617_s28 = sshll.u32 %s610_s18, 4  ;;  %s4824_s2 = sld [smem:[#allocation45_spill]]  ;;  %s4328_s28 = int_to_ptr.vmem [resolvable:$true] %s617_s28 }
 0x16e   : > { %s4825_s16 = sand.u32 1, %s3830_s26   ;;  %p4826_p6 = scmp.ne.s32.totalorder %s4815_s13, 0 }
 0x16f   : > { %s4338_s22 = scalar_lea.sflag [#allocation3], %s4825_s16 }
 0x172   : > { %s4325_s30 = scalar_lea.hbm %s4823_s0, %s4149_s23  ;;  %s3685_s27 = scalar_lea.hbm %s4823_s0, 1024 }
 0x173   : > { %s4334_s29 = scalar_lea.hbm %s4824_s2, %s4149_s23  ;;  %s3680_s5 = scalar_lea.hbm %s4325_s30, 512 }
 0x174   : > { %p3681_p8 = scmp.ne.s32.totalorder %s4325_s30, %s3680_s5  ;;  %p3686_p3 = scmp.lt.u32.totalorder %s4325_s30, %s4823_s0 }
 0x175   : > { %p3687_p7 = scmp.lt.u32.totalorder %s3685_s27, %s3680_s5  ;;  %p3689_p13 = scmp.lt.u32.totalorder %s3680_s5, %s4325_s30 }
 0x176   : > { %p3683_p11 = pnand %p3681_p8, %p4826_p6 }
 0x177   : > { %p3688_p10 = por %p3687_p7, %p3686_p3 }
 0x178   : > { %p3684_p5 = pneg %p3683_p11 }
 0x179   : > { %p3690_p9 = por %p3689_p13, %p3688_p10 }
 0x17b   : > { %p3691_p4 = pnand %p3690_p9, %p3684_p5 }
 0x17d   : > { %3694 = shalt.err (!%p3691_p4)
}
 0x17e   : > { %s3695_s23 = scalar_lea.vmem %s4328_s28, 512  ;;  %s3852_s18 = smov [#allocation2]  }
 0x17f   : > { %p3696_p1 = scmp.ne.s32.totalorder %s4328_s28, %s3695_s23  ;;  %s3700_s17 = sshll.u32 %s3852_s18, 4  ;;  %s3701_s17 = int_to_ptr.vmem [resolvable:$false] %s3700_s17 }
 0x180   : > { %s3702_s3 = scalar_lea.vmem %s3701_s17, 1024  ;;  %p3703_p2 = scmp.lt.s32.totalorder %s4328_s28, %s3701_s17 }
 0x181   : > { %p3698_p12 = pnand %p3696_p1, %p4826_p6  ;;  %p3704_p8 = scmp.lt.s32.totalorder %s3702_s3, %s3695_s23 }
 0x183   : > { %p3699_p0 = pneg %p3698_p12  ;;  %p3705_p11 = por %p3704_p8, %p3703_p2 }
 0x185   : > { %p3706_p3 = pnand %p3705_p11, %p3699_p0 }
 0x187   : > { %3709 = shalt.err (!%p3706_p3)
}
 0x188   : > { %p4827_p5 = scmp.ne.s32.totalorder %s4813_s8, 0  ;;  %s652_s16 = scalar_lea.vmem [#allocation7], %s4146_s21 }
 0x189   : > { %s659_s5 = sshll.u32 %s652_s16, 4  ;;  %s3710_s1 = scalar_lea.hbm %s4334_s29, 512  ;;  %s4366_s5 = int_to_ptr.vmem [resolvable:$true] %s659_s5 }
 0x18a   : > { %3257 = dma.hbm_to_vmem [thread:$0]  (!%p4827_p5), %s4325_s30, 512, %s4328_s28, %s4338_s22, %s4817_s15, %s4817_s15, %s4816_s10  }
 0x18b   : > { %p3711_p7 = scmp.ne.s32.totalorder %s4334_s29, %s3710_s1  ;;  %s3715_s11 = scalar_lea.hbm %s4824_s2, 1024 }
 0x18c   : > { %p3716_p9 = scmp.lt.u32.totalorder %s4334_s29, %s4824_s2  ;;  %p3717_p4 = scmp.lt.u32.totalorder %s3715_s11, %s3710_s1 }
 0x18d   : > { %p3713_p10 = pnand %p3711_p7, %p4826_p6  ;;  %p3719_p12 = scmp.lt.u32.totalorder %s3710_s1, %s4334_s29 }
 0x18e   : > { %p3718_p1 = por %p3717_p4, %p3716_p9 }
 0x18f   : > { %p3714_p13 = pneg %p3713_p10 }
 0x190   : > { %p3720_p0 = por %p3719_p12, %p3718_p1 }
 0x192   : > { %p3721_p2 = pnand %p3720_p0, %p3714_p13 }
 0x194   : > { %3724 = shalt.err (!%p3721_p2)
}
 0x195   : > { %s3725_s21 = scalar_lea.vmem %s4366_s5, 512  ;;  %s3853_s30 = smov [#allocation7]  }
 0x196   : > { %p3726_p8 = scmp.ne.s32.totalorder %s4366_s5, %s3725_s21  ;;  %s3730_s28 = sshll.u32 %s3853_s30, 4  ;;  %s3731_s28 = int_to_ptr.vmem [resolvable:$false] %s3730_s28 }
 0x197   : > { %s3732_s22 = scalar_lea.vmem %s3731_s28, 1024  ;;  %p3733_p7 = scmp.lt.s32.totalorder %s4366_s5, %s3731_s28 }
 0x198   : > { %p3728_p11 = pnand %p3726_p8, %p4826_p6  ;;  %p3734_p10 = scmp.lt.s32.totalorder %s3732_s22, %s3725_s21 }
 0x19a   : > { %p3729_p3 = pneg %p3728_p11  ;;  %p3735_p9 = por %p3734_p10, %p3733_p7 }
 0x19c   : > { %p3736_p4 = pnand %p3735_p9, %p3729_p3 }
 0x19e   : > { %3739 = shalt.err (!%p3736_p4)
}
 0x19f   : > { %3263 = dma.hbm_to_vmem [thread:$0]  (!%p4827_p5), %s4334_s29, 512, %s4366_s5, %s4165_s7, %s4817_s15, %s4817_s15, %s4816_s10  }
 0x1a0   : > { %s4828_s13 = sld [smem:[#allocation38_spill]] }
 0x1a6   : > { %p4829_p6 = scmp.ne.s32.totalorder %s4828_s13, 0 }
 0x1a7   : > { %s4396_s18 = sand.u32 (!%p4829_p6), 1, %s3826_s25   ;;  %p4830_p13 = scmp.ne.s32.totalorder (!%p4829_p6), %s4808_s19, 0 }
 0x1a8   : > { %671 = sbr.rel (%p4829_p6) target bundleno = 3127 (0xc37), region = 88  ;;  %s2728_s17 = sshll.u32 (!%p4829_p6), %s4396_s18, 5 }
 0x1a9   : > { %s674_s3 = scalar_lea.sflag (!%p4829_p6), [#allocation3], %s4396_s18  ;;  %s4400_s16 = scalar_lea.vmem (!%p4829_p6), [#allocation2], %s2728_s17 }
 0x1af   : > { %3785 = dma.done.wait (%p4830_p13), %s674_s3, 512  }
 0x1b0   : > { %3787 = vsyncadd (%p4830_p13), %s674_s3, 4294966784  ;;  %s4831_s8 = sld [smem:[#allocation37_spill]]  ;;  %s4407_s15 = scalar_lea.vmem [#allocation5], %s2728_s17 }
 0x1b6   : > { %s682_s7 = sand.u32 1, %s4831_s8  }
 0x1b7   : > { %s683_s10 = scalar_lea.sflag [#allocation6], %s682_s7 }
 0x1b8   : > { %3789 = dma.done.wait (%p4830_p13), %s683_s10, 1024  }
 0x1b9   : > { %3791 = vsyncadd (%p4830_p13), %s683_s10, 4294966272  ;;  %s4413_s29 = scalar_lea.vmem [#allocation7], %s2728_s17  ;;  %p4832_p5 = scmp.eq.s32.totalorder %s4831_s8, 0 }
 0x1bb   : > { %3793 = dma.done.wait (%p4832_p5), [#allocation9], 1728   ;;  %p4833_p1 = pmov %p4832_p5 }
 0x1bd   : > { %3795 = vsyncadd (%p4833_p1), [#allocation9], 4294965568  ;;  %p4834_p12 = pmov %p4833_p1 }
 0x1be   : > { %p4835_p0 = pmov %p4833_p1 }
 0x1bf   : > { %3797 = dma.done.wait (%p4834_p12), [#allocation12], 1600  }
 0x1c0   : > { %3799 = vsyncadd (%p4835_p0), [#allocation12], 4294965696  ;;  %p4836_p2 = pmov %p4835_p0 }
 0x1c1   : > { %p4837_p8 = pmov %p4835_p0 }
 0x1c2   : > { %3801 = dma.done.wait (%p4836_p2), [#allocation15], 832  }
 0x1c3   : > { %3803 = vsyncadd (%p4837_p8), [#allocation15], 4294966464  ;;  %p4838_p11 = pmov %p4835_p0 }
 0x1c4   : > { %p4839_p3 = pmov %p4835_p0 }
 0x1c5   : > { %3805 = dma.done.wait (%p4838_p11), [#allocation18], 1152  }
 0x1c6   : > { %3807 = vsyncadd (%p4839_p3), [#allocation18], 4294966144  ;;  %p4840_p7 = pmov %p4835_p0 }
 0x1c7   : > { %p4841_p10 = pmov %p4835_p0 }
 0x1c8   : > { %3809 = dma.done.wait (%p4840_p7), [#allocation21], 768  }
 0x1c9   : > { %3811 = vsyncadd (%p4841_p10), [#allocation21], 4294966528  ;;  %p4842_p9 = pmov %p4835_p0 }
 0x1ca   : > { %p4843_p4 = pmov %p4835_p0 }
 0x1cb   : > { %3813 = dma.done.wait (%p4842_p9), [#allocation24], 512  }
 0x1cc   : > { %3815 = vsyncadd (%p4843_p4), [#allocation24], 4294966784  ;;  %v3854_v0 = vmov 0.0|0.0   ;;  %vm3855_vm0 = vmmov 0   ;;  %v3856_v1 = vmov 0.0   ;;  %v877_v2 = vld [vmem:[#allocation10] sm:$0xff] }
 0x1cd   : > { %3062 = vmatprep.subr.bf16.mxu0 %v3854_v0  ;;  %2877 = vmatprep.mubr.msk.f32.mxu0 %vm3855_vm0, %v3856_v1  ;;  %v878_v3 = vld [vmem:[#allocation10 + $0x8] sm:$0xff]  ;;  %v879_v4 = vld [vmem:[#allocation10 + $0x10] sm:$0xff]  ;;  %v880_v6 = vld [vmem:[#allocation10 + $0x18] sm:$0xff]  ;;  %vm820_vm1 = vcmask 257024   ;;  %vm894_vm2 = vcmask 1041409   ;;  %vm896_vm3 = vcmask 1042434  }
 0x1ce   : > { %3068 = vmatprep.subr.bf16.mxu1 %v3854_v0  ;;  %2888 = vmatprep.mubr.msk.f32.mxu1 %vm3855_vm0, %v3856_v1  ;;  %v3063_v5 = vpack.c.bf16 %v878_v3, %v877_v2  ;;  %v803_v7 = vld [vmem:[%s4400_s16] sm:$0xf]  ;;  %v804_v8 = vld [vmem:[%s4400_s16 + $0x4] sm:$0xf]  ;;  %v805_v9 = vld [vmem:[%s4400_s16 + $0x8] sm:$0xf]  ;;  %v3066_v12 = vpack.c.bf16 %v880_v6, %v879_v4 }
 0x1cf   : > { %v806_v10 = vld [vmem:[%s4400_s16 + $0xc] sm:$0xf]  ;;  %v807_v11 = vld [vmem:[%s4400_s16 + $0x10] sm:$0xf]  ;;  %v808_v13 = vld [vmem:[%s4400_s16 + $0x14] sm:$0xf] }
 0x1d0   : > { %3064 = vmatpush3.bf16.msra.mxu0 %v3063_v5  ;;  %v809_v14 = vld [vmem:[%s4400_s16 + $0x18] sm:$0xf]  ;;  %v810_v15 = vld [vmem:[%s4400_s16 + $0x1c] sm:$0xf]  ;;  %v811_v16 = vld [vmem:[#allocation8] sm:$0xf] }
 0x1d1   : > { %3065 = vmatprep.subr.bf16.mxu0 %v3854_v0  ;;  %v812_v17 = vmul.f32 %v811_v16, %v803_v7  ;;  %v813_v18 = vmul.f32 %v811_v16, %v804_v8  ;;  %v814_v19 = vmul.f32 %v811_v16, %v805_v9  ;;  %v815_v20 = vmul.f32 %v811_v16, %v806_v10  ;;  %v4463_v61 = vld [vmem:[#allocation10 + $0x20] sm:$0xff]  ;;  %v1149_v4 = vld [vmem:[#allocation10 + $0x28] sm:$0xff]  ;;  %v4465_v5 = vld [vmem:[#allocation10 + $0x30] sm:$0xff]  ;;  %s4844_s1 = sld [smem:[#allocation50_spill]]  ;;  %s4845_s21 = sld [smem:[#allocation52_spill]] }
 0x1d2   : > { %v816_v21 = vmul.f32 %v811_v16, %v807_v11  ;;  %v817_v22 = vmul.f32 %v811_v16, %v808_v13  ;;  %v818_v23 = vmul.f32 %v811_v16, %v809_v14  ;;  %v819_v24 = vmul.f32 %v811_v16, %v810_v15  ;;  %v4467_v10 = vld [vmem:[#allocation10 + $0x38] sm:$0xff]  ;;  %v1073_v11 = vld [vmem:[%s4407_s15] sm:$0xf]  ;;  %s4846_s5 = sld [smem:[#allocation54_spill]]  ;;  %s4847_s28 = sld [smem:[#allocation41_spill]] }
 0x1d3   : > { %v821_v25 = vsel %vm820_vm1, %v812_v17, 0.0  ;;  %v828_v26 = vsel %vm820_vm1, %v813_v18, 0.0  ;;  %v835_v27 = vsel %vm820_vm1, %v814_v19, 0.0  ;;  %v842_v28 = vsel %vm820_vm1, %v815_v20, 0.0  ;;  %v1074_v17 = vld [vmem:[%s4407_s15 + $0x4] sm:$0xf] }
 0x1d4   : > { %3067 = vmatpush3.bf16.msra.mxu0 %v3066_v12  ;;  %v822_v29 = vrot.slane %v821_v25, 4  ;;  %v829_v30 = vrot.slane %v828_v26, 4  ;;  %v836_v31 = vrot.slane %v835_v27, 4  ;;  %v843_v32 = vrot.slane %v842_v28, 4  ;;  %v1082_v12 = vld [vmem:[#allocation8 + $0x4] sm:$0xf] }
 0x1d5   : > { %3074 = vmatprep.subr.bf16.mxu0 %v3854_v0  ;;  %v849_v33 = vsel %vm820_vm1, %v816_v21, 0.0  ;;  %v856_v34 = vsel %vm820_vm1, %v817_v22, 0.0  ;;  %v863_v35 = vsel %vm820_vm1, %v818_v23, 0.0  ;;  %v870_v36 = vsel %vm820_vm1, %v819_v24, 0.0  ;;  %v1075_v18 = vld [vmem:[%s4407_s15 + $0x8] sm:$0xf] }
 0x1d6   : > { %v823_v37 = vadd.f32 %v822_v29, %v821_v25  ;;  %v830_v38 = vadd.f32 %v829_v30, %v828_v26  ;;  %v837_v39 = vadd.f32 %v836_v31, %v835_v27  ;;  %v844_v40 = vadd.f32 %v843_v32, %v842_v28  ;;  %v1076_v23 = vld [vmem:[%s4407_s15 + $0xc] sm:$0xf]  ;;  %v1077_v27 = vld [vmem:[%s4407_s15 + $0x10] sm:$0xf]  ;;  %v1078_v28 = vld [vmem:[%s4407_s15 + $0x14] sm:$0xf] }
 0x1d7   : > { %v850_v41 = vrot.slane %v849_v33, 4  ;;  %v857_v42 = vrot.slane %v856_v34, 4  ;;  %v864_v43 = vrot.slane %v863_v35, 4  ;;  %v871_v44 = vrot.slane %v870_v36, 4  ;;  %v1079_v29 = vld [vmem:[%s4407_s15 + $0x18] sm:$0xf] }
 0x1d8   : > { %v824_v45 = vrot.slane %v823_v37, 2  ;;  %v831_v46 = vrot.slane %v830_v38, 2  ;;  %v838_v47 = vrot.slane %v837_v39, 2  ;;  %v845_v48 = vrot.slane %v844_v40, 2  ;;  %s2742_s22 = sshll.u32 %s4396_s18, 3  ;;  %s2775_s3 = sshll.u32 %s4831_s8, 7 }
 0x1d9   : > { %vm898_vm4 = vcmask 1043459   ;;  %v851_v49 = vadd.f32 %v850_v41, %v849_v33  ;;  %v858_v50 = vadd.f32 %v857_v42, %v856_v34  ;;  %v865_v51 = vadd.f32 %v864_v43, %v863_v35  ;;  %v1080_v35 = vld [vmem:[%s4407_s15 + $0x1c] sm:$0xf]  ;;  %s799_s13 = scalar_lea.vmem [#allocation25], %s2742_s22  ;;  %s4848_s10 = sld [smem:[#allocation56_spill]] }
 0x1da   : > { %v872_v52 = vadd.f32 %v871_v44, %v870_v36  ;;  %vm900_vm5 = vcmask 1044484   ;;  %v825_v53 = vadd.f32 %v824_v45, %v823_v37  ;;  %v832_v54 = vadd.f32 %v831_v46, %v830_v38  ;;  %s2486_s17 = sshll.u32 %s799_s13, 4  ;;  %p4849_p13 = scmp.ne.s32.totalorder %s4847_s28, 0  ;;  %s4673_s17 = int_to_ptr.vmem [resolvable:$true] %s2486_s17 }
 0x1db   : > { %v839_v55 = vadd.f32 %v838_v47, %v837_v39  ;;  %v846_v56 = vadd.f32 %v845_v48, %v844_v40  ;;  %vm902_vm6 = vcmask 1045509   ;;  %v852_v57 = vrot.slane %v851_v49, 2  ;;  %s3740_s19 = scalar_lea.vmem %s4673_s17, 128  ;;  %s3857_s8 = smov [#allocation25]  }
 0x1dc   : > { %v859_v58 = vrot.slane %v858_v50, 2  ;;  %v866_v59 = vrot.slane %v865_v51, 2  ;;  %v873_v60 = vrot.slane %v872_v52, 2  ;;  %vm904_vm7 = vcmask 1046534   ;;  %p3741_p6 = scmp.ne.s32.totalorder %s4673_s17, %s3740_s19  ;;  %s3744_s24 = sshll.u32 %s3857_s8, 4  ;;  %s3745_s24 = int_to_ptr.vmem [resolvable:$false] %s3744_s24 }
 0x1dd   : > { %v826_v62 = vrot.slane %v825_v53, 1  ;;  %v833_v63 = vrot.slane %v832_v54, 1  ;;  %v840_v2 = vrot.slane %v839_v55, 1  ;;  %v847_v3 = vrot.slane %v846_v56, 1  ;;  %s3746_s27 = scalar_lea.vmem %s3745_s24, 256  ;;  %p3747_p12 = scmp.lt.s32.totalorder %s4673_s17, %s3745_s24 }
 0x1de   : > { %vm906_vm8 = vcmask 1047559   ;;  %v853_v6 = vadd.f32 %v852_v57, %v851_v49  ;;  %v860_v7 = vadd.f32 %v859_v58, %v858_v50  ;;  %v867_v8 = vadd.f32 %v866_v59, %v865_v51  ;;  %p3742_p5 = pnand %p3741_p6, %p4849_p13  ;;  %p3748_p0 = scmp.lt.s32.totalorder %s3746_s27, %s3740_s19 }
 0x1df   : > { %v874_v9 = vadd.f32 %v873_v60, %v872_v52  ;;  %vm908_vm9 = vcmask 261120   ;;  %v827_v13 = vadd.f32 %v826_v62, %v825_v53  ;;  %v834_v14 = vadd.f32 %v833_v63, %v832_v54  ;;  %s4678_s15 = scalar_lea.hbm %s4848_s10, %s2775_s3 }
 0x1e0   : > { %v841_v15 = vadd.f32 %v840_v2, %v839_v55  ;;  %v848_v16 = vadd.f32 %v847_v3, %v846_v56  ;;  %v854_v19 = vrot.slane %v853_v6, 1  ;;  %v861_v20 = vrot.slane %v860_v7, 1  ;;  %p3743_p1 = pneg %p3742_p5  ;;  %p3749_p2 = por %p3748_p0, %p3747_p12 }
 0x1e1   : > { %v868_v21 = vrot.slane %v867_v8, 1  ;;  %v875_v22 = vrot.slane %v874_v9, 1  ;;  %v895_v24 = vsel %vm894_vm2, %v834_v14, %v827_v13  ;;  %v3075_v25 = vpack.c.bf16 %v1149_v4, %v4463_v61 }
 0x1e2   : > { %v3078_v26 = vpack.c.bf16 %v4467_v10, %v4465_v5  ;;  %v1083_v30 = vmul.f32 %v1082_v12, %v1073_v11  ;;  %v855_v31 = vadd.f32 %v854_v19, %v853_v6  ;;  %v862_v32 = vadd.f32 %v861_v20, %v860_v7  ;;  %p3750_p8 = pnand %p3749_p2, %p3743_p1 }
 0x1e3   : > { %v869_v33 = vadd.f32 %v868_v21, %v867_v8  ;;  %v876_v34 = vadd.f32 %v875_v22, %v874_v9  ;;  %v897_v36 = vsel %vm896_vm3, %v841_v15, %v895_v24  ;;  %v1084_v37 = vmul.f32 %v1082_v12, %v1074_v17 }
 0x1e4   : > { %v1085_v38 = vmul.f32 %v1082_v12, %v1075_v18  ;;  %v1086_v39 = vmul.f32 %v1082_v12, %v1076_v23  ;;  %v899_v40 = vsel %vm898_vm4, %v848_v16, %v897_v36  ;;  %v1087_v41 = vmul.f32 %v1082_v12, %v1077_v27  ;;  %v984_v27 = vld [vmem:[#allocation11] sm:$0xff] }
 0x1e5   : > { %v1088_v42 = vmul.f32 %v1082_v12, %v1078_v28  ;;  %v1089_v43 = vmul.f32 %v1082_v12, %v1079_v29  ;;  %v901_v44 = vsel %vm900_vm5, %v855_v31, %v899_v40  ;;  %v1090_v45 = vmul.f32 %v1082_v12, %v1080_v35  ;;  %v985_v28 = vld [vmem:[#allocation11 + $0x8] sm:$0xff] }
 0x1e6   : > { %v1091_v46 = vsel %vm820_vm1, %v1083_v30, 0.0  ;;  %v1098_v47 = vsel %vm820_vm1, %v1084_v37, 0.0  ;;  %v903_v48 = vsel %vm902_vm6, %v862_v32, %v901_v44  ;;  %v1105_v51 = vsel %vm820_vm1, %v1085_v38, 0.0 }
 0x1e7   : > { %v1092_v49 = vrot.slane %v1091_v46, 4  ;;  %v1099_v50 = vrot.slane %v1098_v47, 4  ;;  %v905_v52 = vsel %vm904_vm7, %v869_v33, %v903_v48  ;;  %v1106_v53 = vrot.slane %v1105_v51, 4 }
 0x1e8   : > { %v1112_v54 = vsel %vm820_vm1, %v1086_v39, 0.0  ;;  %v1119_v55 = vsel %vm820_vm1, %v1087_v41, 0.0  ;;  %v907_v56 = vsel %vm906_vm8, %v876_v34, %v905_v52  ;;  %v1126_v62 = vsel %vm820_vm1, %v1088_v42, 0.0 }
 0x1e9   : > { %v1093_v57 = vadd.f32 %v1092_v49, %v1091_v46  ;;  %v1100_v58 = vadd.f32 %v1099_v50, %v1098_v47  ;;  %v1113_v59 = vrot.slane %v1112_v54, 4  ;;  %2878 = vmatmul.mubr.msk.f32.vlgmr.msra.gmra.mrb[0].mxu0 %vm908_vm9, %v907_v56  ;;  %v1107_v60 = vadd.f32 %v1106_v53, %v1105_v51  ;;  %v986_v53 = vld [vmem:[#allocation11 + $0x10] sm:$0xff] }
 0x1ea   : > { %v1120_v61 = vrot.slane %v1119_v55, 4  ;;  %v1133_v63 = vsel %vm820_vm1, %v1089_v43, 0.0  ;;  %3076 = vmatpush3.bf16.msra.mxu0 %v3075_v25  ;;  %2899 = vmatprep.mubr.msk.f32.mxu0 %vm3855_vm0, %v3856_v1  ;;  %v1127_v5 = vrot.slane %v1126_v62, 4  ;;  %v1140_v9 = vsel %vm820_vm1, %v1090_v45, 0.0  ;;  %v1484_v56 = vld [vmem:[%s4413_s29] sm:$0xf] }
 0x1eb   : > { %v1094_v2 = vrot.slane %v1093_v57, 2  ;;  %v1101_v3 = vrot.slane %v1100_v58, 2  ;;  %v1114_v4 = vadd.f32 %v1113_v59, %v1112_v54  ;;  %3077 = vmatprep.subr.bf16.mxu0 %v3854_v0  ;;  %v1108_v6 = vrot.slane %v1107_v60, 2  ;;  %v987_v54 = vld [vmem:[#allocation11 + $0x18] sm:$0xff] }
 0x1ec   : > { %v1121_v7 = vadd.f32 %v1120_v61, %v1119_v55  ;;  %v1134_v8 = vrot.slane %v1133_v63, 4  ;;  %v1128_v13 = vadd.f32 %v1127_v5, %v1126_v62  ;;  %v1141_v17 = vrot.slane %v1140_v9, 4  ;;  %v1486_v59 = vld [vmem:[%s4413_s29 + $0x8] sm:$0xf]  ;;  %v1487_v62 = vld [vmem:[%s4413_s29 + $0xc] sm:$0xf] }
 0x1ed   : > { %v1095_v10 = vadd.f32 %v1094_v2, %v1093_v57  ;;  %v1102_v11 = vadd.f32 %v1101_v3, %v1100_v58  ;;  %v1115_v12 = vrot.slane %v1114_v4, 2  ;;  %v1109_v14 = vadd.f32 %v1108_v6, %v1107_v60  ;;  %v1485_v57 = vld [vmem:[%s4413_s29 + $0x4] sm:$0xf]  ;;  %v1493_v58 = vld [vmem:[#allocation8 + $0x8] sm:$0xf] }
 0x1ee   : > { %v1122_v15 = vrot.slane %v1121_v7, 2  ;;  %v1135_v16 = vadd.f32 %v1134_v8, %v1133_v63  ;;  %3079 = vmatpush3.bf16.msra.mxu0 %v3078_v26  ;;  %v1129_v21 = vrot.slane %v1128_v13, 2  ;;  %v1142_v25 = vadd.f32 %v1141_v17, %v1140_v9  ;;  %v1489_v9 = vld [vmem:[%s4413_s29 + $0x14] sm:$0xf] }
 0x1ef   : > { %v1096_v18 = vrot.slane %v1095_v10, 1  ;;  %v1103_v19 = vrot.slane %v1102_v11, 1  ;;  %v1116_v20 = vadd.f32 %v1115_v12, %v1114_v4  ;;  %v1110_v22 = vrot.slane %v1109_v14, 1  ;;  %3086 = vmatprep.subr.bf16.mxu0 %v3854_v0  ;;  %v1488_v4 = vld [vmem:[%s4413_s29 + $0x10] sm:$0xf] }
 0x1f0   : > { %v1123_v23 = vadd.f32 %v1122_v15, %v1121_v7  ;;  %v1136_v24 = vrot.slane %v1135_v16, 2  ;;  %v1130_v32 = vadd.f32 %v1129_v21, %v1128_v13  ;;  %v1143_v26 = vrot.slane %v1142_v25, 2  ;;  %v1490_v15 = vld [vmem:[%s4413_s29 + $0x18] sm:$0xf] }
 0x1f1   : > { %v1097_v29 = vadd.f32 %v1096_v18, %v1095_v10  ;;  %v1104_v30 = vadd.f32 %v1103_v19, %v1102_v11  ;;  %v1117_v31 = vrot.slane %v1116_v20, 1  ;;  %v1111_v33 = vadd.f32 %v1110_v22, %v1109_v14 }
 0x1f2   : > { %v1124_v34 = vrot.slane %v1123_v23, 1  ;;  %v1137_v35 = vadd.f32 %v1136_v24, %v1135_v16  ;;  %v1131_v37 = vrot.slane %v1130_v32, 1  ;;  %v3069_v39 = vpack.c.bf16 %v985_v28, %v984_v27 }
 0x1f3   : > { %v1118_v36 = vadd.f32 %v1117_v31, %v1116_v20  ;;  %v1165_v38 = vsel %vm894_vm2, %v1104_v30, %v1097_v29  ;;  %v1144_v42 = vadd.f32 %v1143_v26, %v1142_v25  ;;  %v3072_v55 = vpack.c.bf16 %v987_v54, %v986_v53  ;;  %v1491_v20 = vld [vmem:[%s4413_s29 + $0x1c] sm:$0xf]  ;;  %v2743_v30 = vld [vmem:[#allocation13] ss:$0 sm:$0xff]  ;;  %s2473_s29 = scalar_lea.sflag [#allocation4], %s4396_s18 }
 0x1f4   : > { %v1125_v40 = vadd.f32 %v1124_v34, %v1123_v23  ;;  %v1138_v41 = vrot.slane %v1137_v35, 1  ;;  %v1166_v43 = vsel %vm896_vm3, %v1111_v33, %v1165_v38  ;;  %v1132_v44 = vadd.f32 %v1131_v37, %v1130_v32  ;;  %3070 = vmatpush3.bf16.msra.mxu1 %v3069_v39  ;;  %v1249_v37 = vld [vmem:[#allocation11 + $0x28] sm:$0xff] }
 0x1f5   : > { %v1167_v45 = vsel %vm898_vm4, %v1118_v36, %v1166_v43  ;;  %v1145_v47 = vrot.slane %v1144_v42, 1  ;;  %3071 = vmatprep.subr.bf16.mxu1 %v3854_v0  ;;  %v1494_v60 = vmul.f32 %v1493_v58, %v1484_v56  ;;  %v1495_v61 = vmul.f32 %v1493_v58, %v1485_v57  ;;  %v1248_v36 = vld [vmem:[#allocation11 + $0x20] sm:$0xff] }
 0x1f6   : > { %v1139_v46 = vadd.f32 %v1138_v41, %v1137_v35  ;;  %v1168_v48 = vsel %vm900_vm5, %v1125_v40, %v1167_v45  ;;  %v1496_v63 = vmul.f32 %v1493_v58, %v1486_v59  ;;  %v1497_v5 = vmul.f32 %v1493_v58, %v1487_v62 }
 0x1f7   : > { %v1169_v49 = vsel %vm902_vm6, %v1132_v44, %v1168_v48  ;;  %v1146_v50 = vadd.f32 %v1145_v47, %v1144_v42  ;;  %v1502_v2 = vsel %vm820_vm1, %v1494_v60, 0.0  ;;  %v1509_v3 = vsel %vm820_vm1, %v1495_v61, 0.0 }
 0x1f8   : > { %v1170_v51 = vsel %vm904_vm7, %v1139_v46, %v1169_v49  ;;  %3073 = vmatpush3.bf16.msra.mxu1 %v3072_v55  ;;  %v1503_v6 = vrot.slane %v1502_v2, 4  ;;  %v1510_v7 = vrot.slane %v1509_v3, 4  ;;  %v1516_v8 = vsel %vm820_vm1, %v1496_v63, 0.0 }
 0x1f9   : > { %v1171_v52 = vsel %vm906_vm8, %v1146_v50, %v1170_v51  ;;  %3080 = vmatprep.subr.bf16.mxu1 %v3854_v0  ;;  %v1498_v10 = vmul.f32 %v1493_v58, %v1488_v4  ;;  %v1517_v11 = vrot.slane %v1516_v8, 4  ;;  %v1523_v12 = vsel %vm820_vm1, %v1497_v5, 0.0  ;;  %v1250_v50 = vld [vmem:[#allocation11 + $0x30] sm:$0xff]  ;;  %v1251_v51 = vld [vmem:[#allocation11 + $0x38] sm:$0xff] }
 0x1fa   : > { %2900 = vmatmul.mubr.msk.f32.vlgmr.msra.gmra.mrb[2].mxu0 %vm908_vm9, %v1171_v52  ;;  %v1504_v13 = vadd.f32 %v1503_v6, %v1502_v2  ;;  %v1511_v14 = vadd.f32 %v1510_v7, %v1509_v3  ;;  %v1499_v16 = vmul.f32 %v1493_v58, %v1489_v9  ;;  %v1524_v17 = vrot.slane %v1523_v12, 4 }
 0x1fb   : > { %2921 = vmatprep.mubr.msk.f32.mxu0 %vm3855_vm0, %v3856_v1  ;;  %v1530_v18 = vsel %vm820_vm1, %v1498_v10, 0.0  ;;  %v1518_v19 = vadd.f32 %v1517_v11, %v1516_v8  ;;  %v1500_v21 = vmul.f32 %v1493_v58, %v1490_v15  ;;  %v1501_v28 = vmul.f32 %v1493_v58, %v1491_v20 }
 0x1fc   : > { %v1505_v22 = vrot.slane %v1504_v13, 2  ;;  %v1512_v23 = vrot.slane %v1511_v14, 2  ;;  %v1531_v24 = vrot.slane %v1530_v18, 4  ;;  %v1537_v25 = vsel %vm820_vm1, %v1499_v16, 0.0 }
 0x1fd   : > { %v1525_v27 = vadd.f32 %v1524_v17, %v1523_v12  ;;  %v1519_v29 = vrot.slane %v1518_v19, 2  ;;  %v1538_v33 = vrot.slane %v1537_v25, 4  ;;  %v1544_v34 = vsel %vm820_vm1, %v1500_v21, 0.0  ;;  %v2747_v12 = vld [vmem:[#allocation13 + $0x1] ss:$0 sm:$0xff] }
 0x1fe   : > { %v1506_v31 = vadd.f32 %v1505_v22, %v1504_v13  ;;  %v1513_v32 = vadd.f32 %v1512_v23, %v1511_v14  ;;  %v1532_v35 = vadd.f32 %v1531_v24, %v1530_v18  ;;  %v1545_v42 = vrot.slane %v1544_v34, 4  ;;  %v1559_v17 = vld [vmem:[#allocation10 + $0x40] sm:$0xff]  ;;  %v1560_v18 = vld [vmem:[#allocation10 + $0x48] sm:$0xff] }
 0x1ff   : > { %v1526_v38 = vrot.slane %v1525_v27, 2  ;;  %v1520_v41 = vadd.f32 %v1519_v29, %v1518_v19  ;;  %v1551_v43 = vsel %vm820_vm1, %v1501_v28, 0.0  ;;  %v1539_v46 = vadd.f32 %v1538_v33, %v1537_v25  ;;  %v1561_v28 = vld [vmem:[#allocation10 + $0x50] sm:$0xff]  ;;  %v1562_v29 = vld [vmem:[#allocation10 + $0x58] sm:$0xff] }
 0x200   : > { %v1507_v44 = vrot.slane %v1506_v31, 1  ;;  %v1514_v45 = vrot.slane %v1513_v32, 1  ;;  %v3081_v48 = vpack.c.bf16 %v1249_v37, %v1248_v36  ;;  %v1533_v49 = vrot.slane %v1532_v35, 2  ;;  %v2751_v36 = vld [vmem:[%s4844_s1 + $0x20] sm:$0xff]  ;;  %v2752_v37 = vld [vmem:[%s4844_s1 + $0x28] sm:$0xff] }
 0x201   : > { %v1527_v52 = vadd.f32 %v1526_v38, %v1525_v27  ;;  %v1552_v53 = vrot.slane %v1551_v43, 4  ;;  %v1521_v55 = vrot.slane %v1520_v41, 1  ;;  %v1546_v56 = vadd.f32 %v1545_v42, %v1544_v34  ;;  %v1659_v42 = vld [vmem:[#allocation11 + $0x40] sm:$0xff] }
 0x202   : > { %v1508_v57 = vadd.f32 %v1507_v44, %v1506_v31  ;;  %v1515_v58 = vadd.f32 %v1514_v45, %v1513_v32  ;;  %v1540_v59 = vrot.slane %v1539_v46, 2  ;;  %v3084_v60 = vpack.c.bf16 %v1251_v51, %v1250_v50  ;;  %v1661_v45 = vld [vmem:[#allocation11 + $0x50] sm:$0xff]  ;;  %v2749_v50 = vld [vmem:[#allocation14 + $0x1] ss:$0 sm:$0xff] }
 0x203   : > { %v1534_v61 = vadd.f32 %v1533_v49, %v1532_v35  ;;  %v1528_v62 = vrot.slane %v1527_v52, 1  ;;  %v1553_v63 = vadd.f32 %v1552_v53, %v1551_v43  ;;  %v1522_v2 = vadd.f32 %v1521_v55, %v1520_v41  ;;  %v1660_v43 = vld [vmem:[#allocation11 + $0x48] sm:$0xff]  ;;  %v1070_v53 = vld [vmem:[%s4844_s1 + $0x8] sm:$0xff] }
 0x204   : > { %v1547_v3 = vrot.slane %v1546_v56, 2  ;;  %v1541_v4 = vadd.f32 %v1540_v59, %v1539_v46  ;;  %v1576_v5 = vsel %vm894_vm2, %v1515_v58, %v1508_v57  ;;  %v3099_v25 = vpack.c.bf16 %v1560_v18, %v1559_v17  ;;  %v1662_v46 = vld [vmem:[#allocation11 + $0x58] sm:$0xff]  ;;  %v1071_v59 = vld [vmem:[%s4844_s1 + $0x10] sm:$0xff]  ;;  %v1830_v17 = vld [vmem:[#allocation16 + $0x8] sm:$0xff] }
 0x205   : > { %v1535_v6 = vrot.slane %v1534_v61, 1  ;;  %v1529_v7 = vadd.f32 %v1528_v62, %v1527_v52  ;;  %v1554_v8 = vrot.slane %v1553_v63, 2  ;;  %v1577_v10 = vsel %vm896_vm3, %v1522_v2, %v1576_v5  ;;  %v1069_v52 = vld [vmem:[%s4844_s1] sm:$0xff]  ;;  %v2762_v5 = vld [vmem:[%s4844_s1 + $0x48] sm:$0xff] }
 0x206   : > { %v1548_v9 = vadd.f32 %v1547_v3, %v1546_v56  ;;  %v1542_v11 = vrot.slane %v1541_v4, 1  ;;  %v3102_v33 = vpack.c.bf16 %v1562_v29, %v1561_v28  ;;  %v3087_v38 = vpack.c.bf16 %v2752_v37, %v2751_v36  ;;  %v2745_v56 = vld [vmem:[#allocation14] ss:$0 sm:$0xff]  ;;  %v1833_v29 = vld [vmem:[#allocation16 + $0x20] sm:$0xff] }
 0x207   : > { %v1536_v13 = vadd.f32 %v1535_v6, %v1534_v61  ;;  %v1555_v14 = vadd.f32 %v1554_v8, %v1553_v63  ;;  %v1578_v15 = vsel %vm898_vm4, %v1529_v7, %v1577_v10  ;;  %v3105_v44 = vpack.c.bf16 %v1660_v43, %v1659_v42  ;;  %v2757_v63 = vld [vmem:[#allocation13 + $0x2] ss:$0 sm:$0xff] }
 0x208   : > { %v1549_v19 = vrot.slane %v1548_v9, 1  ;;  %v1543_v22 = vadd.f32 %v1542_v11, %v1541_v4  ;;  %3088 = vmatpush3.bf16.msra.mxu0 %v3087_v38  ;;  %v3093_v58 = vpack.c.bf16 %v1070_v53, %v1069_v52  ;;  %v2761_v4 = vld [vmem:[%s4844_s1 + $0x40] sm:$0xff]  ;;  %vm1835_vm2 = vcmask 392192  }
 0x209   : > { %v1579_v23 = vsel %vm900_vm5, %v1536_v13, %v1578_v15  ;;  %v1556_v27 = vrot.slane %v1555_v14, 1  ;;  %3089 = vmatprep.subr.bf16.mxu0 %v3854_v0  ;;  %v3111_v10 = vpack.c.bf16 %v2762_v5, %v2761_v4  ;;  %v2763_v13 = vld [vmem:[%s4844_s1 + $0x50] sm:$0xff]  ;;  %v2078_v5 = vld [vmem:[#allocation19 + $0x10] sm:$0xff]  ;;  %vm2079_vm5 = vcmask 195584  }
 0x20a   : > { %v1580_v32 = vsel %vm902_vm6, %v1543_v22, %v1579_v23 }
 0x20b   : > { %v1557_v34 = vadd.f32 %v1556_v27, %v1555_v14  ;;  %v2764_v14 = vld [vmem:[%s4844_s1 + $0x58] sm:$0xff]  ;;  %v1832_v27 = vld [vmem:[#allocation16 + $0x18] sm:$0xff] }
 0x20c   : > { %v3114_v15 = vpack.c.bf16 %v2764_v14, %v2763_v13  ;;  %v2156_v13 = vld [vmem:[#allocation20] sm:$0xff]  ;;  %v2157_v14 = vld [vmem:[#allocation20 + $0x8] sm:$0xff] }
 0x2bc   : > { %v977_v26 = vpop.f32.mrb[0].mxu0 }
 0x2bd   : > { %v978_v39 = vadd.f32 %v2743_v30, %v977_v26  ;;  %v2879_v40 = vpop.f32.mrb[1].mxu0  ;;  %v1550_v30 = vadd.f32 %v1549_v19, %v1548_v9  ;;  %v2759_v19 = vld [vmem:[#allocation14 + $0x2] ss:$0 sm:$0xff] }
 0x2be   : > { %v2754_v40 = vld [vmem:[%s4844_s1 + $0x38] sm:$0xff] }
 0x2bf   : > { %vm981_vm10 = vcmp.ge.f32.partialorder %v978_v39, 0.0  ;;  %v982_v47 = vmul.f32 0.25, %v978_v39  ;;  %v1581_v35 = vsel %vm904_vm7, %v1550_v30, %v1580_v32  ;;  %v1834_v30 = vld [vmem:[#allocation16 + $0x28] sm:$0xff]  ;;  %v1912_v32 = vld [vmem:[#allocation17] sm:$0xff] }
 0x2c0   : > { %v1582_v26 = vsel %vm906_vm8, %v1557_v34, %v1581_v35  ;;  %v1914_v34 = vld [vmem:[#allocation17 + $0x10] sm:$0xff] }
 0x2c1   : > { %v983_v54 = vsel %vm981_vm10, %v978_v39, %v982_v47  ;;  %v2753_v39 = vld [vmem:[%s4844_s1 + $0x30] sm:$0xff]  ;;  %v3108_v47 = vpack.c.bf16 %v1662_v46, %v1661_v45 }
 0x2c2   : > { %2889 = vmatmul.mubr.msk.f32.vlgmr.msra.gmra.mrb[0].mxu1 %vm908_vm9, %v983_v54  ;;  %v3090_v41 = vpack.c.bf16 %v2754_v40, %v2753_v39  ;;  %v1917_v45 = vld [vmem:[#allocation17 + $0x28] sm:$0xff] }
 0x2c3   : > { %3082 = vmatpush3.bf16.msra.mxu1 %v3081_v48  ;;  %2910 = vmatprep.mubr.msk.f32.mxu1 %vm3855_vm0, %v3856_v1 }
 0x2c4   : > { %3083 = vmatprep.subr.bf16.mxu1 %v3854_v0  ;;  %3091 = vmatpush3.bf16.msra.mxu0 %v3090_v41 }
 0x2c5   : > { %3092 = vmatprep.subr.bf16.mxu0 %v3854_v0 }
 0x2c7   : > { %3085 = vmatpush3.bf16.msra.mxu1 %v3084_v60  ;;  %v1072_v60 = vld [vmem:[%s4844_s1 + $0x18] sm:$0xff] }
 0x2c8   : > { %3098 = vmatprep.subr.bf16.mxu1 %v3854_v0  ;;  %v3096_v2 = vpack.c.bf16 %v1072_v60, %v1071_v59  ;;  %v1996_v59 = vld [vmem:[%s4845_s21 + $0x28] sm:$0xff] }
 0x2cd   : > { %v1240_v16 = vpop.f32.mrb[2].mxu0 }
 0x2ce   : > { %v1241_v20 = vadd.f32 %v2747_v12, %v1240_v16  ;;  %v2901_v21 = vpop.f32.mrb[3].mxu0  ;;  %v1829_v16 = vld [vmem:[#allocation16] sm:$0xff] }
 0x2cf   : > { %v3117_v18 = vpack.c.bf16 %v1830_v17, %v1829_v16  ;;  %v2158_v16 = vld [vmem:[#allocation20 + $0x10] sm:$0xff]  ;;  %v2232_v17 = vld [vmem:[#allocation22] sm:$0xff] }
 0x2d0   : > { %vm1244_vm11 = vcmp.ge.f32.partialorder %v1241_v20, 0.0  ;;  %v1245_v24 = vmul.f32 0.25, %v1241_v20 }
 0x2d2   : > { %v1246_v31 = vsel %vm1244_vm11, %v1241_v20, %v1245_v24 }
 0x2d3   : > { %2911 = vmatmul.mubr.msk.f32.vlgmr.msra.gmra.mrb[2].mxu1 %vm908_vm9, %v1246_v31  ;;  %v3123_v31 = vpack.c.bf16 %v1834_v30, %v1833_v29  ;;  %v2314_v30 = vld [vmem:[%s4846_s5] sm:$0xff] }
 0x2d4   : > { %3100 = vmatpush3.bf16.msra.mxu1 %v3099_v25  ;;  %2943 = vmatprep.mubr.msk.f32.mxu1 %vm3855_vm0, %v3856_v1  ;;  %v1831_v25 = vld [vmem:[#allocation16 + $0x10] sm:$0xff] }
 0x2d5   : > { %3101 = vmatprep.subr.bf16.mxu1 %v3854_v0  ;;  %v3120_v28 = vpack.c.bf16 %v1832_v27, %v1831_v25  ;;  %v2234_v25 = vld [vmem:[#allocation22 + $0x10] sm:$0xff] }
 0x2d8   : > { %3103 = vmatpush3.bf16.msra.mxu1 %v3102_v33  ;;  %v1913_v33 = vld [vmem:[#allocation17 + $0x8] sm:$0xff] }
 0x2d9   : > { %3104 = vmatprep.subr.bf16.mxu1 %v3854_v0  ;;  %v3126_v35 = vpack.c.bf16 %v1913_v33, %v1912_v32  ;;  %v2316_v33 = vld [vmem:[%s4846_s5 + $0x10] sm:$0xff] }
 0x2db   : > { %2944 = vmatmul.mubr.msk.f32.vlgmr.msra.gmra.mrb[4].mxu1 %vm908_vm9, %v1582_v26  ;;  %v1915_v26 = vld [vmem:[#allocation17 + $0x18] sm:$0xff] }
 0x2dc   : > { %2954 = vmatprep.mubr.msk.f32.mxu1 %vm3855_vm0, %v3856_v1  ;;  %3106 = vmatpush3.bf16.msra.mxu1 %v3105_v44  ;;  %v3129_v36 = vpack.c.bf16 %v1915_v26, %v1914_v34  ;;  %v1916_v44 = vld [vmem:[#allocation17 + $0x20] sm:$0xff] }
 0x2dd   : > { %3107 = vmatprep.subr.bf16.mxu1 %v3854_v0  ;;  %v3132_v46 = vpack.c.bf16 %v1917_v45, %v1916_v44  ;;  %v2395_v26 = vld [vmem:[#allocation23 + $0x8] sm:$0xff]  ;;  %v2396_v44 = vld [vmem:[#allocation23 + $0x10] sm:$0xff]  ;;  %v2397_v45 = vld [vmem:[#allocation23 + $0x18] sm:$0xff] }
 0x2e0   : > { %3109 = vmatpush3.bf16.msra.mxu1 %v3108_v47  ;;  %v1991_v47 = vld [vmem:[%s4845_s21] sm:$0xff] }
 0x2e1   : > { %3116 = vmatprep.subr.bf16.mxu1 %v3854_v0 }
 0x395   : > { %v1062_v48 = vpop.f32.mrb[0].mxu1 }
 0x396   : > { %v2890_v49 = vpop.f32.mrb[1].mxu1  ;;  %v1063_v61 = vadd.f32 %v2745_v56, %v1062_v48  ;;  %v1992_v48 = vld [vmem:[%s4845_s21 + $0x8] sm:$0xff] }
 0x397   : > { %v1993_v49 = vld [vmem:[%s4845_s21 + $0x10] sm:$0xff] }
 0x398   : > { %v1067_v6 = vmul.f32 0.25, %v1063_v61  ;;  %vm1066_vm13 = vcmp.ge.f32.partialorder %v1063_v61, 0.0 }
 0x39a   : > { %v1068_v11 = vsel %vm1066_vm13, %v1063_v61, %v1067_v6 }
 0x3a6   : > { %v1326_v51 = vpop.f32.mrb[2].mxu1 }
 0x3a7   : > { %v1327_v54 = vadd.f32 %v2749_v50, %v1326_v51  ;;  %v2912_v55 = vpop.f32.mrb[3].mxu1  ;;  %v3135_v50 = vpack.c.bf16 %v1992_v48, %v1991_v47  ;;  %v1994_v51 = vld [vmem:[%s4845_s21 + $0x18] sm:$0xff] }
 0x3a8   : > { %v3138_v52 = vpack.c.bf16 %v1994_v51, %v1993_v49 }
 0x3a9   : > { %vm1330_vm12 = vcmp.ge.f32.partialorder %v1327_v54, 0.0  ;;  %v1331_v57 = vmul.f32 0.25, %v1327_v54 }
 0x3ab   : > { %v1332_v62 = vsel %vm1330_vm12, %v1327_v54, %v1331_v57 }
 0x3ac   : > { %2922 = vmatmul.mubr.msk.f32.vlgmr.msra.gmra.mrb[4].mxu0 %vm908_vm9, %v1332_v62 }
 0x3ad   : > { %3094 = vmatpush3.bf16.msra.mxu0 %v3093_v58  ;;  %2932 = vmatprep.mubr.msk.f32.mxu0 %vm3855_vm0, %v3856_v1  ;;  %v1995_v58 = vld [vmem:[%s4845_s21 + $0x20] sm:$0xff] }
 0x3ae   : > { %v1651_v3 = vpop.f32.mrb[4].mxu1  ;;  %3095 = vmatprep.subr.bf16.mxu0 %v3854_v0  ;;  %v3141_v60 = vpack.c.bf16 %v1996_v59, %v1995_v58 }
 0x3af   : > { %v1652_v7 = vadd.f32 %v2757_v63, %v1651_v3  ;;  %v2945_v8 = vpop.f32.mrb[5].mxu1  ;;  %v2077_v3 = vld [vmem:[#allocation19 + $0x8] sm:$0xff] }
 0x3b1   : > { %vm1655_vm14 = vcmp.ge.f32.partialorder %v1652_v7, 0.0  ;;  %v1656_v9 = vmul.f32 0.25, %v1652_v7  ;;  %3097 = vmatpush3.bf16.msra.mxu0 %v3096_v2  ;;  %v2076_v2 = vld [vmem:[#allocation19] sm:$0xff] }
 0x3b2   : > { %3110 = vmatprep.subr.bf16.mxu0 %v3854_v0  ;;  %v3144_v4 = vpack.c.bf16 %v2077_v3, %v2076_v2 }
 0x3b3   : > { %v1657_v12 = vsel %vm1655_vm14, %v1652_v7, %v1656_v9 }
 0x3b4   : > { %2933 = vmatmul.mubr.msk.f32.vlgmr.msra.gmra.mrb[4].mxu0 %vm908_vm9, %v1068_v11  ;;  %2955 = vmatmul.mubr.msk.f32.vlgmr.msra.gmra.mrb[6].mxu1 %vm908_vm9, %v1657_v12 }
 0x3b5   : > { %3112 = vmatpush3.bf16.msra.mxu0 %v3111_v10  ;;  %2965 = vmatprep.mubr.msk.f32.mxu0 %vm3855_vm0, %v3856_v1 }
 0x3b6   : > { %3113 = vmatprep.subr.bf16.mxu0 %v3854_v0  ;;  %2980 = vmatprep.mubr.msk.f32.mxu1 %vm3855_vm0, %v3856_v1 }
 0x3b7   : > { %3118 = vmatpush3.bf16.msra.mxu1 %v3117_v18  ;;  %v2233_v18 = vld [vmem:[#allocation22 + $0x8] sm:$0xff] }
 0x3b8   : > { %3119 = vmatprep.subr.bf16.mxu1 %v3854_v0 }
 0x3b9   : > { %3115 = vmatpush3.bf16.msra.mxu0 %v3114_v15  ;;  %v3147_v15 = vpack.c.bf16 %v2157_v14, %v2156_v13 }
 0x3ba   : > { %3125 = vmatprep.subr.bf16.mxu0 %v3854_v0 }
 0x3bb   : > { %3121 = vmatpush3.bf16.msra.mxu1 %v3120_v28 }
 0x3bc   : > { %3122 = vmatprep.subr.bf16.mxu1 %v3854_v0 }
 0x3bf   : > { %3124 = vmatpush3.bf16.msra.mxu1 %v3123_v31  ;;  %v2315_v31 = vld [vmem:[%s4846_s5 + $0x8] sm:$0xff] }
 0x3c0   : > { %3134 = vmatprep.subr.bf16.mxu1 %v3854_v0  ;;  %v3153_v32 = vpack.c.bf16 %v2315_v31, %v2314_v30 }
 0x487   : > { %v1737_v20 = vpop.f32.mrb[6].mxu1 }
 0x488   : > { %v1738_v21 = vadd.f32 %v2759_v19, %v1737_v20  ;;  %v2956_v22 = vpop.f32.mrb[7].mxu1  ;;  %v3150_v19 = vpack.c.bf16 %v2233_v18, %v2232_v17 }
 0x48a   : > { %vm1741_vm15 = vcmp.ge.f32.partialorder %v1738_v21, 0.0  ;;  %v1742_v23 = vmul.f32 0.25, %v1738_v21 }
 0x48c   : > { %v1743_v24 = vsel %vm1741_vm15, %v1738_v21, %v1742_v23 }
 0x48d   : > { %2966 = vmatmul.mubr.msk.f32.vlgmr.msra.gmra.mrb[4].mxu0 %vm908_vm9, %v1743_v24 }
 0x48e   : > { %2995 = vmatprep.mubr.msk.f32.mxu0 %vm3855_vm0, %v3856_v1  ;;  %3127 = vmatpush3.bf16.msra.mxu0 %v3126_v35  ;;  %v2394_v35 = vld [vmem:[#allocation23] sm:$0xff] }
 0x48f   : > { %3128 = vmatprep.subr.bf16.mxu0 %v3854_v0 }
 0x492   : > { %3130 = vmatpush3.bf16.msra.mxu0 %v3129_v36  ;;  %v3159_v36 = vpack.c.bf16 %v2395_v26, %v2394_v35 }
 0x493   : > { %3131 = vmatprep.subr.bf16.mxu0 %v3854_v0 }
 0x496   : > { %3133 = vmatpush3.bf16.msra.mxu0 %v3132_v46  ;;  %v3162_v46 = vpack.c.bf16 %v2397_v45, %v2396_v44 }
 0x497   : > { %3143 = vmatprep.subr.bf16.mxu0 %v3854_v0 }
 0x560   : > { %v1818_v37 = vpop.f32.mrb[4].mxu0 }
 0x561   : > { %vm1823_vm1 = vcmp.ge.f32.partialorder %v1818_v37, 0.0  ;;  %v1824_v38 = vmul.f32 0.25, %v1818_v37  ;;  %v2967_v39 = vpop.f32.mrb[5].mxu0  ;;  %v1827_v42 = vmul.f32 0.5, %v1818_v37 }
 0x563   : > { %v1825_v40 = vsel %vm1823_vm1, %v1818_v37, %v1824_v38 }
 0x564   : > { %v1826_v41 = vmul.f32 0.5, %v1825_v40 }
 0x566   : > { %v1828_v43 = vadd.f32 %v1827_v42, %v1826_v41 }
 0x568   : > { %2981 = vmatmul.mubr.msk.f32.vlgmr.msra.gmra.mrb[8].mxu1 %vm1835_vm2, %v1828_v43 }
 0x569   : > { %3010 = vmatprep.mubr.msk.f32.mxu1 %vm3855_vm0, %v3856_v1  ;;  %3136 = vmatpush3.bf16.msra.mxu1 %v3135_v50 }
 0x56a   : > { %3137 = vmatprep.subr.bf16.mxu1 %v3854_v0 }
 0x56d   : > { %3139 = vmatpush3.bf16.msra.mxu1 %v3138_v52 }
 0x56e   : > { %3140 = vmatprep.subr.bf16.mxu1 %v3854_v0 }
 0x571   : > { %3142 = vmatpush3.bf16.msra.mxu1 %v3141_v60 }
 0x572   : > { %3146 = vmatprep.subr.bf16.mxu1 %v3854_v0 }
 0x63b   : > { %v1905_v53 = vpop.f32.mrb[8].mxu1 }
 0x63c   : > { %v1906_v54 = vadd.f32 %v1905_v53, %v1825_v40  ;;  %v2982_v55 = vpop.f32.mrb[9].mxu1 }
 0x63e   : > { %vm1909_vm3 = vcmp.ge.f32.partialorder %v1906_v54, 0.0  ;;  %v1910_v56 = vmul.f32 0.25, %v1906_v54 }
 0x640   : > { %v1911_v57 = vsel %vm1909_vm3, %v1906_v54, %v1910_v56 }
 0x641   : > { %2996 = vmatmul.mubr.msk.f32.vlgmr.msra.gmra.mrb[6].mxu0 %vm1835_vm2, %v1911_v57 }
 0x642   : > { %3019 = vmatprep.mubr.msk.f32.mxu0 %vm3855_vm0, %v3856_v1  ;;  %3145 = vmatpush3.bf16.msra.mxu0 %v3144_v4 }
 0x643   : > { %3017 = vmatprep.subr.mxu0 %v3856_v1 }
 0x646   : > { %3018 = vmatpush3.msra.mxu0 %v2078_v5 }
 0x647   : > { %3149 = vmatprep.subr.bf16.mxu0 %v3854_v0 }
 0x714   : > { %v1987_v61 = vpop.f32.mrb[6].mxu0 }
 0x715   : > { %v1988_v62 = vadd.f32 %v1987_v61, %v1911_v57  ;;  %v2997_v63 = vpop.f32.mrb[7].mxu0 }
 0x717   : > { %3011 = vmatmul.mubr.msk.f32.vlgmr.msra.gmra.mrb[10].mxu1 %vm1835_vm2, %v1988_v62 }
 0x718   : > { %3028 = vmatprep.mubr.msk.f32.mxu1 %vm3855_vm0, %v3856_v1  ;;  %3148 = vmatpush3.bf16.msra.mxu1 %v3147_v15 }
 0x719   : > { %3026 = vmatprep.subr.mxu1 %v3856_v1 }
 0x71c   : > { %3027 = vmatpush3.msra.mxu1 %v2158_v16 }
 0x71d   : > { %3152 = vmatprep.subr.bf16.mxu1 %v3854_v0 }
 0x7ea   : > { %v2066_v6 = vpop.f32.mrb[10].mxu1 }
 0x7eb   : > { %vm2070_vm4 = vcmp.ge.f32.partialorder %v2066_v6, 0.0  ;;  %v2071_v7 = vmul.f32 0.25, %v2066_v6  ;;  %v3012_v8 = vpop.f32.mrb[11].mxu1  ;;  %v2074_v11 = vmul.f32 0.5, %v2066_v6 }
 0x7ed   : > { %v2072_v9 = vsel %vm2070_vm4, %v2066_v6, %v2071_v7 }
 0x7ee   : > { %v2073_v10 = vmul.f32 0.5, %v2072_v9 }
 0x7f0   : > { %v2075_v12 = vadd.f32 %v2074_v11, %v2073_v10 }
 0x7f2   : > { %3020 = vmatmul.mubr.msk.f32.vlgmr.msra.gmra.mrb[8].mxu0 %vm2079_vm5, %v2075_v12 }
 0x7f3   : > { %3037 = vmatprep.mubr.msk.f32.mxu0 %vm3855_vm0, %v3856_v1  ;;  %3151 = vmatpush3.bf16.msra.mxu0 %v3150_v19 }
 0x7f4   : > { %3035 = vmatprep.subr.mxu0 %v3856_v1 }
 0x7f7   : > { %3036 = vmatpush3.msra.mxu0 %v2234_v25 }
 0x7f8   : > { %3158 = vmatprep.subr.bf16.mxu0 %v3854_v0 }
 0x8c5   : > { %v2149_v20 = vpop.f32.mrb[8].mxu0 }
 0x8c6   : > { %v2150_v21 = vadd.f32 %v2149_v20, %v2072_v9  ;;  %v3021_v22 = vpop.f32.mrb[9].mxu0 }
 0x8c8   : > { %vm2153_vm6 = vcmp.ge.f32.partialorder %v2150_v21, 0.0  ;;  %v2154_v23 = vmul.f32 0.25, %v2150_v21 }
 0x8ca   : > { %v2155_v24 = vsel %vm2153_vm6, %v2150_v21, %v2154_v23 }
 0x8cb   : > { %3029 = vmatmul.mubr.msk.f32.vlgmr.msra.gmra.mrb[12].mxu1 %vm2079_vm5, %v2155_v24 }
 0x8cc   : > { %3048 = vmatprep.mubr.msk.f32.mxu1 %vm3855_vm0, %v3856_v1  ;;  %3154 = vmatpush3.bf16.msra.mxu1 %v3153_v32 }
 0x8cd   : > { %3155 = vmatprep.subr.bf16.mxu1 %v3854_v0 }
 0x99e   : > { %v2228_v27 = vpop.f32.mrb[12].mxu1 }
 0x99f   : > { %v2229_v28 = vadd.f32 %v2228_v27, %v2155_v24  ;;  %v3030_v29 = vpop.f32.mrb[13].mxu1 }
 0x9a1   : > { %3038 = vmatmul.mubr.msk.f32.vlgmr.msra.gmra.mrb[10].mxu0 %vm2079_vm5, %v2229_v28 }
 0x9a2   : > { %3059 = vmatprep.mubr.msk.f32.mxu0 %vm3855_vm0, %v3856_v1  ;;  %v2317_v1 = vld [vmem:[%s4846_s5 + $0x18] sm:$0xff]  ;;  %3160 = vmatpush3.bf16.msra.mxu0 %v3159_v36 }
 0x9a3   : > { %v3156_v34 = vpack.c.bf16 %v2317_v1, %v2316_v33  ;;  %3161 = vmatprep.subr.bf16.mxu0 %v3854_v0 }
 0x9a5   : > { %3157 = vmatpush3.bf16.msra.mxu1 %v3156_v34 }
 0x9a6   : > { %3163 = vmatpush3.bf16.msra.mxu0 %v3162_v46 }
 0xa74   : > { %v2304_v37 = vpop.f32.mrb[10].mxu0 }
 0xa75   : > { %vm2308_vm0 = vcmp.ge.f32.partialorder %v2304_v37, 0.0  ;;  %v2309_v38 = vmul.f32 0.25, %v2304_v37  ;;  %v3039_v39 = vpop.f32.mrb[11].mxu0  ;;  %v2312_v42 = vmul.f32 0.5, %v2304_v37 }
 0xa77   : > { %v2310_v40 = vsel %vm2308_vm0, %v2304_v37, %v2309_v38 }
 0xa78   : > { %v2311_v41 = vmul.f32 0.5, %v2310_v40 }
 0xa7a   : > { %v2313_v43 = vadd.f32 %v2312_v42, %v2311_v41 }
 0xa7c   : > { %3049 = vmatmul.mubr.msk.f32.vlgmr.msra.gmra.mrb[14].mxu1 %vm908_vm9, %v2313_v43 }
 0xb4f   : > { %v2387_v47 = vpop.f32.mrb[14].mxu1 }
 0xb50   : > { %v2388_v48 = vadd.f32 %v2387_v47, %v2310_v40  ;;  %v3050_v0 = vpop.f32.mrb[15].mxu1 }
 0xb52   : > { %vm2391_vm7 = vcmp.ge.f32.partialorder %v2388_v48, 0.0  ;;  %v2392_v49 = vmul.f32 0.25, %v2388_v48 }
 0xb54   : > { %v2393_v50 = vsel %vm2391_vm7, %v2388_v48, %v2392_v49 }
 0xb55   : > { %3060 = vmatmul.mubr.msk.f32.vlgmr.msra.gmra.mrb[12].mxu0 %vm908_vm9, %v2393_v50 }
 0xc28   : > { %v2467_v51 = vpop.f32.mrb[12].mxu0 }
 0xc29   : > { %2471 = vst [vmem:[%s799_s13] sm:$0xff] %v2467_v51  ;;  %v3061_v52 = vpop.f32.mrb[13].mxu0 }
 0xc2a   : > { %3753 = shalt.err (!%p3750_p8)
}
 0xc2b   : > { %s3754_s18 = scalar_lea.hbm %s4678_s15, 128  ;;  %s3758_s23 = scalar_lea.hbm %s4848_s10, 256 }
 0xc2c   : > { %p3755_p11 = scmp.ne.s32.totalorder %s4678_s15, %s3754_s18  ;;  %p3759_p10 = scmp.lt.u32.totalorder %s4678_s15, %s4848_s10 }
 0xc2d   : > { %p3760_p9 = scmp.lt.u32.totalorder %s3758_s23, %s3754_s18  ;;  %p3762_p6 = scmp.lt.u32.totalorder %s3754_s18, %s4678_s15 }
 0xc2e   : > { %p3756_p3 = pnand %p3755_p11, %p4849_p13 }
 0xc2f   : > { %p3761_p4 = por %p3760_p9, %p3759_p10 }
 0xc30   : > { %p3757_p7 = pneg %p3756_p3 }
 0xc31   : > { %p3763_p5 = por %p3762_p6, %p3761_p4 }
 0xc33   : > { %p3764_p1 = pnand %p3763_p5, %p3757_p7 }
 0xc35   : > { %3767 = shalt.err (!%p3764_p1)
}
 0xc36   : > { %3218 = dma.vmem_to_hbm [thread:$0]  (%p4849_p13), %s4673_s17, 128, %s4678_s15, %s2473_s29  }
 0xc37 PF: > { %s4850_s13 = sld [smem:[#allocation35_spill]]  ;;  %s4851_s3 = sld [smem:[#allocation42_spill]] }
 0xc38   : > { %s4852_s16 = sld [smem:[#allocation36_spill]] }
 0xc3d   : > { %s2498_s7 = sand.u32 1, %s4850_s13   ;;  %p4853_p12 = scmp.ne.s32.totalorder %s4851_s3, 0 }
 0xc3e   : > { %p4854_p0 = scmp.ge.s32.totalorder %s4852_s16, 2  ;;  %s2499_s19 = scalar_lea.sflag [#allocation4], %s2498_s7 }
 0xc40   : > { %p3265_p2 = pnand %p4854_p0, %p4853_p12 }
 0xc42   : > { %3817 = dma.done.wait (!%p3265_p2), %s2499_s19, 128  }
 0xc43   : > { %3819 = vsyncadd (!%p3265_p2), %s2499_s19, 4294967168  ;;  %s4855_s27 = sld [smem:[#allocation39_spill]]  ;;  %s4856_s8 = sld [smem:[#allocation40_spill]] }
 0xc44   : > { %s4857_s24 = smov %s3826_s25  ;;  %s4858_s25 = smov %s3830_s26 }
 0xc49   : > { %p39_p8 = scmp.ge.s32.totalorder %s4855_s27, 4   ;;  %s4859_s26 = smov %s4856_s8 }
 0xc4b   :  { %41 = sbr.rel (!%p39_p8) target bundleno = 28 (0x1c), region = 209 }
 0xc52   :  { %2504 = vsyncpa [#allocation3], 1 }
 0xc53   :  { %2506 = vsyncpa [#allocation3 + $0x1], 1 }
 0xc54   :  { %2507 = vsyncpa [#allocation6], 1 }
 0xc55   :  { %2509 = vsyncpa [#allocation6 + $0x1], 1 }
 0xc56   :  { %2510 = vsyncpa [#allocation9], 1 }
 0xc57   :  { %2511 = vsyncpa [#allocation12], 1 }
 0xc58   :  { %2512 = vsyncpa [#allocation15], 1 }
 0xc59   :  { %2513 = vsyncpa [#allocation18], 1 }
 0xc5a   :  { %2514 = vsyncpa [#allocation21], 1 }
 0xc5b   :  { %2515 = vsyncpa [#allocation24], 1 }
 0xc5c   :  { %2516 = vsyncpa [#allocation4], 1 }
 0xc5d   :  { %2518 = vsyncpa [#allocation4 + $0x1], 1 }

</bundles_post_ra>
